<compile_context>
chip_gen: v6e
topology: v6e:2x2x1
jax: 0.10.0
libtpu: 0.0.40
codegen_flags: <defaults>
</compile_context>

<pallas_src>
import functools

import numpy as np
import jax
import jax.numpy as jnp
from jax.experimental import pallas as pl
from jax.experimental.pallas import tpu as pltpu


# ----------------------------- in-kernel math helpers -----------------------------

def _erf(x):
    # Abramowitz & Stegun 7.1.26 (max abs err ~1.5e-7); divide goes to the EUP slot.
    a1, a2, a3, a4, a5 = 0.254829592, -0.284496736, 1.421413741, -1.453152027, 1.061405429
    p = 0.3275911
    ax = jnp.abs(x)
    t = pl.reciprocal(1.0 + p * ax, approx=True)
    poly = ((((a5 * t + a4) * t + a3) * t + a2) * t + a1) * t
    y = 1.0 - poly * jnp.exp(-ax * ax)
    return jnp.where(x >= 0, y, -y)


def _gelu(x):
    return 0.5 * x * (1.0 + _erf(x * 0.7071067811865476))


def _mac(w, x, bias=None):
    """Tiny unrolled VPU MAC for the (.,1)-wide reweight MLP (MXU not worth it at N=1)."""
    cin = w.shape[1]
    acc = w[:, 0:1] * x[0:1, :]
    for ci in range(1, cin):
        acc = acc + w[:, ci:ci + 1] * x[ci:ci + 1, :]
    if bias is not None:
        acc = acc + bias
    return acc


# ----------------------------- the single fused kernel -----------------------------

def _make_kernel(dim, sC, HW, off33, off37, off73):

    def dwconv(x, taps_ref, offsets):
        """Depthwise conv on the flat token axis.  taps_ref: (ntaps, C, HW) tap planes with the
        boundary-validity mask pre-folded in, so each tap is one mul + one add of a static
        slice of a zero-padded token vector."""
        nch = x.shape[0]
        margin = max(1, max(abs(d) for d in offsets))
        pad = jnp.zeros((nch, margin), jnp.float32)
        xp = jnp.concatenate([pad, x, pad], axis=-1)
        acc = None
        for t, d in enumerate(offsets):
            term = taps_ref[t] * xp[:, margin + d: margin + d + HW]
            acc = term if acc is None else acc + term
        return acc

    def strip_mix(y, B_ref, bias_ref, gsel_ref):
        """Grouped (1,3) strip conv expressed as per-group (dim,HW)x(HW,HW) MXU matmuls over the
        flat token axis; channel c keeps the result of its group g = c % sC via the selector."""
        out = None
        for g in range(sC):
            og = jnp.dot(y, B_ref[g], preferred_element_type=jnp.float32) + bias_ref[g]
            og = og * gsel_ref[g]
            out = og if out is None else out + og
        return out

    def kernel(x_ref, s0_ref, b0_ref, dwt_ref, wm_ref, bm_ref, posh_ref,
               fcht_ref, fcwt_ref, rw1w_ref, rw1b_ref, rw2w_ref, rw2b_ref,
               gsel_ref, B1_ref, bf1_ref, wfh_ref, bfh_ref, posw_ref,
               B2_ref, bf2_ref, wfw_ref, wf_ref, o_ref):
        f32 = jnp.float32
        x = x_ref[0]                                               # (C, HW), tokens on lanes

        # ---- dwsc: BN(folded) -> GELU -> depthwise 3x3 ----
        a = _gelu(x * s0_ref[...] + b0_ref[...])
        xdw = dwconv(a, dwt_ref, off33)

        # ---- smlp.mlp: 1x1 conv (MXU) + bias (BN folded) -> GELU; channel split ----
        m = _gelu(jnp.dot(wm_ref[...], xdw, preferred_element_type=f32) + bm_ref[...])
        x1 = m[:dim, :]
        x2 = m[dim:, :]

        # ---- attention branch on x2: fc_h (3,7), fc_w (7,3), pool, reweight MLP, softmax ----
        x_w_br = dwconv(x2, fcht_ref, off37)                       # torch fc_h
        x_h_br = dwconv(x2, fcwt_ref, off73)                       # torch fc_w
        pooled = jnp.mean(x_h_br + x_w_br + x2, axis=1, keepdims=True)
        h1 = _gelu(_mac(rw1w_ref[...], pooled, rw1b_ref[...]))
        logits = _mac(rw2w_ref[...], h1, rw2b_ref[...])            # rows = j*dim + c
        l0 = logits[:dim, :]
        l1 = logits[dim:2 * dim, :]
        l2 = logits[2 * dim:, :]
        mx = jnp.maximum(jnp.maximum(l0, l1), l2)
        e0 = jnp.exp(l0 - mx)
        e1 = jnp.exp(l1 - mx)
        e2 = jnp.exp(l2 - mx)
        inv = pl.reciprocal(e0 + e1 + e2, approx=True)
        x2n = x_h_br * (e0 * inv) + x_w_br * (e1 * inv) + x2 * (e2 * inv)

        # ---- sparse_mlp on x1 (window partition / restore are identity at H == W == unit) ----
        yh = x1 + posh_ref[...]                                    # core + pos_h
        xh = strip_mix(yh, B1_ref, bf1_ref, gsel_ref)              # proj_h: mix along W
        xh2 = _gelu(jnp.dot(wfh_ref[...], jnp.concatenate([xh, x1], axis=0),
                            preferred_element_type=f32) + bfh_ref[...]) + posw_ref[...]
        xw = strip_mix(xh2, B2_ref, bf2_ref, gsel_ref)             # proh_w: mix along H
        x1o = jnp.dot(wfw_ref[...], jnp.concatenate([x1, xw], axis=0),
                      preferred_element_type=f32)                  # fuse_w
        o_ref[0] = jnp.dot(wf_ref[...], jnp.concatenate([x1o, x2n], axis=0),
                           preferred_element_type=f32)             # fuse

    return kernel


# ----------------------------- host-side constant helpers -----------------------------

def _tap_masks(H, W, kh, kw, ph, pw):
    """Boundary-validity masks (folded into the tap weights) and flat-token offsets."""
    hh, ww = np.meshgrid(np.arange(H), np.arange(W), indexing="ij")
    masks, offsets = [], []
    for i in range(kh):
        for j in range(kw):
            di, dj = i - ph, j - pw
            valid = (hh + di >= 0) & (hh + di < H) & (ww + dj >= 0) & (ww + dj < W)
            masks.append(valid.reshape(-1).astype(np.float32))
            offsets.append(di * W + dj)
    return np.stack(masks), tuple(offsets)


def relative_position(table, length_q, length_k, max_rel):
    rq = jnp.arange(length_q)
    rk = jnp.arange(length_k)
    idx = jnp.clip(rk[None, :] - rq[:, None], -max_rel, max_rel) + max_rel
    emb = table[idx]                                               # (lq, lk, dim) gather = glue
    return jnp.transpose(emb, (2, 0, 1)).reshape(table.shape[1], length_q * length_k)


# ----------------------------- parameters -----------------------------

def init_params(key, C, H, W):
    dim = C // 2
    sC = C // 4
    hid = dim // 2
    ks = iter(jax.random.split(key, 64))

    def nrm(shape, std=0.1):
        return std * jax.random.normal(next(ks), shape, dtype=jnp.float32)

    def bn(ch):
        return dict(gamma=1.0 + nrm((ch,), 0.1), beta=nrm((ch,), 0.1),
                    mean=nrm((ch,), 0.1),
                    var=0.5 + jax.random.uniform(next(ks), (ch,), dtype=jnp.float32))

    p = {}
    p['bn0'] = bn(C)                       # DepthWise_Conv: BN -> GELU -> dw 3x3 (no bias)
    p['dw_w'] = nrm((C, 3, 3))
    p['mlp_w'] = nrm((C, C))               # smlp.mlp: 1x1(C->C, bias) -> BN -> GELU
    p['mlp_b'] = nrm((C,))
    p['bn_mlp'] = bn(C)
    p['proj_h_w'] = nrm((sC * H, W, 3))    # grouped (1,3) strip convs, groups = sC, with bias
    p['proj_h_b'] = nrm((sC * H,))
    p['proh_w_w'] = nrm((sC * W, H, 3))
    p['proh_w_b'] = nrm((sC * W,))
    p['w_fuse_h'] = nrm((dim, C))          # 1x1 fuse convs (no bias)
    p['w_fuse_w'] = nrm((dim, C))
    p['w_fuse'] = nrm((C, C))
    p['bn_s'] = bn(dim)
    p['fc_h_w'] = nrm((dim, 3, 7))         # depthwise (3,7) / (7,3), no bias
    p['fc_w_w'] = nrm((dim, 7, 3))
    p['rw1_w'] = nrm((hid, dim))           # reweight Mlp
    p['rw1_b'] = nrm((hid,))
    p['rw2_w'] = nrm((3 * dim, hid))
    p['rw2_b'] = nrm((3 * dim,))
    p['pos_h_table'] = nrm((2 * H + 1, dim), 0.02)
    p['pos_w_table'] = nrm((2 * W + 1, dim), 0.02)
    return p


# ----------------------------- full forward -----------------------------

def token_mixing_forward(x, params, layer=0):
    """Pallas implementation of TokenMixing.forward (the `layer` arg is unused, as in PyTorch)."""
    del layer
    N, C, H, W = x.shape
    assert H == W, "SparseMLP_Block requires H == W"
    dim = C // 2
    sC = C // 4
    hid = dim // 2
    HW = H * W
    p = params
    f32 = jnp.float32

    # ---- fold eval-mode BatchNorms into affine / adjacent 1x1-conv weights ----
    def fold(bn):
        s = bn['gamma'] * jax.lax.rsqrt(bn['var'] + 1e-5)
        return s, bn['beta'] - bn['mean'] * s

    s0, b0 = fold(p['bn0'])
    sm, bm_aff = fold(p['bn_mlp'])
    wm = p['mlp_w'] * sm[:, None]
    bm = (sm * p['mlp_b'] + bm_aff).reshape(C, 1)
    ss, bs_aff = fold(p['bn_s'])
    wfh = p['w_fuse_h'] * ss[:, None]
    bfh = bs_aff.reshape(dim, 1)
    wfw = p['w_fuse_w']
    wf = p['w_fuse']

    # relative position maps, flattened to (dim, HW); identical for every image
    pos_h = relative_position(p['pos_h_table'], H, W, H)
    pos_w = relative_position(p['pos_w_table'], H, W, W)

    # ---- grouped strip convs as (HW, HW) banded token matrices (kron of a 3-diag eye with
    #      the per-group (W,W)/(H,H) mixing weights); zero-padding semantics are built in ----
    w1 = p['proj_h_w'].reshape(sC, H, W, 3)      # [g, ow, w, k]
    w2 = p['proh_w_w'].reshape(sC, W, H, 3)      # [g, oh, h, k]
    eye_k = [jnp.asarray(np.eye(H, k=1 - k, dtype=np.float32)) for k in range(3)]

    def _b1_group(g):                            # out[h',ow] = sum_{w,k} W[ow,w,k]*in[h'+k-1,w]
        m = jnp.kron(eye_k[0], w1[g, :, :, 0].T)
        for k in range(1, 3):
            m = m + jnp.kron(eye_k[k], w1[g, :, :, k].T)
        return m

    def _b2_group(g):                            # out[oh,w'] = sum_{h,k} W[oh,h,k]*in[h,w'+k-1]
        m = jnp.kron(w2[g, :, :, 0].T, eye_k[0])
        for k in range(1, 3):
            m = m + jnp.kron(w2[g, :, :, k].T, eye_k[k])
        return m

    B1 = jnp.stack([_b1_group(g) for g in range(sC)])             # (sC, HW, HW)
    B2 = jnp.stack([_b2_group(g) for g in range(sC)])             # (sC, HW, HW)
    bf1 = jnp.broadcast_to(p['proj_h_b'].reshape(sC, 1, W), (sC, H, W)).reshape(sC, 1, HW)
    bf2 = jnp.broadcast_to(p['proh_w_b'].reshape(sC, H, 1), (sC, H, W)).reshape(sC, 1, HW)

    # reweight MLP: reorder fc2 rows from torch's (c*3+j) to (j*dim+c)
    rw1w = p['rw1_w']
    rw1b = p['rw1_b'].reshape(hid, 1)
    rw2w = p['rw2_w'].reshape(dim, 3, hid).transpose(1, 0, 2).reshape(3 * dim, hid)
    rw2b = p['rw2_b'].reshape(dim, 3).transpose(1, 0).reshape(3 * dim, 1)

    # depthwise tap planes with boundary masks pre-folded into the weights
    m33, off33 = _tap_masks(H, W, 3, 3, 1, 1)
    m37, off37 = _tap_masks(H, W, 3, 7, 1, 3)       # fc_h
    m73, off73 = _tap_masks(H, W, 7, 3, 3, 1)       # fc_w
    dw_taps = p['dw_w'].reshape(C, 9).T[:, :, None] * jnp.asarray(m33)[:, None, :]
    fch_taps = p['fc_h_w'].reshape(dim, 21).T[:, :, None] * jnp.asarray(m37)[:, None, :]
    fcw_taps = p['fc_w_w'].reshape(dim, 21).T[:, :, None] * jnp.asarray(m73)[:, None, :]

    # group-selector rows: channel c keeps the strip-mix result of group g = c % sC
    gsel_np = np.zeros((sC, dim, 1), np.float32)
    gsel_np[np.arange(dim) % sC, np.arange(dim), 0] = 1.0
    gsel = jnp.asarray(gsel_np)

    x_t = x.reshape(N, C, HW)                       # NCHW is already (N, C, HW): free reshape

    kernel = _make_kernel(dim=dim, sC=sC, HW=HW,
                          off33=off33, off37=off37, off73=off73)

    def rep(shape):
        zeros = (0,) * len(shape)
        return pl.BlockSpec(shape, lambda n, _z=zeros: _z)

    out = pl.pallas_call(
        kernel,
        out_shape=jax.ShapeDtypeStruct((N, C, HW), f32),
        grid=(N,),
        in_specs=[
            pl.BlockSpec((1, C, HW), lambda n: (n, 0, 0)),          # x
            rep((C, 1)), rep((C, 1)),                               # dwsc BN scale / bias
            rep((9, C, HW)),                                        # dw 3x3 tap planes
            rep((C, C)), rep((C, 1)),                               # mlp weight / bias
            rep((dim, HW)),                                         # pos_h
            rep((21, dim, HW)), rep((21, dim, HW)),                 # fc_h / fc_w tap planes
            rep((hid, dim)), rep((hid, 1)),                         # reweight fc1
            rep((3 * dim, hid)), rep((3 * dim, 1)),                 # reweight fc2
            rep((sC, dim, 1)),                                      # group selector
            rep((sC, HW, HW)), rep((sC, 1, HW)),                    # proj_h matrices / bias
            rep((dim, C)), rep((dim, 1)),                           # fuse_h (BN folded) / bias
            rep((dim, HW)),                                         # pos_w
            rep((sC, HW, HW)), rep((sC, 1, HW)),                    # proh_w matrices / bias
            rep((dim, C)),                                          # fuse_w
            rep((C, C)),                                            # fuse
        ],
        out_specs=pl.BlockSpec((1, C, HW), lambda n: (n, 0, 0)),
        compiler_params=pltpu.CompilerParams(
            dimension_semantics=("parallel",)),
    )(x_t, s0.reshape(C, 1), b0.reshape(C, 1), dw_taps, wm, bm, pos_h,
      fch_taps, fcw_taps, rw1w, rw1b, rw2w, rw2b, gsel,
      B1, bf1, wfh, bfh, pos_w, B2, bf2, wfw, wf)

    return out.reshape(N, C, H, W)


# ----------------------------- main -----------------------------

if __name__ == "__main__":
    N, C, H, W = 2, 8, 14, 14          # C divisible by 4; H == W (required by SparseMLP_Block)
    key = jax.random.PRNGKey(0)
    kx, kp = jax.random.split(key)
    x = jax.random.normal(kx, (N, C, H, W), dtype=jnp.float32)
    params = init_params(kp, C, H, W)

    fwd = jax.jit(functools.partial(token_mixing_forward, layer=0))
    out = jax.block_until_ready(fwd(x, params))

    assert out.shape == (N, C, H, W), out.shape
    assert bool(jnp.all(jnp.isfinite(out)))
    print("KERNEL_OK")
</pallas_src>

<mosaic_0001>
module attributes {stable_mosaic.version = 11 : i64} {
  func.func @kernel(%arg0: i32, %arg1: memref<1x8x196xf32, #tpu.memory_space<vmem>>, %arg2: memref<8x1xf32, #tpu.memory_space<vmem>>, %arg3: memref<8x1xf32, #tpu.memory_space<vmem>>, %arg4: memref<9x8x196xf32, #tpu.memory_space<vmem>>, %arg5: memref<8x8xf32, #tpu.memory_space<vmem>>, %arg6: memref<8x1xf32, #tpu.memory_space<vmem>>, %arg7: memref<4x196xf32, #tpu.memory_space<vmem>>, %arg8: memref<21x4x196xf32, #tpu.memory_space<vmem>>, %arg9: memref<21x4x196xf32, #tpu.memory_space<vmem>>, %arg10: memref<2x4xf32, #tpu.memory_space<vmem>>, %arg11: memref<2x1xf32, #tpu.memory_space<vmem>>, %arg12: memref<12x2xf32, #tpu.memory_space<vmem>>, %arg13: memref<12x1xf32, #tpu.memory_space<vmem>>, %arg14: memref<2x4x1xf32, #tpu.memory_space<vmem>>, %arg15: memref<2x196x196xf32, #tpu.memory_space<vmem>>, %arg16: memref<2x1x196xf32, #tpu.memory_space<vmem>>, %arg17: memref<4x8xf32, #tpu.memory_space<vmem>>, %arg18: memref<4x1xf32, #tpu.memory_space<vmem>>, %arg19: memref<4x196xf32, #tpu.memory_space<vmem>>, %arg20: memref<2x196x196xf32, #tpu.memory_space<vmem>>, %arg21: memref<2x1x196xf32, #tpu.memory_space<vmem>>, %arg22: memref<4x8xf32, #tpu.memory_space<vmem>>, %arg23: memref<8x8xf32, #tpu.memory_space<vmem>>, %arg24: memref<1x8x196xf32, #tpu.memory_space<vmem>>) attributes {dimension_semantics = [#tpu.dimension_semantics<parallel>], iteration_bounds = array<i64: 2>, scalar_prefetch = 0 : i64, scratch_operands = 0 : i64, tpu.core_type = #tpu.core_type<tc>, window_params = [{transform_indices = @transform_0, window_bounds = array<i64: 1, 8, 196>}, {pipeline_mode = #tpu.pipeline_mode<synchronous>, transform_indices = @transform_1, window_bounds = array<i64: 8, 1>}, {pipeline_mode = #tpu.pipeline_mode<synchronous>, transform_indices = @transform_2, window_bounds = array<i64: 8, 1>}, {pipeline_mode = #tpu.pipeline_mode<synchronous>, transform_indices = @transform_3, window_bounds = array<i64: 9, 8, 196>}, {pipeline_mode = #tpu.pipeline_mode<synchronous>, transform_indices = @transform_4, window_bounds = array<i64: 8, 8>}, {pipeline_mode = #tpu.pipeline_mode<synchronous>, transform_indices = @transform_5, window_bounds = array<i64: 8, 1>}, {pipeline_mode = #tpu.pipeline_mode<synchronous>, transform_indices = @transform_6, window_bounds = array<i64: 4, 196>}, {pipeline_mode = #tpu.pipeline_mode<synchronous>, transform_indices = @transform_7, window_bounds = array<i64: 21, 4, 196>}, {pipeline_mode = #tpu.pipeline_mode<synchronous>, transform_indices = @transform_8, window_bounds = array<i64: 21, 4, 196>}, {pipeline_mode = #tpu.pipeline_mode<synchronous>, transform_indices = @transform_9, window_bounds = array<i64: 2, 4>}, {pipeline_mode = #tpu.pipeline_mode<synchronous>, transform_indices = @transform_10, window_bounds = array<i64: 2, 1>}, {pipeline_mode = #tpu.pipeline_mode<synchronous>, transform_indices = @transform_11, window_bounds = array<i64: 12, 2>}, {pipeline_mode = #tpu.pipeline_mode<synchronous>, transform_indices = @transform_12, window_bounds = array<i64: 12, 1>}, {pipeline_mode = #tpu.pipeline_mode<synchronous>, transform_indices = @transform_13, window_bounds = array<i64: 2, 4, 1>}, {pipeline_mode = #tpu.pipeline_mode<synchronous>, transform_indices = @transform_14, window_bounds = array<i64: 2, 196, 196>}, {pipeline_mode = #tpu.pipeline_mode<synchronous>, transform_indices = @transform_15, window_bounds = array<i64: 2, 1, 196>}, {pipeline_mode = #tpu.pipeline_mode<synchronous>, transform_indices = @transform_16, window_bounds = array<i64: 4, 8>}, {pipeline_mode = #tpu.pipeline_mode<synchronous>, transform_indices = @transform_17, window_bounds = array<i64: 4, 1>}, {pipeline_mode = #tpu.pipeline_mode<synchronous>, transform_indices = @transform_18, window_bounds = array<i64: 4, 196>}, {pipeline_mode = #tpu.pipeline_mode<synchronous>, transform_indices = @transform_19, window_bounds = array<i64: 2, 196, 196>}, {pipeline_mode = #tpu.pipeline_mode<synchronous>, transform_indices = @transform_20, window_bounds = array<i64: 2, 1, 196>}, {pipeline_mode = #tpu.pipeline_mode<synchronous>, transform_indices = @transform_21, window_bounds = array<i64: 4, 8>}, {pipeline_mode = #tpu.pipeline_mode<synchronous>, transform_indices = @transform_22, window_bounds = array<i64: 8, 8>}, {transform_indices = @transform_23, window_bounds = array<i64: 1, 8, 196>}]} {
    %c0 = arith.constant 0 : index
    %c0_0 = arith.constant 0 : index
    %c0_1 = arith.constant 0 : index
    %0 = vector.load %arg1[%c0, %c0_0, %c0_1] : memref<1x8x196xf32, #tpu.memory_space<vmem>>, vector<1x8x196xf32>
    %1 = vector.shape_cast %0 : vector<1x8x196xf32> to vector<8x196xf32>
    %c0_2 = arith.constant 0 : index
    %c0_3 = arith.constant 0 : index
    %2 = vector.load %arg2[%c0_2, %c0_3] : memref<8x1xf32, #tpu.memory_space<vmem>>, vector<8x1xf32>
    %3 = vector.broadcast %2 : vector<8x1xf32> to vector<8x196xf32>
    %4 = arith.mulf %1, %3 : vector<8x196xf32>
    %c0_4 = arith.constant 0 : index
    %c0_5 = arith.constant 0 : index
    %5 = vector.load %arg3[%c0_4, %c0_5] : memref<8x1xf32, #tpu.memory_space<vmem>>, vector<8x1xf32>
    %6 = vector.broadcast %5 : vector<8x1xf32> to vector<8x196xf32>
    %7 = arith.addf %4, %6 : vector<8x196xf32>
    %cst = arith.constant 5.000000e-01 : f32
    %8 = vector.broadcast %cst : f32 to vector<8x196xf32>
    %9 = arith.mulf %8, %7 : vector<8x196xf32>
    %cst_6 = arith.constant 0.707106769 : f32
    %10 = vector.broadcast %cst_6 : f32 to vector<8x196xf32>
    %11 = arith.mulf %7, %10 : vector<8x196xf32>
    %12 = math.absf %11 : vector<8x196xf32>
    %cst_7 = arith.constant 0.327591091 : f32
    %13 = vector.broadcast %cst_7 : f32 to vector<8x196xf32>
    %14 = arith.mulf %13, %12 : vector<8x196xf32>
    %cst_8 = arith.constant 1.000000e+00 : f32
    %15 = vector.broadcast %cst_8 : f32 to vector<8x196xf32>
    %16 = arith.addf %15, %14 : vector<8x196xf32>
    %17 = tpu.reciprocal %16 {approx = true} : vector<8x196xf32> -> vector<8x196xf32>
    %cst_9 = arith.constant 1.06140542 : f32
    %18 = vector.broadcast %cst_9 : f32 to vector<8x196xf32>
    %19 = arith.mulf %18, %17 : vector<8x196xf32>
    %cst_10 = arith.constant -1.45315206 : f32
    %20 = vector.broadcast %cst_10 : f32 to vector<8x196xf32>
    %21 = arith.addf %19, %20 : vector<8x196xf32>
    %22 = arith.mulf %21, %17 : vector<8x196xf32>
    %cst_11 = arith.constant 1.42141378 : f32
    %23 = vector.broadcast %cst_11 : f32 to vector<8x196xf32>
    %24 = arith.addf %22, %23 : vector<8x196xf32>
    %25 = arith.mulf %24, %17 : vector<8x196xf32>
    %cst_12 = arith.constant -0.284496725 : f32
    %26 = vector.broadcast %cst_12 : f32 to vector<8x196xf32>
    %27 = arith.addf %25, %26 : vector<8x196xf32>
    %28 = arith.mulf %27, %17 : vector<8x196xf32>
    %cst_13 = arith.constant 0.254829586 : f32
    %29 = vector.broadcast %cst_13 : f32 to vector<8x196xf32>
    %30 = arith.addf %28, %29 : vector<8x196xf32>
    %31 = arith.mulf %30, %17 : vector<8x196xf32>
    %cst_14 = arith.constant 0.000000e+00 : f32
    %32 = vector.broadcast %cst_14 : f32 to vector<8x196xf32>
    %33 = arith.subf %32, %12 : vector<8x196xf32>
    %34 = arith.mulf %33, %12 : vector<8x196xf32>
    %35 = math.exp %34 : vector<8x196xf32>
    %36 = arith.mulf %31, %35 : vector<8x196xf32>
    %cst_15 = arith.constant 1.000000e+00 : f32
    %37 = vector.broadcast %cst_15 : f32 to vector<8x196xf32>
    %38 = arith.subf %37, %36 : vector<8x196xf32>
    %cst_16 = arith.constant 0.000000e+00 : f32
    %39 = vector.broadcast %cst_16 : f32 to vector<8x196xf32>
    %40 = arith.cmpf oge, %11, %39 : vector<8x196xf32>
    %cst_17 = arith.constant 0.000000e+00 : f32
    %41 = vector.broadcast %cst_17 : f32 to vector<8x196xf32>
    %42 = arith.subf %41, %38 : vector<8x196xf32>
    %43 = arith.select %40, %38, %42 : vector<8x196xi1>, vector<8x196xf32>
    %cst_18 = arith.constant 1.000000e+00 : f32
    %44 = vector.broadcast %cst_18 : f32 to vector<8x196xf32>
    %45 = arith.addf %44, %43 : vector<8x196xf32>
    %46 = arith.mulf %9, %45 : vector<8x196xf32>
    %cst_19 = arith.constant 0.000000e+00 : f32
    %47 = vector.broadcast %cst_19 : f32 to vector<8x15xf32>
    %48 = tpu.concatenate %47, %46, %47 in 1 : vector<8x15xf32>, vector<8x196xf32>, vector<8x15xf32> -> vector<8x226xf32>
    %c0_20 = arith.constant 0 : index
    %c0_21 = arith.constant 0 : index
    %c0_22 = arith.constant 0 : index
    %49 = vector.load %arg4[%c0_20, %c0_21, %c0_22] : memref<9x8x196xf32, #tpu.memory_space<vmem>>, vector<1x8x196xf32>
    %50 = vector.shape_cast %49 : vector<1x8x196xf32> to vector<8x196xf32>
    %51 = vector.extract_strided_slice %48 {offsets = [0, 0], sizes = [8, 196], strides = [1, 1]} : vector<8x226xf32> to vector<8x196xf32>
    %52 = arith.mulf %50, %51 : vector<8x196xf32>
    %c1 = arith.constant 1 : index
    %c0_23 = arith.constant 0 : index
    %c0_24 = arith.constant 0 : index
    %53 = vector.load %arg4[%c1, %c0_23, %c0_24] : memref<9x8x196xf32, #tpu.memory_space<vmem>>, vector<1x8x196xf32>
    %54 = vector.shape_cast %53 : vector<1x8x196xf32> to vector<8x196xf32>
    %55 = vector.extract_strided_slice %48 {offsets = [0, 1], sizes = [8, 196], strides = [1, 1]} : vector<8x226xf32> to vector<8x196xf32>
    %56 = arith.mulf %54, %55 : vector<8x196xf32>
    %57 = arith.addf %52, %56 : vector<8x196xf32>
    %c2 = arith.constant 2 : index
    %c0_25 = arith.constant 0 : index
    %c0_26 = arith.constant 0 : index
    %58 = vector.load %arg4[%c2, %c0_25, %c0_26] : memref<9x8x196xf32, #tpu.memory_space<vmem>>, vector<1x8x196xf32>
    %59 = vector.shape_cast %58 : vector<1x8x196xf32> to vector<8x196xf32>
    %60 = vector.extract_strided_slice %48 {offsets = [0, 2], sizes = [8, 196], strides = [1, 1]} : vector<8x226xf32> to vector<8x196xf32>
    %61 = arith.mulf %59, %60 : vector<8x196xf32>
    %62 = arith.addf %57, %61 : vector<8x196xf32>
    %c3 = arith.constant 3 : index
    %c0_27 = arith.constant 0 : index
    %c0_28 = arith.constant 0 : index
    %63 = vector.load %arg4[%c3, %c0_27, %c0_28] : memref<9x8x196xf32, #tpu.memory_space<vmem>>, vector<1x8x196xf32>
    %64 = vector.shape_cast %63 : vector<1x8x196xf32> to vector<8x196xf32>
    %65 = vector.extract_strided_slice %48 {offsets = [0, 14], sizes = [8, 196], strides = [1, 1]} : vector<8x226xf32> to vector<8x196xf32>
    %66 = arith.mulf %64, %65 : vector<8x196xf32>
    %67 = arith.addf %62, %66 : vector<8x196xf32>
    %c4 = arith.constant 4 : index
    %c0_29 = arith.constant 0 : index
    %c0_30 = arith.constant 0 : index
    %68 = vector.load %arg4[%c4, %c0_29, %c0_30] : memref<9x8x196xf32, #tpu.memory_space<vmem>>, vector<1x8x196xf32>
    %69 = vector.shape_cast %68 : vector<1x8x196xf32> to vector<8x196xf32>
    %70 = vector.extract_strided_slice %48 {offsets = [0, 15], sizes = [8, 196], strides = [1, 1]} : vector<8x226xf32> to vector<8x196xf32>
    %71 = arith.mulf %69, %70 : vector<8x196xf32>
    %72 = arith.addf %67, %71 : vector<8x196xf32>
    %c5 = arith.constant 5 : index
    %c0_31 = arith.constant 0 : index
    %c0_32 = arith.constant 0 : index
    %73 = vector.load %arg4[%c5, %c0_31, %c0_32] : memref<9x8x196xf32, #tpu.memory_space<vmem>>, vector<1x8x196xf32>
    %74 = vector.shape_cast %73 : vector<1x8x196xf32> to vector<8x196xf32>
    %75 = vector.extract_strided_slice %48 {offsets = [0, 16], sizes = [8, 196], strides = [1, 1]} : vector<8x226xf32> to vector<8x196xf32>
    %76 = arith.mulf %74, %75 : vector<8x196xf32>
    %77 = arith.addf %72, %76 : vector<8x196xf32>
    %c6 = arith.constant 6 : index
    %c0_33 = arith.constant 0 : index
    %c0_34 = arith.constant 0 : index
    %78 = vector.load %arg4[%c6, %c0_33, %c0_34] : memref<9x8x196xf32, #tpu.memory_space<vmem>>, vector<1x8x196xf32>
    %79 = vector.shape_cast %78 : vector<1x8x196xf32> to vector<8x196xf32>
    %80 = vector.extract_strided_slice %48 {offsets = [0, 28], sizes = [8, 196], strides = [1, 1]} : vector<8x226xf32> to vector<8x196xf32>
    %81 = arith.mulf %79, %80 : vector<8x196xf32>
    %82 = arith.addf %77, %81 : vector<8x196xf32>
    %c7 = arith.constant 7 : index
    %c0_35 = arith.constant 0 : index
    %c0_36 = arith.constant 0 : index
    %83 = vector.load %arg4[%c7, %c0_35, %c0_36] : memref<9x8x196xf32, #tpu.memory_space<vmem>>, vector<1x8x196xf32>
    %84 = vector.shape_cast %83 : vector<1x8x196xf32> to vector<8x196xf32>
    %85 = vector.extract_strided_slice %48 {offsets = [0, 29], sizes = [8, 196], strides = [1, 1]} : vector<8x226xf32> to vector<8x196xf32>
    %86 = arith.mulf %84, %85 : vector<8x196xf32>
    %87 = arith.addf %82, %86 : vector<8x196xf32>
    %c8 = arith.constant 8 : index
    %c0_37 = arith.constant 0 : index
    %c0_38 = arith.constant 0 : index
    %88 = vector.load %arg4[%c8, %c0_37, %c0_38] : memref<9x8x196xf32, #tpu.memory_space<vmem>>, vector<1x8x196xf32>
    %89 = vector.shape_cast %88 : vector<1x8x196xf32> to vector<8x196xf32>
    %90 = vector.extract_strided_slice %48 {offsets = [0, 30], sizes = [8, 196], strides = [1, 1]} : vector<8x226xf32> to vector<8x196xf32>
    %91 = arith.mulf %89, %90 : vector<8x196xf32>
    %92 = arith.addf %87, %91 : vector<8x196xf32>
    %c0_39 = arith.constant 0 : index
    %c0_40 = arith.constant 0 : index
    %93 = vector.load %arg5[%c0_39, %c0_40] : memref<8x8xf32, #tpu.memory_space<vmem>>, vector<8x8xf32>
    %cst_41 = arith.constant dense<0.000000e+00> : vector<8x196xf32>
    %94 = tpu.matmul %93, %92, %cst_41 {dimension_numbers = #tpu.dot_dimension_numbers<[1], [0], [0], [1], [0, 0, 1, 1], [], []>} : vector<8x8xf32>, vector<8x196xf32>, vector<8x196xf32> -> vector<8x196xf32>
    %c0_42 = arith.constant 0 : index
    %c0_43 = arith.constant 0 : index
    %95 = vector.load %arg6[%c0_42, %c0_43] : memref<8x1xf32, #tpu.memory_space<vmem>>, vector<8x1xf32>
    %96 = vector.broadcast %95 : vector<8x1xf32> to vector<8x196xf32>
    %97 = arith.addf %94, %96 : vector<8x196xf32>
    %cst_44 = arith.constant 5.000000e-01 : f32
    %98 = vector.broadcast %cst_44 : f32 to vector<8x196xf32>
    %99 = arith.mulf %98, %97 : vector<8x196xf32>
    %cst_45 = arith.constant 0.707106769 : f32
    %100 = vector.broadcast %cst_45 : f32 to vector<8x196xf32>
    %101 = arith.mulf %97, %100 : vector<8x196xf32>
    %102 = math.absf %101 : vector<8x196xf32>
    %cst_46 = arith.constant 0.327591091 : f32
    %103 = vector.broadcast %cst_46 : f32 to vector<8x196xf32>
    %104 = arith.mulf %103, %102 : vector<8x196xf32>
    %cst_47 = arith.constant 1.000000e+00 : f32
    %105 = vector.broadcast %cst_47 : f32 to vector<8x196xf32>
    %106 = arith.addf %105, %104 : vector<8x196xf32>
    %107 = tpu.reciprocal %106 {approx = true} : vector<8x196xf32> -> vector<8x196xf32>
    %cst_48 = arith.constant 1.06140542 : f32
    %108 = vector.broadcast %cst_48 : f32 to vector<8x196xf32>
    %109 = arith.mulf %108, %107 : vector<8x196xf32>
    %cst_49 = arith.constant -1.45315206 : f32
    %110 = vector.broadcast %cst_49 : f32 to vector<8x196xf32>
    %111 = arith.addf %109, %110 : vector<8x196xf32>
    %112 = arith.mulf %111, %107 : vector<8x196xf32>
    %cst_50 = arith.constant 1.42141378 : f32
    %113 = vector.broadcast %cst_50 : f32 to vector<8x196xf32>
    %114 = arith.addf %112, %113 : vector<8x196xf32>
    %115 = arith.mulf %114, %107 : vector<8x196xf32>
    %cst_51 = arith.constant -0.284496725 : f32
    %116 = vector.broadcast %cst_51 : f32 to vector<8x196xf32>
    %117 = arith.addf %115, %116 : vector<8x196xf32>
    %118 = arith.mulf %117, %107 : vector<8x196xf32>
    %cst_52 = arith.constant 0.254829586 : f32
    %119 = vector.broadcast %cst_52 : f32 to vector<8x196xf32>
    %120 = arith.addf %118, %119 : vector<8x196xf32>
    %121 = arith.mulf %120, %107 : vector<8x196xf32>
    %cst_53 = arith.constant 0.000000e+00 : f32
    %122 = vector.broadcast %cst_53 : f32 to vector<8x196xf32>
    %123 = arith.subf %122, %102 : vector<8x196xf32>
    %124 = arith.mulf %123, %102 : vector<8x196xf32>
    %125 = math.exp %124 : vector<8x196xf32>
    %126 = arith.mulf %121, %125 : vector<8x196xf32>
    %cst_54 = arith.constant 1.000000e+00 : f32
    %127 = vector.broadcast %cst_54 : f32 to vector<8x196xf32>
    %128 = arith.subf %127, %126 : vector<8x196xf32>
    %cst_55 = arith.constant 0.000000e+00 : f32
    %129 = vector.broadcast %cst_55 : f32 to vector<8x196xf32>
    %130 = arith.cmpf oge, %101, %129 : vector<8x196xf32>
    %cst_56 = arith.constant 0.000000e+00 : f32
    %131 = vector.broadcast %cst_56 : f32 to vector<8x196xf32>
    %132 = arith.subf %131, %128 : vector<8x196xf32>
    %133 = arith.select %130, %128, %132 : vector<8x196xi1>, vector<8x196xf32>
    %cst_57 = arith.constant 1.000000e+00 : f32
    %134 = vector.broadcast %cst_57 : f32 to vector<8x196xf32>
    %135 = arith.addf %134, %133 : vector<8x196xf32>
    %136 = arith.mulf %99, %135 : vector<8x196xf32>
    %137 = vector.extract_strided_slice %136 {offsets = [0, 0], sizes = [4, 196], strides = [1, 1]} : vector<8x196xf32> to vector<4x196xf32>
    %138 = vector.extract_strided_slice %136 {offsets = [4, 0], sizes = [4, 196], strides = [1, 1]} : vector<8x196xf32> to vector<4x196xf32>
    %cst_58 = arith.constant 0.000000e+00 : f32
    %139 = vector.broadcast %cst_58 : f32 to vector<4x17xf32>
    %140 = tpu.concatenate %139, %138, %139 in 1 : vector<4x17xf32>, vector<4x196xf32>, vector<4x17xf32> -> vector<4x230xf32>
    %c0_59 = arith.constant 0 : index
    %c0_60 = arith.constant 0 : index
    %c0_61 = arith.constant 0 : index
    %141 = vector.load %arg8[%c0_59, %c0_60, %c0_61] : memref<21x4x196xf32, #tpu.memory_space<vmem>>, vector<1x4x196xf32>
    %142 = vector.shape_cast %141 : vector<1x4x196xf32> to vector<4x196xf32>
    %143 = vector.extract_strided_slice %140 {offsets = [0, 0], sizes = [4, 196], strides = [1, 1]} : vector<4x230xf32> to vector<4x196xf32>
    %144 = arith.mulf %142, %143 : vector<4x196xf32>
    %c1_62 = arith.constant 1 : index
    %c0_63 = arith.constant 0 : index
    %c0_64 = arith.constant 0 : index
    %145 = vector.load %arg8[%c1_62, %c0_63, %c0_64] : memref<21x4x196xf32, #tpu.memory_space<vmem>>, vector<1x4x196xf32>
    %146 = vector.shape_cast %145 : vector<1x4x196xf32> to vector<4x196xf32>
    %147 = vector.extract_strided_slice %140 {offsets = [0, 1], sizes = [4, 196], strides = [1, 1]} : vector<4x230xf32> to vector<4x196xf32>
    %148 = arith.mulf %146, %147 : vector<4x196xf32>
    %149 = arith.addf %144, %148 : vector<4x196xf32>
    %c2_65 = arith.constant 2 : index
    %c0_66 = arith.constant 0 : index
    %c0_67 = arith.constant 0 : index
    %150 = vector.load %arg8[%c2_65, %c0_66, %c0_67] : memref<21x4x196xf32, #tpu.memory_space<vmem>>, vector<1x4x196xf32>
    %151 = vector.shape_cast %150 : vector<1x4x196xf32> to vector<4x196xf32>
    %152 = vector.extract_strided_slice %140 {offsets = [0, 2], sizes = [4, 196], strides = [1, 1]} : vector<4x230xf32> to vector<4x196xf32>
    %153 = arith.mulf %151, %152 : vector<4x196xf32>
    %154 = arith.addf %149, %153 : vector<4x196xf32>
    %c3_68 = arith.constant 3 : index
    %c0_69 = arith.constant 0 : index
    %c0_70 = arith.constant 0 : index
    %155 = vector.load %arg8[%c3_68, %c0_69, %c0_70] : memref<21x4x196xf32, #tpu.memory_space<vmem>>, vector<1x4x196xf32>
    %156 = vector.shape_cast %155 : vector<1x4x196xf32> to vector<4x196xf32>
    %157 = vector.extract_strided_slice %140 {offsets = [0, 3], sizes = [4, 196], strides = [1, 1]} : vector<4x230xf32> to vector<4x196xf32>
    %158 = arith.mulf %156, %157 : vector<4x196xf32>
    %159 = arith.addf %154, %158 : vector<4x196xf32>
    %c4_71 = arith.constant 4 : index
    %c0_72 = arith.constant 0 : index
    %c0_73 = arith.constant 0 : index
    %160 = vector.load %arg8[%c4_71, %c0_72, %c0_73] : memref<21x4x196xf32, #tpu.memory_space<vmem>>, vector<1x4x196xf32>
    %161 = vector.shape_cast %160 : vector<1x4x196xf32> to vector<4x196xf32>
    %162 = vector.extract_strided_slice %140 {offsets = [0, 4], sizes = [4, 196], strides = [1, 1]} : vector<4x230xf32> to vector<4x196xf32>
    %163 = arith.mulf %161, %162 : vector<4x196xf32>
    %164 = arith.addf %159, %163 : vector<4x196xf32>
    %c5_74 = arith.constant 5 : index
    %c0_75 = arith.constant 0 : index
    %c0_76 = arith.constant 0 : index
    %165 = vector.load %arg8[%c5_74, %c0_75, %c0_76] : memref<21x4x196xf32, #tpu.memory_space<vmem>>, vector<1x4x196xf32>
    %166 = vector.shape_cast %165 : vector<1x4x196xf32> to vector<4x196xf32>
    %167 = vector.extract_strided_slice %140 {offsets = [0, 5], sizes = [4, 196], strides = [1, 1]} : vector<4x230xf32> to vector<4x196xf32>
    %168 = arith.mulf %166, %167 : vector<4x196xf32>
    %169 = arith.addf %164, %168 : vector<4x196xf32>
    %c6_77 = arith.constant 6 : index
    %c0_78 = arith.constant 0 : index
    %c0_79 = arith.constant 0 : index
    %170 = vector.load %arg8[%c6_77, %c0_78, %c0_79] : memref<21x4x196xf32, #tpu.memory_space<vmem>>, vector<1x4x196xf32>
    %171 = vector.shape_cast %170 : vector<1x4x196xf32> to vector<4x196xf32>
    %172 = vector.extract_strided_slice %140 {offsets = [0, 6], sizes = [4, 196], strides = [1, 1]} : vector<4x230xf32> to vector<4x196xf32>
    %173 = arith.mulf %171, %172 : vector<4x196xf32>
    %174 = arith.addf %169, %173 : vector<4x196xf32>
    %c7_80 = arith.constant 7 : index
    %c0_81 = arith.constant 0 : index
    %c0_82 = arith.constant 0 : index
    %175 = vector.load %arg8[%c7_80, %c0_81, %c0_82] : memref<21x4x196xf32, #tpu.memory_space<vmem>>, vector<1x4x196xf32>
    %176 = vector.shape_cast %175 : vector<1x4x196xf32> to vector<4x196xf32>
    %177 = vector.extract_strided_slice %140 {offsets = [0, 14], sizes = [4, 196], strides = [1, 1]} : vector<4x230xf32> to vector<4x196xf32>
    %178 = arith.mulf %176, %177 : vector<4x196xf32>
    %179 = arith.addf %174, %178 : vector<4x196xf32>
    %c8_83 = arith.constant 8 : index
    %c0_84 = arith.constant 0 : index
    %c0_85 = arith.constant 0 : index
    %180 = vector.load %arg8[%c8_83, %c0_84, %c0_85] : memref<21x4x196xf32, #tpu.memory_space<vmem>>, vector<1x4x196xf32>
    %181 = vector.shape_cast %180 : vector<1x4x196xf32> to vector<4x196xf32>
    %182 = vector.extract_strided_slice %140 {offsets = [0, 15], sizes = [4, 196], strides = [1, 1]} : vector<4x230xf32> to vector<4x196xf32>
    %183 = arith.mulf %181, %182 : vector<4x196xf32>
    %184 = arith.addf %179, %183 : vector<4x196xf32>
    %c9 = arith.constant 9 : index
    %c0_86 = arith.constant 0 : index
    %c0_87 = arith.constant 0 : index
    %185 = vector.load %arg8[%c9, %c0_86, %c0_87] : memref<21x4x196xf32, #tpu.memory_space<vmem>>, vector<1x4x196xf32>
    %186 = vector.shape_cast %185 : vector<1x4x196xf32> to vector<4x196xf32>
    %187 = vector.extract_strided_slice %140 {offsets = [0, 16], sizes = [4, 196], strides = [1, 1]} : vector<4x230xf32> to vector<4x196xf32>
    %188 = arith.mulf %186, %187 : vector<4x196xf32>
    %189 = arith.addf %184, %188 : vector<4x196xf32>
    %c10 = arith.constant 10 : index
    %c0_88 = arith.constant 0 : index
    %c0_89 = arith.constant 0 : index
    %190 = vector.load %arg8[%c10, %c0_88, %c0_89] : memref<21x4x196xf32, #tpu.memory_space<vmem>>, vector<1x4x196xf32>
    %191 = vector.shape_cast %190 : vector<1x4x196xf32> to vector<4x196xf32>
    %192 = vector.extract_strided_slice %140 {offsets = [0, 17], sizes = [4, 196], strides = [1, 1]} : vector<4x230xf32> to vector<4x196xf32>
    %193 = arith.mulf %191, %192 : vector<4x196xf32>
    %194 = arith.addf %189, %193 : vector<4x196xf32>
    %c11 = arith.constant 11 : index
    %c0_90 = arith.constant 0 : index
    %c0_91 = arith.constant 0 : index
    %195 = vector.load %arg8[%c11, %c0_90, %c0_91] : memref<21x4x196xf32, #tpu.memory_space<vmem>>, vector<1x4x196xf32>
    %196 = vector.shape_cast %195 : vector<1x4x196xf32> to vector<4x196xf32>
    %197 = vector.extract_strided_slice %140 {offsets = [0, 18], sizes = [4, 196], strides = [1, 1]} : vector<4x230xf32> to vector<4x196xf32>
    %198 = arith.mulf %196, %197 : vector<4x196xf32>
    %199 = arith.addf %194, %198 : vector<4x196xf32>
    %c12 = arith.constant 12 : index
    %c0_92 = arith.constant 0 : index
    %c0_93 = arith.constant 0 : index
    %200 = vector.load %arg8[%c12, %c0_92, %c0_93] : memref<21x4x196xf32, #tpu.memory_space<vmem>>, vector<1x4x196xf32>
    %201 = vector.shape_cast %200 : vector<1x4x196xf32> to vector<4x196xf32>
    %202 = vector.extract_strided_slice %140 {offsets = [0, 19], sizes = [4, 196], strides = [1, 1]} : vector<4x230xf32> to vector<4x196xf32>
    %203 = arith.mulf %201, %202 : vector<4x196xf32>
    %204 = arith.addf %199, %203 : vector<4x196xf32>
    %c13 = arith.constant 13 : index
    %c0_94 = arith.constant 0 : index
    %c0_95 = arith.constant 0 : index
    %205 = vector.load %arg8[%c13, %c0_94, %c0_95] : memref<21x4x196xf32, #tpu.memory_space<vmem>>, vector<1x4x196xf32>
    %206 = vector.shape_cast %205 : vector<1x4x196xf32> to vector<4x196xf32>
    %207 = vector.extract_strided_slice %140 {offsets = [0, 20], sizes = [4, 196], strides = [1, 1]} : vector<4x230xf32> to vector<4x196xf32>
    %208 = arith.mulf %206, %207 : vector<4x196xf32>
    %209 = arith.addf %204, %208 : vector<4x196xf32>
    %c14 = arith.constant 14 : index
    %c0_96 = arith.constant 0 : index
    %c0_97 = arith.constant 0 : index
    %210 = vector.load %arg8[%c14, %c0_96, %c0_97] : memref<21x4x196xf32, #tpu.memory_space<vmem>>, vector<1x4x196xf32>
    %211 = vector.shape_cast %210 : vector<1x4x196xf32> to vector<4x196xf32>
    %212 = vector.extract_strided_slice %140 {offsets = [0, 28], sizes = [4, 196], strides = [1, 1]} : vector<4x230xf32> to vector<4x196xf32>
    %213 = arith.mulf %211, %212 : vector<4x196xf32>
    %214 = arith.addf %209, %213 : vector<4x196xf32>
    %c15 = arith.constant 15 : index
    %c0_98 = arith.constant 0 : index
    %c0_99 = arith.constant 0 : index
    %215 = vector.load %arg8[%c15, %c0_98, %c0_99] : memref<21x4x196xf32, #tpu.memory_space<vmem>>, vector<1x4x196xf32>
    %216 = vector.shape_cast %215 : vector<1x4x196xf32> to vector<4x196xf32>
    %217 = vector.extract_strided_slice %140 {offsets = [0, 29], sizes = [4, 196], strides = [1, 1]} : vector<4x230xf32> to vector<4x196xf32>
    %218 = arith.mulf %216, %217 : vector<4x196xf32>
    %219 = arith.addf %214, %218 : vector<4x196xf32>
    %c16 = arith.constant 16 : index
    %c0_100 = arith.constant 0 : index
    %c0_101 = arith.constant 0 : index
    %220 = vector.load %arg8[%c16, %c0_100, %c0_101] : memref<21x4x196xf32, #tpu.memory_space<vmem>>, vector<1x4x196xf32>
    %221 = vector.shape_cast %220 : vector<1x4x196xf32> to vector<4x196xf32>
    %222 = vector.extract_strided_slice %140 {offsets = [0, 30], sizes = [4, 196], strides = [1, 1]} : vector<4x230xf32> to vector<4x196xf32>
    %223 = arith.mulf %221, %222 : vector<4x196xf32>
    %224 = arith.addf %219, %223 : vector<4x196xf32>
    %c17 = arith.constant 17 : index
    %c0_102 = arith.constant 0 : index
    %c0_103 = arith.constant 0 : index
    %225 = vector.load %arg8[%c17, %c0_102, %c0_103] : memref<21x4x196xf32, #tpu.memory_space<vmem>>, vector<1x4x196xf32>
    %226 = vector.shape_cast %225 : vector<1x4x196xf32> to vector<4x196xf32>
    %227 = vector.extract_strided_slice %140 {offsets = [0, 31], sizes = [4, 196], strides = [1, 1]} : vector<4x230xf32> to vector<4x196xf32>
    %228 = arith.mulf %226, %227 : vector<4x196xf32>
    %229 = arith.addf %224, %228 : vector<4x196xf32>
    %c18 = arith.constant 18 : index
    %c0_104 = arith.constant 0 : index
    %c0_105 = arith.constant 0 : index
    %230 = vector.load %arg8[%c18, %c0_104, %c0_105] : memref<21x4x196xf32, #tpu.memory_space<vmem>>, vector<1x4x196xf32>
    %231 = vector.shape_cast %230 : vector<1x4x196xf32> to vector<4x196xf32>
    %232 = vector.extract_strided_slice %140 {offsets = [0, 32], sizes = [4, 196], strides = [1, 1]} : vector<4x230xf32> to vector<4x196xf32>
    %233 = arith.mulf %231, %232 : vector<4x196xf32>
    %234 = arith.addf %229, %233 : vector<4x196xf32>
    %c19 = arith.constant 19 : index
    %c0_106 = arith.constant 0 : index
    %c0_107 = arith.constant 0 : index
    %235 = vector.load %arg8[%c19, %c0_106, %c0_107] : memref<21x4x196xf32, #tpu.memory_space<vmem>>, vector<1x4x196xf32>
    %236 = vector.shape_cast %235 : vector<1x4x196xf32> to vector<4x196xf32>
    %237 = vector.extract_strided_slice %140 {offsets = [0, 33], sizes = [4, 196], strides = [1, 1]} : vector<4x230xf32> to vector<4x196xf32>
    %238 = arith.mulf %236, %237 : vector<4x196xf32>
    %239 = arith.addf %234, %238 : vector<4x196xf32>
    %c20 = arith.constant 20 : index
    %c0_108 = arith.constant 0 : index
    %c0_109 = arith.constant 0 : index
    %240 = vector.load %arg8[%c20, %c0_108, %c0_109] : memref<21x4x196xf32, #tpu.memory_space<vmem>>, vector<1x4x196xf32>
    %241 = vector.shape_cast %240 : vector<1x4x196xf32> to vector<4x196xf32>
    %242 = vector.extract_strided_slice %140 {offsets = [0, 34], sizes = [4, 196], strides = [1, 1]} : vector<4x230xf32> to vector<4x196xf32>
    %243 = arith.mulf %241, %242 : vector<4x196xf32>
    %244 = arith.addf %239, %243 : vector<4x196xf32>
    %cst_110 = arith.constant 0.000000e+00 : f32
    %245 = vector.broadcast %cst_110 : f32 to vector<4x43xf32>
    %246 = tpu.concatenate %245, %138, %245 in 1 : vector<4x43xf32>, vector<4x196xf32>, vector<4x43xf32> -> vector<4x282xf32>
    %c0_111 = arith.constant 0 : index
    %c0_112 = arith.constant 0 : index
    %c0_113 = arith.constant 0 : index
    %247 = vector.load %arg9[%c0_111, %c0_112, %c0_113] : memref<21x4x196xf32, #tpu.memory_space<vmem>>, vector<1x4x196xf32>
    %248 = vector.shape_cast %247 : vector<1x4x196xf32> to vector<4x196xf32>
    %249 = vector.extract_strided_slice %246 {offsets = [0, 0], sizes = [4, 196], strides = [1, 1]} : vector<4x282xf32> to vector<4x196xf32>
    %250 = arith.mulf %248, %249 : vector<4x196xf32>
    %c1_114 = arith.constant 1 : index
    %c0_115 = arith.constant 0 : index
    %c0_116 = arith.constant 0 : index
    %251 = vector.load %arg9[%c1_114, %c0_115, %c0_116] : memref<21x4x196xf32, #tpu.memory_space<vmem>>, vector<1x4x196xf32>
    %252 = vector.shape_cast %251 : vector<1x4x196xf32> to vector<4x196xf32>
    %253 = vector.extract_strided_slice %246 {offsets = [0, 1], sizes = [4, 196], strides = [1, 1]} : vector<4x282xf32> to vector<4x196xf32>
    %254 = arith.mulf %252, %253 : vector<4x196xf32>
    %255 = arith.addf %250, %254 : vector<4x196xf32>
    %c2_117 = arith.constant 2 : index
    %c0_118 = arith.constant 0 : index
    %c0_119 = arith.constant 0 : index
    %256 = vector.load %arg9[%c2_117, %c0_118, %c0_119] : memref<21x4x196xf32, #tpu.memory_space<vmem>>, vector<1x4x196xf32>
    %257 = vector.shape_cast %256 : vector<1x4x196xf32> to vector<4x196xf32>
    %258 = vector.extract_strided_slice %246 {offsets = [0, 2], sizes = [4, 196], strides = [1, 1]} : vector<4x282xf32> to vector<4x196xf32>
    %259 = arith.mulf %257, %258 : vector<4x196xf32>
    %260 = arith.addf %255, %259 : vector<4x196xf32>
    %c3_120 = arith.constant 3 : index
    %c0_121 = arith.constant 0 : index
    %c0_122 = arith.constant 0 : index
    %261 = vector.load %arg9[%c3_120, %c0_121, %c0_122] : memref<21x4x196xf32, #tpu.memory_space<vmem>>, vector<1x4x196xf32>
    %262 = vector.shape_cast %261 : vector<1x4x196xf32> to vector<4x196xf32>
    %263 = vector.extract_strided_slice %246 {offsets = [0, 14], sizes = [4, 196], strides = [1, 1]} : vector<4x282xf32> to vector<4x196xf32>
    %264 = arith.mulf %262, %263 : vector<4x196xf32>
    %265 = arith.addf %260, %264 : vector<4x196xf32>
    %c4_123 = arith.constant 4 : index
    %c0_124 = arith.constant 0 : index
    %c0_125 = arith.constant 0 : index
    %266 = vector.load %arg9[%c4_123, %c0_124, %c0_125] : memref<21x4x196xf32, #tpu.memory_space<vmem>>, vector<1x4x196xf32>
    %267 = vector.shape_cast %266 : vector<1x4x196xf32> to vector<4x196xf32>
    %268 = vector.extract_strided_slice %246 {offsets = [0, 15], sizes = [4, 196], strides = [1, 1]} : vector<4x282xf32> to vector<4x196xf32>
    %269 = arith.mulf %267, %268 : vector<4x196xf32>
    %270 = arith.addf %265, %269 : vector<4x196xf32>
    %c5_126 = arith.constant 5 : index
    %c0_127 = arith.constant 0 : index
    %c0_128 = arith.constant 0 : index
    %271 = vector.load %arg9[%c5_126, %c0_127, %c0_128] : memref<21x4x196xf32, #tpu.memory_space<vmem>>, vector<1x4x196xf32>
    %272 = vector.shape_cast %271 : vector<1x4x196xf32> to vector<4x196xf32>
    %273 = vector.extract_strided_slice %246 {offsets = [0, 16], sizes = [4, 196], strides = [1, 1]} : vector<4x282xf32> to vector<4x196xf32>
    %274 = arith.mulf %272, %273 : vector<4x196xf32>
    %275 = arith.addf %270, %274 : vector<4x196xf32>
    %c6_129 = arith.constant 6 : index
    %c0_130 = arith.constant 0 : index
    %c0_131 = arith.constant 0 : index
    %276 = vector.load %arg9[%c6_129, %c0_130, %c0_131] : memref<21x4x196xf32, #tpu.memory_space<vmem>>, vector<1x4x196xf32>
    %277 = vector.shape_cast %276 : vector<1x4x196xf32> to vector<4x196xf32>
    %278 = vector.extract_strided_slice %246 {offsets = [0, 28], sizes = [4, 196], strides = [1, 1]} : vector<4x282xf32> to vector<4x196xf32>
    %279 = arith.mulf %277, %278 : vector<4x196xf32>
    %280 = arith.addf %275, %279 : vector<4x196xf32>
    %c7_132 = arith.constant 7 : index
    %c0_133 = arith.constant 0 : index
    %c0_134 = arith.constant 0 : index
    %281 = vector.load %arg9[%c7_132, %c0_133, %c0_134] : memref<21x4x196xf32, #tpu.memory_space<vmem>>, vector<1x4x196xf32>
    %282 = vector.shape_cast %281 : vector<1x4x196xf32> to vector<4x196xf32>
    %283 = vector.extract_strided_slice %246 {offsets = [0, 29], sizes = [4, 196], strides = [1, 1]} : vector<4x282xf32> to vector<4x196xf32>
    %284 = arith.mulf %282, %283 : vector<4x196xf32>
    %285 = arith.addf %280, %284 : vector<4x196xf32>
    %c8_135 = arith.constant 8 : index
    %c0_136 = arith.constant 0 : index
    %c0_137 = arith.constant 0 : index
    %286 = vector.load %arg9[%c8_135, %c0_136, %c0_137] : memref<21x4x196xf32, #tpu.memory_space<vmem>>, vector<1x4x196xf32>
    %287 = vector.shape_cast %286 : vector<1x4x196xf32> to vector<4x196xf32>
    %288 = vector.extract_strided_slice %246 {offsets = [0, 30], sizes = [4, 196], strides = [1, 1]} : vector<4x282xf32> to vector<4x196xf32>
    %289 = arith.mulf %287, %288 : vector<4x196xf32>
    %290 = arith.addf %285, %289 : vector<4x196xf32>
    %c9_138 = arith.constant 9 : index
    %c0_139 = arith.constant 0 : index
    %c0_140 = arith.constant 0 : index
    %291 = vector.load %arg9[%c9_138, %c0_139, %c0_140] : memref<21x4x196xf32, #tpu.memory_space<vmem>>, vector<1x4x196xf32>
    %292 = vector.shape_cast %291 : vector<1x4x196xf32> to vector<4x196xf32>
    %293 = vector.extract_strided_slice %246 {offsets = [0, 42], sizes = [4, 196], strides = [1, 1]} : vector<4x282xf32> to vector<4x196xf32>
    %294 = arith.mulf %292, %293 : vector<4x196xf32>
    %295 = arith.addf %290, %294 : vector<4x196xf32>
    %c10_141 = arith.constant 10 : index
    %c0_142 = arith.constant 0 : index
    %c0_143 = arith.constant 0 : index
    %296 = vector.load %arg9[%c10_141, %c0_142, %c0_143] : memref<21x4x196xf32, #tpu.memory_space<vmem>>, vector<1x4x196xf32>
    %297 = vector.shape_cast %296 : vector<1x4x196xf32> to vector<4x196xf32>
    %298 = vector.extract_strided_slice %246 {offsets = [0, 43], sizes = [4, 196], strides = [1, 1]} : vector<4x282xf32> to vector<4x196xf32>
    %299 = arith.mulf %297, %298 : vector<4x196xf32>
    %300 = arith.addf %295, %299 : vector<4x196xf32>
    %c11_144 = arith.constant 11 : index
    %c0_145 = arith.constant 0 : index
    %c0_146 = arith.constant 0 : index
    %301 = vector.load %arg9[%c11_144, %c0_145, %c0_146] : memref<21x4x196xf32, #tpu.memory_space<vmem>>, vector<1x4x196xf32>
    %302 = vector.shape_cast %301 : vector<1x4x196xf32> to vector<4x196xf32>
    %303 = vector.extract_strided_slice %246 {offsets = [0, 44], sizes = [4, 196], strides = [1, 1]} : vector<4x282xf32> to vector<4x196xf32>
    %304 = arith.mulf %302, %303 : vector<4x196xf32>
    %305 = arith.addf %300, %304 : vector<4x196xf32>
    %c12_147 = arith.constant 12 : index
    %c0_148 = arith.constant 0 : index
    %c0_149 = arith.constant 0 : index
    %306 = vector.load %arg9[%c12_147, %c0_148, %c0_149] : memref<21x4x196xf32, #tpu.memory_space<vmem>>, vector<1x4x196xf32>
    %307 = vector.shape_cast %306 : vector<1x4x196xf32> to vector<4x196xf32>
    %308 = vector.extract_strided_slice %246 {offsets = [0, 56], sizes = [4, 196], strides = [1, 1]} : vector<4x282xf32> to vector<4x196xf32>
    %309 = arith.mulf %307, %308 : vector<4x196xf32>
    %310 = arith.addf %305, %309 : vector<4x196xf32>
    %c13_150 = arith.constant 13 : index
    %c0_151 = arith.constant 0 : index
    %c0_152 = arith.constant 0 : index
    %311 = vector.load %arg9[%c13_150, %c0_151, %c0_152] : memref<21x4x196xf32, #tpu.memory_space<vmem>>, vector<1x4x196xf32>
    %312 = vector.shape_cast %311 : vector<1x4x196xf32> to vector<4x196xf32>
    %313 = vector.extract_strided_slice %246 {offsets = [0, 57], sizes = [4, 196], strides = [1, 1]} : vector<4x282xf32> to vector<4x196xf32>
    %314 = arith.mulf %312, %313 : vector<4x196xf32>
    %315 = arith.addf %310, %314 : vector<4x196xf32>
    %c14_153 = arith.constant 14 : index
    %c0_154 = arith.constant 0 : index
    %c0_155 = arith.constant 0 : index
    %316 = vector.load %arg9[%c14_153, %c0_154, %c0_155] : memref<21x4x196xf32, #tpu.memory_space<vmem>>, vector<1x4x196xf32>
    %317 = vector.shape_cast %316 : vector<1x4x196xf32> to vector<4x196xf32>
    %318 = vector.extract_strided_slice %246 {offsets = [0, 58], sizes = [4, 196], strides = [1, 1]} : vector<4x282xf32> to vector<4x196xf32>
    %319 = arith.mulf %317, %318 : vector<4x196xf32>
    %320 = arith.addf %315, %319 : vector<4x196xf32>
    %c15_156 = arith.constant 15 : index
    %c0_157 = arith.constant 0 : index
    %c0_158 = arith.constant 0 : index
    %321 = vector.load %arg9[%c15_156, %c0_157, %c0_158] : memref<21x4x196xf32, #tpu.memory_space<vmem>>, vector<1x4x196xf32>
    %322 = vector.shape_cast %321 : vector<1x4x196xf32> to vector<4x196xf32>
    %323 = vector.extract_strided_slice %246 {offsets = [0, 70], sizes = [4, 196], strides = [1, 1]} : vector<4x282xf32> to vector<4x196xf32>
    %324 = arith.mulf %322, %323 : vector<4x196xf32>
    %325 = arith.addf %320, %324 : vector<4x196xf32>
    %c16_159 = arith.constant 16 : index
    %c0_160 = arith.constant 0 : index
    %c0_161 = arith.constant 0 : index
    %326 = vector.load %arg9[%c16_159, %c0_160, %c0_161] : memref<21x4x196xf32, #tpu.memory_space<vmem>>, vector<1x4x196xf32>
    %327 = vector.shape_cast %326 : vector<1x4x196xf32> to vector<4x196xf32>
    %328 = vector.extract_strided_slice %246 {offsets = [0, 71], sizes = [4, 196], strides = [1, 1]} : vector<4x282xf32> to vector<4x196xf32>
    %329 = arith.mulf %327, %328 : vector<4x196xf32>
    %330 = arith.addf %325, %329 : vector<4x196xf32>
    %c17_162 = arith.constant 17 : index
    %c0_163 = arith.constant 0 : index
    %c0_164 = arith.constant 0 : index
    %331 = vector.load %arg9[%c17_162, %c0_163, %c0_164] : memref<21x4x196xf32, #tpu.memory_space<vmem>>, vector<1x4x196xf32>
    %332 = vector.shape_cast %331 : vector<1x4x196xf32> to vector<4x196xf32>
    %333 = vector.extract_strided_slice %246 {offsets = [0, 72], sizes = [4, 196], strides = [1, 1]} : vector<4x282xf32> to vector<4x196xf32>
    %334 = arith.mulf %332, %333 : vector<4x196xf32>
    %335 = arith.addf %330, %334 : vector<4x196xf32>
    %c18_165 = arith.constant 18 : index
    %c0_166 = arith.constant 0 : index
    %c0_167 = arith.constant 0 : index
    %336 = vector.load %arg9[%c18_165, %c0_166, %c0_167] : memref<21x4x196xf32, #tpu.memory_space<vmem>>, vector<1x4x196xf32>
    %337 = vector.shape_cast %336 : vector<1x4x196xf32> to vector<4x196xf32>
    %338 = vector.extract_strided_slice %246 {offsets = [0, 84], sizes = [4, 196], strides = [1, 1]} : vector<4x282xf32> to vector<4x196xf32>
    %339 = arith.mulf %337, %338 : vector<4x196xf32>
    %340 = arith.addf %335, %339 : vector<4x196xf32>
    %c19_168 = arith.constant 19 : index
    %c0_169 = arith.constant 0 : index
    %c0_170 = arith.constant 0 : index
    %341 = vector.load %arg9[%c19_168, %c0_169, %c0_170] : memref<21x4x196xf32, #tpu.memory_space<vmem>>, vector<1x4x196xf32>
    %342 = vector.shape_cast %341 : vector<1x4x196xf32> to vector<4x196xf32>
    %343 = vector.extract_strided_slice %246 {offsets = [0, 85], sizes = [4, 196], strides = [1, 1]} : vector<4x282xf32> to vector<4x196xf32>
    %344 = arith.mulf %342, %343 : vector<4x196xf32>
    %345 = arith.addf %340, %344 : vector<4x196xf32>
    %c20_171 = arith.constant 20 : index
    %c0_172 = arith.constant 0 : index
    %c0_173 = arith.constant 0 : index
    %346 = vector.load %arg9[%c20_171, %c0_172, %c0_173] : memref<21x4x196xf32, #tpu.memory_space<vmem>>, vector<1x4x196xf32>
    %347 = vector.shape_cast %346 : vector<1x4x196xf32> to vector<4x196xf32>
    %348 = vector.extract_strided_slice %246 {offsets = [0, 86], sizes = [4, 196], strides = [1, 1]} : vector<4x282xf32> to vector<4x196xf32>
    %349 = arith.mulf %347, %348 : vector<4x196xf32>
    %350 = arith.addf %345, %349 : vector<4x196xf32>
    %351 = arith.addf %350, %244 : vector<4x196xf32>
    %352 = arith.addf %351, %138 : vector<4x196xf32>
    %cst_174 = arith.constant dense<0.000000e+00> : vector<4xf32>
    %353 = vector.multi_reduction <add>, %352, %cst_174 [1] : vector<4x196xf32> to vector<4xf32>
    %354 = vector.shape_cast %353 : vector<4xf32> to vector<4x1xf32>
    %cst_175 = arith.constant 1.960000e+02 : f32
    %355 = vector.broadcast %cst_175 : f32 to vector<4x1xf32>
    %356 = arith.divf %354, %355 : vector<4x1xf32>
    %c0_176 = arith.constant 0 : index
    %c0_177 = arith.constant 0 : index
    %357 = vector.load %arg10[%c0_176, %c0_177] : memref<2x4xf32, #tpu.memory_space<vmem>>, vector<2x4xf32>
    %c0_178 = arith.constant 0 : index
    %c0_179 = arith.constant 0 : index
    %358 = vector.load %arg11[%c0_178, %c0_179] : memref<2x1xf32, #tpu.memory_space<vmem>>, vector<2x1xf32>
    %359 = vector.extract_strided_slice %357 {offsets = [0, 0], sizes = [2, 1], strides = [1, 1]} : vector<2x4xf32> to vector<2x1xf32>
    %360 = vector.extract_strided_slice %356 {offsets = [0, 0], sizes = [1, 1], strides = [1, 1]} : vector<4x1xf32> to vector<1x1xf32>
    %361 = vector.broadcast %360 : vector<1x1xf32> to vector<2x1xf32>
    %362 = arith.mulf %359, %361 : vector<2x1xf32>
    %363 = vector.extract_strided_slice %357 {offsets = [0, 1], sizes = [2, 1], strides = [1, 1]} : vector<2x4xf32> to vector<2x1xf32>
    %364 = vector.extract_strided_slice %356 {offsets = [1, 0], sizes = [1, 1], strides = [1, 1]} : vector<4x1xf32> to vector<1x1xf32>
    %365 = vector.broadcast %364 : vector<1x1xf32> to vector<2x1xf32>
    %366 = arith.mulf %363, %365 : vector<2x1xf32>
    %367 = arith.addf %362, %366 : vector<2x1xf32>
    %368 = vector.extract_strided_slice %357 {offsets = [0, 2], sizes = [2, 1], strides = [1, 1]} : vector<2x4xf32> to vector<2x1xf32>
    %369 = vector.extract_strided_slice %356 {offsets = [2, 0], sizes = [1, 1], strides = [1, 1]} : vector<4x1xf32> to vector<1x1xf32>
    %370 = vector.broadcast %369 : vector<1x1xf32> to vector<2x1xf32>
    %371 = arith.mulf %368, %370 : vector<2x1xf32>
    %372 = arith.addf %367, %371 : vector<2x1xf32>
    %373 = vector.extract_strided_slice %357 {offsets = [0, 3], sizes = [2, 1], strides = [1, 1]} : vector<2x4xf32> to vector<2x1xf32>
    %374 = vector.extract_strided_slice %356 {offsets = [3, 0], sizes = [1, 1], strides = [1, 1]} : vector<4x1xf32> to vector<1x1xf32>
    %375 = vector.broadcast %374 : vector<1x1xf32> to vector<2x1xf32>
    %376 = arith.mulf %373, %375 : vector<2x1xf32>
    %377 = arith.addf %372, %376 : vector<2x1xf32>
    %378 = arith.addf %377, %358 : vector<2x1xf32>
    %cst_180 = arith.constant 5.000000e-01 : f32
    %379 = vector.broadcast %cst_180 : f32 to vector<2x1xf32>
    %380 = arith.mulf %379, %378 : vector<2x1xf32>
    %cst_181 = arith.constant 0.707106769 : f32
    %381 = vector.broadcast %cst_181 : f32 to vector<2x1xf32>
    %382 = arith.mulf %378, %381 : vector<2x1xf32>
    %383 = math.absf %382 : vector<2x1xf32>
    %cst_182 = arith.constant 0.327591091 : f32
    %384 = vector.broadcast %cst_182 : f32 to vector<2x1xf32>
    %385 = arith.mulf %384, %383 : vector<2x1xf32>
    %cst_183 = arith.constant 1.000000e+00 : f32
    %386 = vector.broadcast %cst_183 : f32 to vector<2x1xf32>
    %387 = arith.addf %386, %385 : vector<2x1xf32>
    %388 = tpu.reciprocal %387 {approx = true} : vector<2x1xf32> -> vector<2x1xf32>
    %cst_184 = arith.constant 1.06140542 : f32
    %389 = vector.broadcast %cst_184 : f32 to vector<2x1xf32>
    %390 = arith.mulf %389, %388 : vector<2x1xf32>
    %cst_185 = arith.constant -1.45315206 : f32
    %391 = vector.broadcast %cst_185 : f32 to vector<2x1xf32>
    %392 = arith.addf %390, %391 : vector<2x1xf32>
    %393 = arith.mulf %392, %388 : vector<2x1xf32>
    %cst_186 = arith.constant 1.42141378 : f32
    %394 = vector.broadcast %cst_186 : f32 to vector<2x1xf32>
    %395 = arith.addf %393, %394 : vector<2x1xf32>
    %396 = arith.mulf %395, %388 : vector<2x1xf32>
    %cst_187 = arith.constant -0.284496725 : f32
    %397 = vector.broadcast %cst_187 : f32 to vector<2x1xf32>
    %398 = arith.addf %396, %397 : vector<2x1xf32>
    %399 = arith.mulf %398, %388 : vector<2x1xf32>
    %cst_188 = arith.constant 0.254829586 : f32
    %400 = vector.broadcast %cst_188 : f32 to vector<2x1xf32>
    %401 = arith.addf %399, %400 : vector<2x1xf32>
    %402 = arith.mulf %401, %388 : vector<2x1xf32>
    %cst_189 = arith.constant 0.000000e+00 : f32
    %403 = vector.broadcast %cst_189 : f32 to vector<2x1xf32>
    %404 = arith.subf %403, %383 : vector<2x1xf32>
    %405 = arith.mulf %404, %383 : vector<2x1xf32>
    %406 = math.exp %405 : vector<2x1xf32>
    %407 = arith.mulf %402, %406 : vector<2x1xf32>
    %cst_190 = arith.constant 1.000000e+00 : f32
    %408 = vector.broadcast %cst_190 : f32 to vector<2x1xf32>
    %409 = arith.subf %408, %407 : vector<2x1xf32>
    %cst_191 = arith.constant 0.000000e+00 : f32
    %410 = vector.broadcast %cst_191 : f32 to vector<2x1xf32>
    %411 = arith.cmpf oge, %382, %410 : vector<2x1xf32>
    %cst_192 = arith.constant 0.000000e+00 : f32
    %412 = vector.broadcast %cst_192 : f32 to vector<2x1xf32>
    %413 = arith.subf %412, %409 : vector<2x1xf32>
    %414 = arith.select %411, %409, %413 : vector<2x1xi1>, vector<2x1xf32>
    %cst_193 = arith.constant 1.000000e+00 : f32
    %415 = vector.broadcast %cst_193 : f32 to vector<2x1xf32>
    %416 = arith.addf %415, %414 : vector<2x1xf32>
    %417 = arith.mulf %380, %416 : vector<2x1xf32>
    %c0_194 = arith.constant 0 : index
    %c0_195 = arith.constant 0 : index
    %418 = vector.load %arg12[%c0_194, %c0_195] : memref<12x2xf32, #tpu.memory_space<vmem>>, vector<12x2xf32>
    %c0_196 = arith.constant 0 : index
    %c0_197 = arith.constant 0 : index
    %419 = vector.load %arg13[%c0_196, %c0_197] : memref<12x1xf32, #tpu.memory_space<vmem>>, vector<12x1xf32>
    %420 = vector.extract_strided_slice %418 {offsets = [0, 0], sizes = [12, 1], strides = [1, 1]} : vector<12x2xf32> to vector<12x1xf32>
    %421 = vector.extract_strided_slice %417 {offsets = [0, 0], sizes = [1, 1], strides = [1, 1]} : vector<2x1xf32> to vector<1x1xf32>
    %422 = vector.broadcast %421 : vector<1x1xf32> to vector<12x1xf32>
    %423 = arith.mulf %420, %422 : vector<12x1xf32>
    %424 = vector.extract_strided_slice %418 {offsets = [0, 1], sizes = [12, 1], strides = [1, 1]} : vector<12x2xf32> to vector<12x1xf32>
    %425 = vector.extract_strided_slice %417 {offsets = [1, 0], sizes = [1, 1], strides = [1, 1]} : vector<2x1xf32> to vector<1x1xf32>
    %426 = vector.broadcast %425 : vector<1x1xf32> to vector<12x1xf32>
    %427 = arith.mulf %424, %426 : vector<12x1xf32>
    %428 = arith.addf %423, %427 : vector<12x1xf32>
    %429 = arith.addf %428, %419 : vector<12x1xf32>
    %430 = vector.extract_strided_slice %429 {offsets = [0, 0], sizes = [4, 1], strides = [1, 1]} : vector<12x1xf32> to vector<4x1xf32>
    %431 = vector.extract_strided_slice %429 {offsets = [4, 0], sizes = [4, 1], strides = [1, 1]} : vector<12x1xf32> to vector<4x1xf32>
    %432 = vector.extract_strided_slice %429 {offsets = [8, 0], sizes = [4, 1], strides = [1, 1]} : vector<12x1xf32> to vector<4x1xf32>
    %433 = arith.maximumf %430, %431 : vector<4x1xf32>
    %434 = arith.maximumf %433, %432 : vector<4x1xf32>
    %435 = arith.subf %430, %434 : vector<4x1xf32>
    %436 = math.exp %435 : vector<4x1xf32>
    %437 = arith.subf %431, %434 : vector<4x1xf32>
    %438 = math.exp %437 : vector<4x1xf32>
    %439 = arith.subf %432, %434 : vector<4x1xf32>
    %440 = math.exp %439 : vector<4x1xf32>
    %441 = arith.addf %436, %438 : vector<4x1xf32>
    %442 = arith.addf %441, %440 : vector<4x1xf32>
    %443 = tpu.reciprocal %442 {approx = true} : vector<4x1xf32> -> vector<4x1xf32>
    %444 = arith.mulf %436, %443 : vector<4x1xf32>
    %445 = vector.broadcast %444 : vector<4x1xf32> to vector<4x196xf32>
    %446 = arith.mulf %350, %445 : vector<4x196xf32>
    %447 = arith.mulf %438, %443 : vector<4x1xf32>
    %448 = vector.broadcast %447 : vector<4x1xf32> to vector<4x196xf32>
    %449 = arith.mulf %244, %448 : vector<4x196xf32>
    %450 = arith.addf %446, %449 : vector<4x196xf32>
    %451 = arith.mulf %440, %443 : vector<4x1xf32>
    %452 = vector.broadcast %451 : vector<4x1xf32> to vector<4x196xf32>
    %453 = arith.mulf %138, %452 : vector<4x196xf32>
    %454 = arith.addf %450, %453 : vector<4x196xf32>
    %c0_198 = arith.constant 0 : index
    %c0_199 = arith.constant 0 : index
    %455 = vector.load %arg7[%c0_198, %c0_199] : memref<4x196xf32, #tpu.memory_space<vmem>>, vector<4x196xf32>
    %456 = arith.addf %137, %455 : vector<4x196xf32>
    %c0_200 = arith.constant 0 : index
    %c0_201 = arith.constant 0 : index
    %c0_202 = arith.constant 0 : index
    %457 = vector.load %arg15[%c0_200, %c0_201, %c0_202] : memref<2x196x196xf32, #tpu.memory_space<vmem>>, vector<1x196x196xf32>
    %458 = vector.shape_cast %457 : vector<1x196x196xf32> to vector<196x196xf32>
    %cst_203 = arith.constant dense<0.000000e+00> : vector<4x196xf32>
    %459 = tpu.matmul %456, %458, %cst_203 {dimension_numbers = #tpu.dot_dimension_numbers<[1], [0], [0], [1], [0, 0, 1, 1], [], []>} : vector<4x196xf32>, vector<196x196xf32>, vector<4x196xf32> -> vector<4x196xf32>
    %c0_204 = arith.constant 0 : index
    %c0_205 = arith.constant 0 : index
    %c0_206 = arith.constant 0 : index
    %460 = vector.load %arg16[%c0_204, %c0_205, %c0_206] : memref<2x1x196xf32, #tpu.memory_space<vmem>>, vector<1x1x196xf32>
    %461 = vector.shape_cast %460 : vector<1x1x196xf32> to vector<1x196xf32>
    %462 = vector.broadcast %461 : vector<1x196xf32> to vector<4x196xf32>
    %463 = arith.addf %459, %462 : vector<4x196xf32>
    %c0_207 = arith.constant 0 : index
    %c0_208 = arith.constant 0 : index
    %c0_209 = arith.constant 0 : index
    %464 = vector.load %arg14[%c0_207, %c0_208, %c0_209] : memref<2x4x1xf32, #tpu.memory_space<vmem>>, vector<1x4x1xf32>
    %465 = vector.shape_cast %464 : vector<1x4x1xf32> to vector<4x1xf32>
    %466 = vector.broadcast %465 : vector<4x1xf32> to vector<4x196xf32>
    %467 = arith.mulf %463, %466 : vector<4x196xf32>
    %c1_210 = arith.constant 1 : index
    %c0_211 = arith.constant 0 : index
    %c0_212 = arith.constant 0 : index
    %468 = vector.load %arg15[%c1_210, %c0_211, %c0_212] : memref<2x196x196xf32, #tpu.memory_space<vmem>>, vector<1x196x196xf32>
    %469 = vector.shape_cast %468 : vector<1x196x196xf32> to vector<196x196xf32>
    %cst_213 = arith.constant dense<0.000000e+00> : vector<4x196xf32>
    %470 = tpu.matmul %456, %469, %cst_213 {dimension_numbers = #tpu.dot_dimension_numbers<[1], [0], [0], [1], [0, 0, 1, 1], [], []>} : vector<4x196xf32>, vector<196x196xf32>, vector<4x196xf32> -> vector<4x196xf32>
    %c1_214 = arith.constant 1 : index
    %c0_215 = arith.constant 0 : index
    %c0_216 = arith.constant 0 : index
    %471 = vector.load %arg16[%c1_214, %c0_215, %c0_216] : memref<2x1x196xf32, #tpu.memory_space<vmem>>, vector<1x1x196xf32>
    %472 = vector.shape_cast %471 : vector<1x1x196xf32> to vector<1x196xf32>
    %473 = vector.broadcast %472 : vector<1x196xf32> to vector<4x196xf32>
    %474 = arith.addf %470, %473 : vector<4x196xf32>
    %c1_217 = arith.constant 1 : index
    %c0_218 = arith.constant 0 : index
    %c0_219 = arith.constant 0 : index
    %475 = vector.load %arg14[%c1_217, %c0_218, %c0_219] : memref<2x4x1xf32, #tpu.memory_space<vmem>>, vector<1x4x1xf32>
    %476 = vector.shape_cast %475 : vector<1x4x1xf32> to vector<4x1xf32>
    %477 = vector.broadcast %476 : vector<4x1xf32> to vector<4x196xf32>
    %478 = arith.mulf %474, %477 : vector<4x196xf32>
    %479 = arith.addf %467, %478 : vector<4x196xf32>
    %c0_220 = arith.constant 0 : index
    %c0_221 = arith.constant 0 : index
    %480 = vector.load %arg17[%c0_220, %c0_221] : memref<4x8xf32, #tpu.memory_space<vmem>>, vector<4x8xf32>
    %481 = tpu.concatenate %479, %137 in 0 : vector<4x196xf32>, vector<4x196xf32> -> vector<8x196xf32>
    %cst_222 = arith.constant dense<0.000000e+00> : vector<4x196xf32>
    %482 = tpu.matmul %480, %481, %cst_222 {dimension_numbers = #tpu.dot_dimension_numbers<[1], [0], [0], [1], [0, 0, 1, 1], [], []>} : vector<4x8xf32>, vector<8x196xf32>, vector<4x196xf32> -> vector<4x196xf32>
    %c0_223 = arith.constant 0 : index
    %c0_224 = arith.constant 0 : index
    %483 = vector.load %arg18[%c0_223, %c0_224] : memref<4x1xf32, #tpu.memory_space<vmem>>, vector<4x1xf32>
    %484 = vector.broadcast %483 : vector<4x1xf32> to vector<4x196xf32>
    %485 = arith.addf %482, %484 : vector<4x196xf32>
    %cst_225 = arith.constant 5.000000e-01 : f32
    %486 = vector.broadcast %cst_225 : f32 to vector<4x196xf32>
    %487 = arith.mulf %486, %485 : vector<4x196xf32>
    %cst_226 = arith.constant 0.707106769 : f32
    %488 = vector.broadcast %cst_226 : f32 to vector<4x196xf32>
    %489 = arith.mulf %485, %488 : vector<4x196xf32>
    %490 = math.absf %489 : vector<4x196xf32>
    %cst_227 = arith.constant 0.327591091 : f32
    %491 = vector.broadcast %cst_227 : f32 to vector<4x196xf32>
    %492 = arith.mulf %491, %490 : vector<4x196xf32>
    %cst_228 = arith.constant 1.000000e+00 : f32
    %493 = vector.broadcast %cst_228 : f32 to vector<4x196xf32>
    %494 = arith.addf %493, %492 : vector<4x196xf32>
    %495 = tpu.reciprocal %494 {approx = true} : vector<4x196xf32> -> vector<4x196xf32>
    %cst_229 = arith.constant 1.06140542 : f32
    %496 = vector.broadcast %cst_229 : f32 to vector<4x196xf32>
    %497 = arith.mulf %496, %495 : vector<4x196xf32>
    %cst_230 = arith.constant -1.45315206 : f32
    %498 = vector.broadcast %cst_230 : f32 to vector<4x196xf32>
    %499 = arith.addf %497, %498 : vector<4x196xf32>
    %500 = arith.mulf %499, %495 : vector<4x196xf32>
    %cst_231 = arith.constant 1.42141378 : f32
    %501 = vector.broadcast %cst_231 : f32 to vector<4x196xf32>
    %502 = arith.addf %500, %501 : vector<4x196xf32>
    %503 = arith.mulf %502, %495 : vector<4x196xf32>
    %cst_232 = arith.constant -0.284496725 : f32
    %504 = vector.broadcast %cst_232 : f32 to vector<4x196xf32>
    %505 = arith.addf %503, %504 : vector<4x196xf32>
    %506 = arith.mulf %505, %495 : vector<4x196xf32>
    %cst_233 = arith.constant 0.254829586 : f32
    %507 = vector.broadcast %cst_233 : f32 to vector<4x196xf32>
    %508 = arith.addf %506, %507 : vector<4x196xf32>
    %509 = arith.mulf %508, %495 : vector<4x196xf32>
    %cst_234 = arith.constant 0.000000e+00 : f32
    %510 = vector.broadcast %cst_234 : f32 to vector<4x196xf32>
    %511 = arith.subf %510, %490 : vector<4x196xf32>
    %512 = arith.mulf %511, %490 : vector<4x196xf32>
    %513 = math.exp %512 : vector<4x196xf32>
    %514 = arith.mulf %509, %513 : vector<4x196xf32>
    %cst_235 = arith.constant 1.000000e+00 : f32
    %515 = vector.broadcast %cst_235 : f32 to vector<4x196xf32>
    %516 = arith.subf %515, %514 : vector<4x196xf32>
    %cst_236 = arith.constant 0.000000e+00 : f32
    %517 = vector.broadcast %cst_236 : f32 to vector<4x196xf32>
    %518 = arith.cmpf oge, %489, %517 : vector<4x196xf32>
    %cst_237 = arith.constant 0.000000e+00 : f32
    %519 = vector.broadcast %cst_237 : f32 to vector<4x196xf32>
    %520 = arith.subf %519, %516 : vector<4x196xf32>
    %521 = arith.select %518, %516, %520 : vector<4x196xi1>, vector<4x196xf32>
    %cst_238 = arith.constant 1.000000e+00 : f32
    %522 = vector.broadcast %cst_238 : f32 to vector<4x196xf32>
    %523 = arith.addf %522, %521 : vector<4x196xf32>
    %524 = arith.mulf %487, %523 : vector<4x196xf32>
    %c0_239 = arith.constant 0 : index
    %c0_240 = arith.constant 0 : index
    %525 = vector.load %arg19[%c0_239, %c0_240] : memref<4x196xf32, #tpu.memory_space<vmem>>, vector<4x196xf32>
    %526 = arith.addf %524, %525 : vector<4x196xf32>
    %c0_241 = arith.constant 0 : index
    %c0_242 = arith.constant 0 : index
    %c0_243 = arith.constant 0 : index
    %527 = vector.load %arg20[%c0_241, %c0_242, %c0_243] : memref<2x196x196xf32, #tpu.memory_space<vmem>>, vector<1x196x196xf32>
    %528 = vector.shape_cast %527 : vector<1x196x196xf32> to vector<196x196xf32>
    %cst_244 = arith.constant dense<0.000000e+00> : vector<4x196xf32>
    %529 = tpu.matmul %526, %528, %cst_244 {dimension_numbers = #tpu.dot_dimension_numbers<[1], [0], [0], [1], [0, 0, 1, 1], [], []>} : vector<4x196xf32>, vector<196x196xf32>, vector<4x196xf32> -> vector<4x196xf32>
    %c0_245 = arith.constant 0 : index
    %c0_246 = arith.constant 0 : index
    %c0_247 = arith.constant 0 : index
    %530 = vector.load %arg21[%c0_245, %c0_246, %c0_247] : memref<2x1x196xf32, #tpu.memory_space<vmem>>, vector<1x1x196xf32>
    %531 = vector.shape_cast %530 : vector<1x1x196xf32> to vector<1x196xf32>
    %532 = vector.broadcast %531 : vector<1x196xf32> to vector<4x196xf32>
    %533 = arith.addf %529, %532 : vector<4x196xf32>
    %c0_248 = arith.constant 0 : index
    %c0_249 = arith.constant 0 : index
    %c0_250 = arith.constant 0 : index
    %534 = vector.load %arg14[%c0_248, %c0_249, %c0_250] : memref<2x4x1xf32, #tpu.memory_space<vmem>>, vector<1x4x1xf32>
    %535 = vector.shape_cast %534 : vector<1x4x1xf32> to vector<4x1xf32>
    %536 = vector.broadcast %535 : vector<4x1xf32> to vector<4x196xf32>
    %537 = arith.mulf %533, %536 : vector<4x196xf32>
    %c1_251 = arith.constant 1 : index
    %c0_252 = arith.constant 0 : index
    %c0_253 = arith.constant 0 : index
    %538 = vector.load %arg20[%c1_251, %c0_252, %c0_253] : memref<2x196x196xf32, #tpu.memory_space<vmem>>, vector<1x196x196xf32>
    %539 = vector.shape_cast %538 : vector<1x196x196xf32> to vector<196x196xf32>
    %cst_254 = arith.constant dense<0.000000e+00> : vector<4x196xf32>
    %540 = tpu.matmul %526, %539, %cst_254 {dimension_numbers = #tpu.dot_dimension_numbers<[1], [0], [0], [1], [0, 0, 1, 1], [], []>} : vector<4x196xf32>, vector<196x196xf32>, vector<4x196xf32> -> vector<4x196xf32>
    %c1_255 = arith.constant 1 : index
    %c0_256 = arith.constant 0 : index
    %c0_257 = arith.constant 0 : index
    %541 = vector.load %arg21[%c1_255, %c0_256, %c0_257] : memref<2x1x196xf32, #tpu.memory_space<vmem>>, vector<1x1x196xf32>
    %542 = vector.shape_cast %541 : vector<1x1x196xf32> to vector<1x196xf32>
    %543 = vector.broadcast %542 : vector<1x196xf32> to vector<4x196xf32>
    %544 = arith.addf %540, %543 : vector<4x196xf32>
    %c1_258 = arith.constant 1 : index
    %c0_259 = arith.constant 0 : index
    %c0_260 = arith.constant 0 : index
    %545 = vector.load %arg14[%c1_258, %c0_259, %c0_260] : memref<2x4x1xf32, #tpu.memory_space<vmem>>, vector<1x4x1xf32>
    %546 = vector.shape_cast %545 : vector<1x4x1xf32> to vector<4x1xf32>
    %547 = vector.broadcast %546 : vector<4x1xf32> to vector<4x196xf32>
    %548 = arith.mulf %544, %547 : vector<4x196xf32>
    %549 = arith.addf %537, %548 : vector<4x196xf32>
    %c0_261 = arith.constant 0 : index
    %c0_262 = arith.constant 0 : index
    %550 = vector.load %arg22[%c0_261, %c0_262] : memref<4x8xf32, #tpu.memory_space<vmem>>, vector<4x8xf32>
    %551 = tpu.concatenate %137, %549 in 0 : vector<4x196xf32>, vector<4x196xf32> -> vector<8x196xf32>
    %cst_263 = arith.constant dense<0.000000e+00> : vector<4x196xf32>
    %552 = tpu.matmul %550, %551, %cst_263 {dimension_numbers = #tpu.dot_dimension_numbers<[1], [0], [0], [1], [0, 0, 1, 1], [], []>} : vector<4x8xf32>, vector<8x196xf32>, vector<4x196xf32> -> vector<4x196xf32>
    %c0_264 = arith.constant 0 : index
    %c0_265 = arith.constant 0 : index
    %553 = vector.load %arg23[%c0_264, %c0_265] : memref<8x8xf32, #tpu.memory_space<vmem>>, vector<8x8xf32>
    %554 = tpu.concatenate %552, %454 in 0 : vector<4x196xf32>, vector<4x196xf32> -> vector<8x196xf32>
    %cst_266 = arith.constant dense<0.000000e+00> : vector<8x196xf32>
    %555 = tpu.matmul %553, %554, %cst_266 {dimension_numbers = #tpu.dot_dimension_numbers<[1], [0], [0], [1], [0, 0, 1, 1], [], []>} : vector<8x8xf32>, vector<8x196xf32>, vector<8x196xf32> -> vector<8x196xf32>
    %c0_267 = arith.constant 0 : index
    %c0_268 = arith.constant 0 : index
    %c0_269 = arith.constant 0 : index
    %556 = vector.load %arg24[%c0_267, %c0_268, %c0_269] : memref<1x8x196xf32, #tpu.memory_space<vmem>>, vector<1x8x196xf32>
    %557 = vector.shape_cast %556 : vector<1x8x196xf32> to vector<8x196xf32>
    %558 = vector.shape_cast %555 : vector<8x196xf32> to vector<1x8x196xf32>
    tpu.vector_store %arg24[%c0_267, %c0_268, %c0_269], %558 {strides = array<i32>} : memref<1x8x196xf32, #tpu.memory_space<vmem>>, vector<1x8x196xf32>,
    return
  }
  func.func @transform_0(%arg0: i32) -> (i32, i32, i32) {
    %c0_i32 = arith.constant 0 : i32
    %c0_i32_0 = arith.constant 0 : i32
    %c0_i32_1 = arith.constant 0 : i32
    return %arg0, %c0_i32, %c0_i32_0 : i32, i32, i32
  }
  func.func @transform_1(%arg0: i32) -> (i32, i32) {
    %c0_i32 = arith.constant 0 : i32
    %c0_i32_0 = arith.constant 0 : i32
    %c0_i32_1 = arith.constant 0 : i32
    return %c0_i32, %c0_i32_0 : i32, i32
  }
  func.func @transform_2(%arg0: i32) -> (i32, i32) {
    %c0_i32 = arith.constant 0 : i32
    %c0_i32_0 = arith.constant 0 : i32
    %c0_i32_1 = arith.constant 0 : i32
    return %c0_i32, %c0_i32_0 : i32, i32
  }
  func.func @transform_3(%arg0: i32) -> (i32, i32, i32) {
    %c0_i32 = arith.constant 0 : i32
    %c0_i32_0 = arith.constant 0 : i32
    %c0_i32_1 = arith.constant 0 : i32
    %c0_i32_2 = arith.constant 0 : i32
    return %c0_i32, %c0_i32_0, %c0_i32_1 : i32, i32, i32
  }
  func.func @transform_4(%arg0: i32) -> (i32, i32) {
    %c0_i32 = arith.constant 0 : i32
    %c0_i32_0 = arith.constant 0 : i32
    %c0_i32_1 = arith.constant 0 : i32
    return %c0_i32, %c0_i32_0 : i32, i32
  }
  func.func @transform_5(%arg0: i32) -> (i32, i32) {
    %c0_i32 = arith.constant 0 : i32
    %c0_i32_0 = arith.constant 0 : i32
    %c0_i32_1 = arith.constant 0 : i32
    return %c0_i32, %c0_i32_0 : i32, i32
  }
  func.func @transform_6(%arg0: i32) -> (i32, i32) {
    %c0_i32 = arith.constant 0 : i32
    %c0_i32_0 = arith.constant 0 : i32
    %c0_i32_1 = arith.constant 0 : i32
    return %c0_i32, %c0_i32_0 : i32, i32
  }
  func.func @transform_7(%arg0: i32) -> (i32, i32, i32) {
    %c0_i32 = arith.constant 0 : i32
    %c0_i32_0 = arith.constant 0 : i32
    %c0_i32_1 = arith.constant 0 : i32
    %c0_i32_2 = arith.constant 0 : i32
    return %c0_i32, %c0_i32_0, %c0_i32_1 : i32, i32, i32
  }
  func.func @transform_8(%arg0: i32) -> (i32, i32, i32) {
    %c0_i32 = arith.constant 0 : i32
    %c0_i32_0 = arith.constant 0 : i32
    %c0_i32_1 = arith.constant 0 : i32
    %c0_i32_2 = arith.constant 0 : i32
    return %c0_i32, %c0_i32_0, %c0_i32_1 : i32, i32, i32
  }
  func.func @transform_9(%arg0: i32) -> (i32, i32) {
    %c0_i32 = arith.constant 0 : i32
    %c0_i32_0 = arith.constant 0 : i32
    %c0_i32_1 = arith.constant 0 : i32
    return %c0_i32, %c0_i32_0 : i32, i32
  }
  func.func @transform_10(%arg0: i32) -> (i32, i32) {
    %c0_i32 = arith.constant 0 : i32
    %c0_i32_0 = arith.constant 0 : i32
    %c0_i32_1 = arith.constant 0 : i32
    return %c0_i32, %c0_i32_0 : i32, i32
  }
  func.func @transform_11(%arg0: i32) -> (i32, i32) {
    %c0_i32 = arith.constant 0 : i32
    %c0_i32_0 = arith.constant 0 : i32
    %c0_i32_1 = arith.constant 0 : i32
    return %c0_i32, %c0_i32_0 : i32, i32
  }
  func.func @transform_12(%arg0: i32) -> (i32, i32) {
    %c0_i32 = arith.constant 0 : i32
    %c0_i32_0 = arith.constant 0 : i32
    %c0_i32_1 = arith.constant 0 : i32
    return %c0_i32, %c0_i32_0 : i32, i32
  }
  func.func @transform_13(%arg0: i32) -> (i32, i32, i32) {
    %c0_i32 = arith.constant 0 : i32
    %c0_i32_0 = arith.constant 0 : i32
    %c0_i32_1 = arith.constant 0 : i32
    %c0_i32_2 = arith.constant 0 : i32
    return %c0_i32, %c0_i32_0, %c0_i32_1 : i32, i32, i32
  }
  func.func @transform_14(%arg0: i32) -> (i32, i32, i32) {
    %c0_i32 = arith.constant 0 : i32
    %c0_i32_0 = arith.constant 0 : i32
    %c0_i32_1 = arith.constant 0 : i32
    %c0_i32_2 = arith.constant 0 : i32
    return %c0_i32, %c0_i32_0, %c0_i32_1 : i32, i32, i32
  }
  func.func @transform_15(%arg0: i32) -> (i32, i32, i32) {
    %c0_i32 = arith.constant 0 : i32
    %c0_i32_0 = arith.constant 0 : i32
    %c0_i32_1 = arith.constant 0 : i32
    %c0_i32_2 = arith.constant 0 : i32
    return %c0_i32, %c0_i32_0, %c0_i32_1 : i32, i32, i32
  }
  func.func @transform_16(%arg0: i32) -> (i32, i32) {
    %c0_i32 = arith.constant 0 : i32
    %c0_i32_0 = arith.constant 0 : i32
    %c0_i32_1 = arith.constant 0 : i32
    return %c0_i32, %c0_i32_0 : i32, i32
  }
  func.func @transform_17(%arg0: i32) -> (i32, i32) {
    %c0_i32 = arith.constant 0 : i32
    %c0_i32_0 = arith.constant 0 : i32
    %c0_i32_1 = arith.constant 0 : i32
    return %c0_i32, %c0_i32_0 : i32, i32
  }
  func.func @transform_18(%arg0: i32) -> (i32, i32) {
    %c0_i32 = arith.constant 0 : i32
    %c0_i32_0 = arith.constant 0 : i32
    %c0_i32_1 = arith.constant 0 : i32
    return %c0_i32, %c0_i32_0 : i32, i32
  }
  func.func @transform_19(%arg0: i32) -> (i32, i32, i32) {
    %c0_i32 = arith.constant 0 : i32
    %c0_i32_0 = arith.constant 0 : i32
    %c0_i32_1 = arith.constant 0 : i32
    %c0_i32_2 = arith.constant 0 : i32
    return %c0_i32, %c0_i32_0, %c0_i32_1 : i32, i32, i32
  }
  func.func @transform_20(%arg0: i32) -> (i32, i32, i32) {
    %c0_i32 = arith.constant 0 : i32
    %c0_i32_0 = arith.constant 0 : i32
    %c0_i32_1 = arith.constant 0 : i32
    %c0_i32_2 = arith.constant 0 : i32
    return %c0_i32, %c0_i32_0, %c0_i32_1 : i32, i32, i32
  }
  func.func @transform_21(%arg0: i32) -> (i32, i32) {
    %c0_i32 = arith.constant 0 : i32
    %c0_i32_0 = arith.constant 0 : i32
    %c0_i32_1 = arith.constant 0 : i32
    return %c0_i32, %c0_i32_0 : i32, i32
  }
  func.func @transform_22(%arg0: i32) -> (i32, i32) {
    %c0_i32 = arith.constant 0 : i32
    %c0_i32_0 = arith.constant 0 : i32
    %c0_i32_1 = arith.constant 0 : i32
    return %c0_i32, %c0_i32_0 : i32, i32
  }
  func.func @transform_23(%arg0: i32) -> (i32, i32, i32) {
    %c0_i32 = arith.constant 0 : i32
    %c0_i32_0 = arith.constant 0 : i32
    %c0_i32_1 = arith.constant 0 : i32
    return %arg0, %c0_i32, %c0_i32_0 : i32, i32, i32
  }
}

</mosaic_0001>

<bundles_post_ra>
// kernel: token_mixing_forward.1
= control target key start
LH: loop header
LB: loop body
LE: loop exit
PB: predicated region body
PF: predicated region fallthrough
CT: control target
= control target key end

     0   :  { %s4294_s0 = inlined_call_operand.vmem [shape: f32[2,8,196], index: 0, kind: input, shape index: {}]   ;;  %s4295_s1 = inlined_call_operand.vmem [shape: f32[8,1], index: 1, kind: input, shape index: {}]   ;;  %s4296_s2 = inlined_call_operand.vmem [shape: f32[8,1], index: 2, kind: input, shape index: {}]   ;;  %s4297_s3 = inlined_call_operand.vmem [shape: f32[9,8,196], index: 3, kind: input, shape index: {}]   ;;  %s4298_s4 = inlined_call_operand.vmem [shape: f32[8,8], index: 4, kind: input, shape index: {}]   ;;  %s4299_s5 = inlined_call_operand.vmem [shape: f32[8,1], index: 5, kind: input, shape index: {}]   ;;  %s4300_s6 = inlined_call_operand.vmem [shape: f32[4,196], index: 6, kind: input, shape index: {}]   ;;  %s4301_s7 = inlined_call_operand.vmem [shape: f32[21,4,196], index: 7, kind: input, shape index: {}]   ;;  %s4302_s8 = inlined_call_operand.vmem [shape: f32[21,4,196], index: 8, kind: input, shape index: {}]   ;;  %s4303_s9 = inlined_call_operand.vmem [shape: f32[2,4], index: 9, kind: input, shape index: {}]   ;;  %s4304_s10 = inlined_call_operand.vmem [shape: f32[2,1], index: 10, kind: input, shape index: {}]   ;;  %s4305_s11 = inlined_call_operand.vmem [shape: f32[12,2], index: 11, kind: input, shape index: {}]   ;;  %s4306_s12 = inlined_call_operand.vmem [shape: f32[12,1], index: 12, kind: input, shape index: {}]   ;;  %s4307_s13 = inlined_call_operand.vmem [shape: f32[2,4,1], index: 13, kind: input, shape index: {}]   ;;  %s4308_s14 = inlined_call_operand.vmem [shape: f32[2,196,196], index: 14, kind: input, shape index: {}]   ;;  %s4309_s15 = inlined_call_operand.vmem [shape: f32[2,1,196], index: 15, kind: input, shape index: {}]   ;;  %s4310_s16 = inlined_call_operand.vmem [shape: f32[4,8], index: 16, kind: input, shape index: {}]   ;;  %s4311_s17 = inlined_call_operand.vmem [shape: f32[4,1], index: 17, kind: input, shape index: {}]   ;;  %s4312_s18 = inlined_call_operand.vmem [shape: f32[4,196], index: 18, kind: input, shape index: {}]   ;;  %s4313_s19 = inlined_call_operand.vmem [shape: f32[2,196,196], index: 19, kind: input, shape index: {}]   ;;  %s4314_s20 = inlined_call_operand.vmem [shape: f32[2,1,196], index: 20, kind: input, shape index: {}]   ;;  %s4315_s21 = inlined_call_operand.vmem [shape: f32[4,8], index: 21, kind: input, shape index: {}]   ;;  %s4316_s22 = inlined_call_operand.vmem [shape: f32[8,8], index: 22, kind: input, shape index: {}]   ;;  %s4317_s23 = inlined_call_operand.vmem [shape: f32[2,8,196], index: 23, kind: output, shape index: {}]  }
   0x1   :  { %4341 = sst [smem:[#allocation2_spill]] %s4294_s0 }
   0x2   :  { %4342 = sst [smem:[#allocation3_spill]] %s4295_s1 }
   0x3   :  { %4343 = sst [smem:[#allocation4_spill]] %s4296_s2 }
   0x4   :  { %4344 = sst [smem:[#allocation5_spill]] %s4297_s3 }
   0x5   :  { %4345 = sst [smem:[#allocation6_spill]] %s4298_s4  ;;  %s3082_s4 = smov 0  }
   0x6   :  { %4346 = sst [smem:[#allocation7_spill]] %s4299_s5 }
   0x7   :  { %4347 = sst [smem:[#allocation8_spill]] %s4300_s6 }
   0x8   :  { %4348 = sst [smem:[#allocation9_spill]] %s4301_s7 }
   0x9 LB: > { %s2640_s30 = sadd.s32 4294967295, %s2921_s4   ;;  %p2644_p0 = scmp.ge.s32.totalorder %s2921_s4, 1  ;;  %s2921_s4 = sphi %s3082_s4, %s33_s4  }
   0xa   : > { %p637_p1 = scmp.lt.s32.totalorder %s2921_s4, 3 }
   0xc   : > { %p638_p2 = pnand %p2644_p0, %p637_p1 }
   0xd   : > { %s4349_s5 = sld [smem:[#allocation3_spill]] (!%p638_p2)  ;;  %p701_p3 = scmp.lt.s32.totalorder (!%p638_p2), %s2640_s30, 1 }
   0xe   : > { %641 = sbr.rel (%p638_p2) target bundleno = 1998 (0x7ce), region = 112  ;;  %s4350_s2 = sld [smem:[#allocation4_spill]] (!%p638_p2) }
   0xf   : > { %s4351_s28 = sld [smem:[#allocation2_spill]] (!%p638_p2)  ;;  %s2924_s3 = smov (!%p638_p2), 15  }
  0x10   : > { %s4333_s0 = smov (!%p638_p2), 127   ;;  %s4337_s24 = smov (!%p638_p2), 126  }
  0x11   : > { %s4331_s25 = smov (!%p638_p2), 114   ;;  %s4327_s1 = smov (!%p638_p2), 112  }
  0x12   : > { %s4323_s26 = smov (!%p638_p2), 100   ;;  %s4325_s27 = smov (!%p638_p2), 98  }
  0x13   : > { %v713_v0 = vld [vmem:[%s4349_s5] sm:$0xff]  ;;  %v2923_v1 = vmov 0   ;;  %s4372_s30 = smov (!%p701_p3, %s2640_s30), 1  ;;  %vm787_vm2 = vcmask 121856   ;;  %vm792_vm3 = vcmask 678912   ;;  %s4329_s5 = smov 113  }
  0x14   : > { %2875 = vset.pattern.permute.xlu0 %v2923_v1  ;;  %2876 = vset.pattern.permute.xlu1 %v2923_v1  ;;  %v721_v2 = vld [vmem:[%s4350_s2] sm:$0xff]  ;;  %s4320_s6 = sshll.u32 %s4372_s30, 4  ;;  %s4321_s2 = smov 99   ;;  %vm807_vm4 = vcmask 1039360   ;;  %vm822_vm5 = vcmask 1031168   ;;  %vm837_vm6 = vcmask 932864  }
  0x15   : > { %716 = vperm.xlu0 %2875, %v713_v0   ;;  %s705_s29 = scalar_lea.vmem %s4351_s28, %s4320_s6  ;;  %s4353_s7 = sld [smem:[#allocation5_spill]]  ;;  %vm852_vm7 = vcmask 924672   ;;  %vm867_vm8 = vcmask 916480   ;;  %vm882_vm9 = vcmask 818176   ;;  %vm897_vm10 = vcmask 809984  }
  0x16   : > { %v711_v4 = vld [vmem:[%s705_s29] sm:$0xff]  ;;  %v712_v5 = vld [vmem:[%s705_s29 + $0x8] sm:$0xff]  ;;  %s4352_s29 = sld [smem:[#allocation7_spill]]  ;;  %vm912_vm11 = vcmask 801792   ;;  %vm927_vm12 = vcmask 64512   ;;  %vm1423_vm13 = vcmask 1043456  }
  0x17   : > { %s4335_s6 = smov 43   ;;  %s4336_s28 = smov 125  }
  0x19   : > { %724 = vperm.xlu0 %2875, %v721_v2   ;;  %v2932_v2 = vmov 0.0  }
  0x1a   : > { %995 = vmatprep.mubr.f32.mxu0 %v2932_v2 }
  0x90   : > { %v717_v3 = vpop.permute.xlu0 %716 }
  0x91   : > { %v719_v6 = vmul.f32 %v717_v3, %v711_v4  ;;  %v720_v7 = vmul.f32 %v717_v3, %v712_v5  ;;  %v921_v3 = vld [vmem:[%s4352_s29] sm:$0xff]  ;;  %s2934_s29 = smov 17  }
  0x92   : > { %v2763_v4 = vld [vmem:[%s4307_s13 + $0x4] sm:$0xf] }
  0x94   : > { %v725_v8 = vpop.permute.xlu0 %724 }
  0x95   : > { %v727_v9 = vadd.f32 %v725_v8, %v719_v6  ;;  %v728_v10 = vadd.f32 %v725_v8, %v720_v7 }
  0x97   : > { %v731_v11 = vmul.f32 0.70710677, %v727_v9  ;;  %v732_v12 = vmul.f32 0.70710677, %v728_v10  ;;  %v729_v54 = vmul.f32 0.5, %v727_v9  ;;  %v730_v59 = vmul.f32 0.5, %v728_v10 }
  0x99   : > { %v733_v13 = vand.u32 2147483647, %v731_v11  ;;  %v734_v14 = vand.u32 2147483647, %v732_v12  ;;  %vm771_vm0 = vcmp.ge.f32.partialorder %v731_v11, 0.0  ;;  %vm772_vm1 = vcmp.ge.f32.partialorder %v732_v12, 0.0 }
  0x9a   : > { %v2650_v12 = vld [vmem:[%s4353_s7 + $0x18] sm:$0xff] }
  0x9b   : > { %v735_v15 = vmul.f32 0.3275911, %v733_v13  ;;  %v736_v16 = vmul.f32 0.3275911, %v734_v14  ;;  %v759_v19 = vsub.f32 0.0, %v733_v13  ;;  %v760_v20 = vsub.f32 0.0, %v734_v14 }
  0x9d   : > { %v737_v17 = vadd.f32 1.0, %v735_v15  ;;  %v738_v18 = vadd.f32 1.0, %v736_v16  ;;  %v761_v21 = vmul.f32 %v759_v19, %v733_v13  ;;  %v762_v22 = vmul.f32 %v760_v20, %v734_v14  ;;  %v2649_v13 = vld [vmem:[%s4353_s7 + $0x10] sm:$0xff]  ;;  %v795_v16 = vld [vmem:[%s4353_s7 + $0x8] sm:$0xff]  ;;  %v794_v19 = vld [vmem:[%s4353_s7] sm:$0xff] }
  0x9f   : > { %2879 = vrcp.f32 %v737_v17  ;;  %v763_v25 = vmul.f32 1.442695, %v761_v21  ;;  %v765_v27 = vmul.f32 1.442695, %v762_v22  ;;  %v2652_v17 = vld [vmem:[%s4353_s7 + $0x28] sm:$0xff]  ;;  %v2651_v21 = vld [vmem:[%s4353_s7 + $0x20] sm:$0xff] }
  0xa0   : > { %2881 = vrcp.f32 %v738_v18 }
  0xa1   : > { %2883 = vpow2.f32 %v763_v25 }
  0xa2   : > { %2885 = vpow2.f32 %v765_v27  ;;  %v2653_v27 = vld [vmem:[%s4353_s7 + $0x30] sm:$0xff] }
  0xac   : > { %v2880_v23 = vpop.eup %2879 }
  0xad   : > { %v2882_v24 = vpop.eup %2881  ;;  %v741_v26 = vmul.f32 1.0614054, %v2880_v23 }
  0xae   : > { %v742_v28 = vmul.f32 1.0614054, %v2882_v24  ;;  %v2884_v44 = vpop.eup %2883 }
  0xaf   : > { %v743_v29 = vadd.f32 -1.4531521, %v741_v26  ;;  %v2886_v46 = vpop.eup %2885 }
  0xb0   : > { %v744_v30 = vadd.f32 -1.4531521, %v742_v28 }
  0xb1   : > { %v745_v31 = vmul.f32 %v2880_v23, %v743_v29 }
  0xb2   : > { %v746_v32 = vmul.f32 %v2882_v24, %v744_v30 }
  0xb3   : > { %v747_v33 = vadd.f32 1.4214138, %v745_v31  ;;  %v2656_v31 = vld [vmem:[%s4353_s7 + $0x48] sm:$0xff] }
  0xb4   : > { %v748_v34 = vadd.f32 1.4214138, %v746_v32 }
  0xb5   : > { %v749_v35 = vmul.f32 %v2880_v23, %v747_v33 }
  0xb6   : > { %v750_v36 = vmul.f32 %v2882_v24, %v748_v34 }
  0xb7   : > { %v751_v37 = vadd.f32 -0.28449672, %v749_v35 }
  0xb8   : > { %v752_v38 = vadd.f32 -0.28449672, %v750_v36  ;;  %v2655_v36 = vld [vmem:[%s4353_s7 + $0x40] sm:$0xff] }
  0xb9   : > { %v753_v39 = vmul.f32 %v2880_v23, %v751_v37 }
  0xba   : > { %v754_v40 = vmul.f32 %v2882_v24, %v752_v38 }
  0xbb   : > { %v755_v41 = vadd.f32 0.2548296, %v753_v39 }
  0xbc   : > { %v756_v42 = vadd.f32 0.2548296, %v754_v40  ;;  %v2658_v40 = vld [vmem:[%s4353_s7 + $0x58] sm:$0xff] }
  0xbd   : > { %v757_v43 = vmul.f32 %v2880_v23, %v755_v41 }
  0xbe   : > { %v758_v45 = vmul.f32 %v2882_v24, %v756_v42  ;;  %v2654_v24 = vld [vmem:[%s4353_s7 + $0x38] sm:$0xff] }
  0xbf   : > { %v767_v47 = vmul.f32 %v2884_v44, %v757_v43  ;;  %v2657_v43 = vld [vmem:[%s4353_s7 + $0x50] sm:$0xff] }
  0xc0   : > { %v768_v48 = vmul.f32 %v2886_v46, %v758_v45 }
  0xc1   : > { %v769_v49 = vsub.f32 1.0, %v767_v47  ;;  %v2660_v47 = vld [vmem:[%s4353_s7 + $0x68] sm:$0xff] }
  0xc2   : > { %v770_v50 = vsub.f32 1.0, %v768_v48 }
  0xc3   : > { %v773_v51 = vsub.f32 0.0, %v769_v49 }
  0xc4   : > { %v774_v52 = vsub.f32 0.0, %v770_v50 }
  0xc5   : > { %v775_v53 = vsel %vm771_vm0, %v769_v49, %v773_v51  ;;  %v2659_v51 = vld [vmem:[%s4353_s7 + $0x60] sm:$0xff]  ;;  %vm1747_vm0 = vcmask 556032  }
  0xc6   : > { %v777_v55 = vadd.f32 1.0, %v775_v53  ;;  %v776_v56 = vsel %vm772_vm1, %v770_v50, %v774_v52  ;;  %vm1062_vm1 = vcmask 138240  }
  0xc7   : > { %v778_v58 = vadd.f32 1.0, %v776_v56  ;;  %v2662_v56 = vld [vmem:[%s4353_s7 + $0x78] sm:$0xff] }
  0xc8   : > { %v779_v57 = vmul.f32 %v777_v55, %v729_v54 }
  0xc9   : > { %v780_v60 = vmul.f32 %v778_v58, %v730_v59  ;;  %v2661_v59 = vld [vmem:[%s4353_s7 + $0x70] sm:$0xff] }
  0xca   : > { %783 = vrot.lane.b32.xlu1 %v779_v57, %s2924_s3 }
  0xce   : > { %785 = vrot.lane.b32.xlu1 %v780_v60, %s2924_s3  ;;  %s4340_s3 = smov 57  }
 0x13c   : > { %v784_v61 = vpop.permute.xlu1 %783 }
 0x13d   : > { %v3104_v62 = vsel %vm787_vm2, 0.0, %v784_v61 }
 0x13e   : > { %803 = vrot.lane.b32.xlu0 %v3104_v62, %s4333_s0  ;;  %v796_v29 = vmul.f32 %v794_v19, %v3104_v62  ;;  %v1716_v19 = vld [vmem:[%s4308_s14 + $0xf8] sm:$0xff] }
 0x13f   : > { %1757 = vmatprep.subr.mxu1 %v1716_v19  ;;  %v2709_v19 = vld [vmem:[%s4308_s14 + $0x190] sm:$0xff] }
 0x140   : > { %v786_v63 = vpop.permute.xlu1 %785 }
 0x141   : > { %v788_v0 = vsel %vm787_vm2, %v784_v61, %v786_v63  ;;  %vm1067_vm2 = vcmask 695296  }
 0x142   : > { %v793_v1 = vsel %vm792_vm3, %v788_v0, 0.0  ;;  %818 = vrot.lane.b32.xlu0 %v3104_v62, %s4337_s24  ;;  %vm1271_vm3 = vcmask 351232  }
 0x143   : > { %805 = vrot.lane.b32.xlu1 %v793_v1, %s4333_s0  ;;  %v797_v25 = vmul.f32 %v795_v16, %v793_v1 }
 0x146   : > { %833 = vrot.lane.b32.xlu0 %v3104_v62, %s4331_s25 }
 0x147   : > { %820 = vrot.lane.b32.xlu1 %v793_v1, %s4337_s24 }
 0x14a   : > { %848 = vrot.lane.b32.xlu0 %v3104_v62, %s4329_s5 }
 0x14b   : > { %835 = vrot.lane.b32.xlu1 %v793_v1, %s4331_s25  ;;  %s2942_s25 = smov 123  }
 0x14e   : > { %863 = vrot.lane.b32.xlu0 %v3104_v62, %s4327_s1 }
 0x14f   : > { %850 = vrot.lane.b32.xlu1 %v793_v1, %s4329_s5  ;;  %s4355_s5 = sld [smem:[#allocation8_spill]] }
 0x152   : > { %878 = vrot.lane.b32.xlu0 %v3104_v62, %s4323_s26 }
 0x153   : > { %865 = vrot.lane.b32.xlu1 %v793_v1, %s4327_s1  ;;  %s4354_s1 = sld [smem:[#allocation6_spill]] }
 0x156   : > { %893 = vrot.lane.b32.xlu0 %v3104_v62, %s4321_s2 }
 0x157   : > { %880 = vrot.lane.b32.xlu1 %v793_v1, %s4323_s26  ;;  %s4339_s26 = smov 56  }
 0x15a   : > { %908 = vrot.lane.b32.xlu0 %v3104_v62, %s4325_s27 }
 0x15b   : > { %895 = vrot.lane.b32.xlu1 %v793_v1, %s4321_s2  ;;  %s4338_s2 = smov 44  }
 0x15e   : > { %924 = vperm.xlu0 %2875, %v921_v3  }
 0x15f   : > { %910 = vrot.lane.b32.xlu1 %v793_v1, %s4325_s27  ;;  %s2937_s27 = smov 58  }
 0x162   : > { %1981 = vperm.xlu0 %2875, %v2763_v4  }
 0x1b0   : > { %v804_v5 = vpop.permute.xlu0 %803 }
 0x1b4   : > { %v819_v6 = vpop.permute.xlu0 %818 }
 0x1b5   : > { %v806_v7 = vpop.permute.xlu1 %805 }
 0x1b6   : > { %v808_v14 = vsel %vm807_vm4, %v804_v5, %v806_v7  ;;  %v812_v20 = vmul.f32 %v2650_v12, %v806_v7  ;;  %v2664_v5 = vld [vmem:[%s4353_s7 + $0x88] sm:$0xff]  ;;  %v2663_v7 = vld [vmem:[%s4353_s7 + $0x80] sm:$0xff] }
 0x1b7   : > { %v811_v23 = vmul.f32 %v2649_v13, %v808_v14 }
 0x1b8   : > { %v834_v8 = vpop.permute.xlu0 %833  ;;  %v814_v34 = vadd.f32 %v812_v20, %v797_v25  ;;  %v2740_v20 = vld [vmem:[%s4308_s14 + $0x288] sm:$0xff]  ;;  %v1713_v25 = vld [vmem:[%s4308_s14 + $0xe0] sm:$0xff] }
 0x1b9   : > { %v821_v9 = vpop.permute.xlu1 %820  ;;  %v813_v38 = vadd.f32 %v811_v23, %v796_v29  ;;  %v1714_v23 = vld [vmem:[%s4308_s14 + $0xe8] sm:$0xff]  ;;  %v1711_v29 = vld [vmem:[%s4308_s14 + $0xd0] sm:$0xff] }
 0x1ba   : > { %v823_v22 = vsel %vm822_vm5, %v819_v6, %v821_v9  ;;  %v827_v26 = vmul.f32 %v2652_v17, %v821_v9 }
 0x1bb   : > { %v826_v30 = vmul.f32 %v2651_v21, %v823_v22  ;;  %v1715_v21 = vld [vmem:[%s4308_s14 + $0xf0] sm:$0xff]  ;;  %v2739_v22 = vld [vmem:[%s4308_s14 + $0x280] sm:$0xff] }
 0x1bc   : > { %v849_v10 = vpop.permute.xlu0 %848  ;;  %v829_v41 = vadd.f32 %v827_v26, %v814_v34  ;;  %1758 = vmatpush1.msra.mxu1 %v1715_v21  ;;  %v2737_v26 = vld [vmem:[%s4308_s14 + $0x270] sm:$0xff]  ;;  %v2758_v21 = vld [vmem:[%s4308_s14 + $0x318] sm:$0xf] }
 0x1bd   : > { %v836_v11 = vpop.permute.xlu1 %835  ;;  %v828_v45 = vadd.f32 %v826_v30, %v813_v38  ;;  %1759 = vmatprep.subr.mxu1 %v1714_v23  ;;  %v2735_v30 = vld [vmem:[%s4308_s14 + $0x260] sm:$0xff]  ;;  %v2733_v34 = vld [vmem:[%s4308_s14 + $0x250] sm:$0xff] }
 0x1be   : > { %v838_v28 = vsel %vm837_vm6, %v834_v8, %v836_v11  ;;  %v842_v35 = vmul.f32 %v2654_v24, %v836_v11  ;;  %v2738_v24 = vld [vmem:[%s4308_s14 + $0x278] sm:$0xff]  ;;  %1760 = vmatpush1.msra.mxu1 %v1713_v25  ;;  %v2731_v38 = vld [vmem:[%s4308_s14 + $0x240] sm:$0xff]  ;;  %v2757_v23 = vld [vmem:[%s4308_s14 + $0x310] sm:$0xf] }
 0x1bf   : > { %v841_v39 = vmul.f32 %v2653_v27, %v838_v28  ;;  %v1712_v27 = vld [vmem:[%s4308_s14 + $0xd8] sm:$0xff]  ;;  %v2736_v28 = vld [vmem:[%s4308_s14 + $0x268] sm:$0xff]  ;;  %v1828_v25 = vld [vmem:[%s4307_s13] sm:$0xf] }
 0x1c0   : > { %v864_v15 = vpop.permute.xlu0 %863  ;;  %v844_v49 = vadd.f32 %v842_v35, %v829_v41  ;;  %1761 = vmatprep.subr.mxu1 %v1712_v27  ;;  %v1708_v35 = vld [vmem:[%s4308_s14 + $0xb8] sm:$0xff]  ;;  %v1705_v41 = vld [vmem:[%s4308_s14 + $0xa0] sm:$0xff]  ;;  %1831 = vperm.xlu1 %2876, %v1828_v25   ;;  %v1731_v27 = vld [vmem:[%s4308_s14 + $0x170] sm:$0xff] }
 0x1c1   : > { %v851_v18 = vpop.permute.xlu1 %850  ;;  %v843_v53 = vadd.f32 %v841_v39, %v828_v45  ;;  %1762 = vmatpush1.msra.mxu1 %v1711_v29  ;;  %v1706_v39 = vld [vmem:[%s4308_s14 + $0xa8] sm:$0xff]  ;;  %v1703_v45 = vld [vmem:[%s4308_s14 + $0x90] sm:$0xff] }
 0x1c2   : > { %v853_v37 = vsel %vm852_vm7, %v849_v10, %v851_v18  ;;  %v857_v42 = vmul.f32 %v2656_v31, %v851_v18  ;;  %v920_v18 = vld [vmem:[%s4354_s1] sm:$0xff]  ;;  %v1710_v31 = vld [vmem:[%s4308_s14 + $0xc8] sm:$0xff]  ;;  %s4357_s1 = smov 113  }
 0x1c3   : > { %v856_v46 = vmul.f32 %v2655_v36, %v853_v37  ;;  %1763 = vmatprep.subr.mxu1 %v1710_v31  ;;  %v2732_v36 = vld [vmem:[%s4308_s14 + $0x248] sm:$0xff]  ;;  %v1707_v37 = vld [vmem:[%s4308_s14 + $0xb0] sm:$0xff]  ;;  %v1729_v31 = vld [vmem:[%s4308_s14 + $0x160] sm:$0xff] }
 0x1c4   : > { %v879_v32 = vpop.permute.xlu0 %878  ;;  %v859_v57 = vadd.f32 %v857_v42, %v844_v49  ;;  %v2729_v42 = vld [vmem:[%s4308_s14 + $0x230] sm:$0xff]  ;;  %v1701_v49 = vld [vmem:[%s4308_s14 + $0x80] sm:$0xff]  ;;  %v1730_v29 = vld [vmem:[%s4308_s14 + $0x168] sm:$0xff] }
 0x1c5   : > { %v866_v33 = vpop.permute.xlu1 %865  ;;  %v858_v60 = vadd.f32 %v856_v46, %v843_v53  ;;  %v2727_v46 = vld [vmem:[%s4308_s14 + $0x220] sm:$0xff]  ;;  %v1699_v53 = vld [vmem:[%s4308_s14 + $0x70] sm:$0xff] }
 0x1c6   : > { %v868_v44 = vsel %vm867_vm8, %v864_v15, %v866_v33  ;;  %v872_v50 = vmul.f32 %v2658_v40, %v866_v33  ;;  %v1709_v33 = vld [vmem:[%s4308_s14 + $0xc0] sm:$0xff]  ;;  %v2730_v40 = vld [vmem:[%s4308_s14 + $0x238] sm:$0xff] }
 0x1c7   : > { %v871_v54 = vmul.f32 %v2657_v43, %v868_v44  ;;  %1764 = vmatpush1.msra.mxu1 %v1709_v33  ;;  %v1704_v43 = vld [vmem:[%s4308_s14 + $0x98] sm:$0xff]  ;;  %v2728_v44 = vld [vmem:[%s4308_s14 + $0x228] sm:$0xff] }
 0x1c8   : > { %v894_v55 = vpop.permute.xlu0 %893  ;;  %v874_v63 = vadd.f32 %v872_v50, %v859_v57  ;;  %1765 = vmatprep.subr.mxu1 %v1708_v35  ;;  %v2725_v50 = vld [vmem:[%s4308_s14 + $0x210] sm:$0xff]  ;;  %v1697_v57 = vld [vmem:[%s4308_s14 + $0x60] sm:$0xff]  ;;  %v1728_v33 = vld [vmem:[%s4308_s14 + $0x158] sm:$0xff] }
 0x1c9   : > { %v881_v48 = vpop.permute.xlu1 %880  ;;  %v873_v3 = vadd.f32 %v871_v54, %v858_v60  ;;  %1766 = vmatpush1.msra.mxu1 %v1707_v37  ;;  %v2723_v54 = vld [vmem:[%s4308_s14 + $0x200] sm:$0xff]  ;;  %v2720_v60 = vld [vmem:[%s4308_s14 + $0x1e8] sm:$0xff]  ;;  %v1727_v35 = vld [vmem:[%s4308_s14 + $0x150] sm:$0xff] }
 0x1ca   : > { %v883_v52 = vsel %vm882_vm9, %v879_v32, %v881_v48  ;;  %v887_v58 = vmul.f32 %v2660_v47, %v881_v48  ;;  %v2734_v32 = vld [vmem:[%s4308_s14 + $0x258] sm:$0xff]  ;;  %1767 = vmatprep.subr.mxu1 %v1706_v39  ;;  %v1702_v47 = vld [vmem:[%s4308_s14 + $0x88] sm:$0xff]  ;;  %v1725_v39 = vld [vmem:[%s4308_s14 + $0x140] sm:$0xff] }
 0x1cb   : > { %v886_v61 = vmul.f32 %v2659_v51, %v883_v52  ;;  %1768 = vmatpush1.msra.mxu1 %v1705_v41  ;;  %v2726_v48 = vld [vmem:[%s4308_s14 + $0x218] sm:$0xff]  ;;  %v2724_v52 = vld [vmem:[%s4308_s14 + $0x208] sm:$0xff] }
 0x1cc   : > { %v889_v6 = vadd.f32 %v887_v58, %v874_v63  ;;  %v909_v9 = vpop.permute.xlu0 %908  ;;  %1769 = vmatprep.subr.mxu1 %v1704_v43  ;;  %v1700_v51 = vld [vmem:[%s4308_s14 + $0x78] sm:$0xff]  ;;  %v2721_v58 = vld [vmem:[%s4308_s14 + $0x1f0] sm:$0xff]  ;;  %v1694_v63 = vld [vmem:[%s4308_s14 + $0x48] sm:$0xff] }
 0x1cd   : > { %v896_v62 = vpop.permute.xlu1 %895  ;;  %v888_v8 = vadd.f32 %v886_v61, %v873_v3  ;;  %1770 = vmatpush1.msra.mxu1 %v1703_v45  ;;  %v1695_v61 = vld [vmem:[%s4308_s14 + $0x50] sm:$0xff]  ;;  %v1726_v37 = vld [vmem:[%s4308_s14 + $0x148] sm:$0xff]  ;;  %v1724_v41 = vld [vmem:[%s4308_s14 + $0x138] sm:$0xff] }
 0x1ce   : > { %v898_v0 = vsel %vm897_vm10, %v894_v55, %v896_v62  ;;  %v902_v1 = vmul.f32 %v2662_v56, %v896_v62  ;;  %1771 = vmatprep.subr.mxu1 %v1702_v47  ;;  %v1698_v55 = vld [vmem:[%s4308_s14 + $0x68] sm:$0xff]  ;;  %v2722_v56 = vld [vmem:[%s4308_s14 + $0x1f8] sm:$0xff]  ;;  %v2719_v62 = vld [vmem:[%s4308_s14 + $0x1e0] sm:$0xff] }
 0x1cf   : > { %v901_v4 = vmul.f32 %v2661_v59, %v898_v0  ;;  %1772 = vmatpush1.msra.mxu1 %v1701_v49  ;;  %v1696_v59 = vld [vmem:[%s4308_s14 + $0x58] sm:$0xff]  ;;  %v2717_v3 = vld [vmem:[%s4308_s14 + $0x1d0] sm:$0xff]  ;;  %v1722_v45 = vld [vmem:[%s4308_s14 + $0x128] sm:$0xff] }
 0x1d0   : > { %v904_v13 = vadd.f32 %v902_v1, %v889_v6  ;;  %1773 = vmatprep.subr.mxu1 %v1700_v51  ;;  %v2718_v0 = vld [vmem:[%s4308_s14 + $0x1d8] sm:$0xff]  ;;  %v1693_v1 = vld [vmem:[%s4308_s14 + $0x40] sm:$0xff]  ;;  %v1691_v6 = vld [vmem:[%s4308_s14 + $0x30] sm:$0xff] }
 0x1d1   : > { %v911_v10 = vpop.permute.xlu1 %910  ;;  %v903_v15 = vadd.f32 %v901_v4, %v888_v8  ;;  %1774 = vmatpush1.msra.mxu1 %v1699_v53  ;;  %v1692_v4 = vld [vmem:[%s4308_s14 + $0x38] sm:$0xff]  ;;  %v1690_v8 = vld [vmem:[%s4308_s14 + $0x28] sm:$0xff]  ;;  %v1723_v43 = vld [vmem:[%s4308_s14 + $0x130] sm:$0xff] }
 0x1d2   : > { %v913_v11 = vsel %vm912_vm11, %v909_v9, %v911_v10  ;;  %v917_v12 = vmul.f32 %v2664_v5, %v911_v10  ;;  %1775 = vmatprep.subr.mxu1 %v1698_v55  ;;  %v2716_v5 = vld [vmem:[%s4308_s14 + $0x1c8] sm:$0xff]  ;;  %v2714_v9 = vld [vmem:[%s4308_s14 + $0x1b8] sm:$0xff]  ;;  %v1689_v10 = vld [vmem:[%s4308_s14 + $0x20] sm:$0xff] }
 0x1d3   : > { %v916_v14 = vmul.f32 %v2663_v7, %v913_v11  ;;  %1776 = vmatpush1.msra.mxu1 %v1697_v57  ;;  %v2715_v7 = vld [vmem:[%s4308_s14 + $0x1c0] sm:$0xff]  ;;  %v2713_v11 = vld [vmem:[%s4308_s14 + $0x1b0] sm:$0xff]  ;;  %v1720_v49 = vld [vmem:[%s4308_s14 + $0x118] sm:$0xff] }
 0x1d4   : > { %v919_v16 = vadd.f32 %v917_v12, %v904_v13  ;;  %1777 = vmatprep.subr.mxu1 %v1696_v59  ;;  %v1688_v12 = vld [vmem:[%s4308_s14 + $0x18] sm:$0xff]  ;;  %v2712_v13 = vld [vmem:[%s4308_s14 + $0x1a8] sm:$0xff]  ;;  %v1721_v47 = vld [vmem:[%s4308_s14 + $0x120] sm:$0xff] }
 0x1d5   : > { %v918_v17 = vadd.f32 %v916_v14, %v903_v15  ;;  %1778 = vmatpush1.msra.mxu1 %v1695_v61  ;;  %v1687_v14 = vld [vmem:[%s4308_s14 + $0x10] sm:$0xff]  ;;  %v2711_v15 = vld [vmem:[%s4308_s14 + $0x1a0] sm:$0xff]  ;;  %v1718_v53 = vld [vmem:[%s4308_s14 + $0x108] sm:$0xff] }
 0x1d6   : > { %961 = vmatprep.subr.mxu0 %v919_v16  ;;  %1779 = vmatprep.subr.mxu1 %v1694_v63  ;;  %v1686_v16 = vld [vmem:[%s4308_s14 + $0x8] sm:$0xff]  ;;  %v1719_v51 = vld [vmem:[%s4308_s14 + $0x110] sm:$0xff]  ;;  %v1717_v55 = vld [vmem:[%s4308_s14 + $0x100] sm:$0xff] }
 0x1d7   : > { %962 = vmatpush1.msra.mxu0 %v918_v17  ;;  %1780 = vmatpush1.msra.mxu1 %v1693_v1  ;;  %v2710_v17 = vld [vmem:[%s4308_s14 + $0x198] sm:$0xff] }
 0x1d8   : > { %2665 = vmatmul.mubr.msk.f32.vlgmr.msra.gmra.mxu0 %vm927_vm12, %v920_v18  ;;  %1906 = vmatprep.subr.mxu0 %v2740_v20  ;;  %v1685_v18 = vld [vmem:[%s4308_s14] sm:$0xff]  ;;  %v1734_v20 = vld [vmem:[%s4308_s14 + $0x188] sm:$0xf] }
 0x1d9   : > { %1907 = vmatpush1.msra.mxu0 %v2739_v22  ;;  %1781 = vmatprep.subr.mxu1 %v1692_v4  ;;  %v1733_v22 = vld [vmem:[%s4308_s14 + $0x180] sm:$0xf]  ;;  %v925_v57 = vpop.permute.xlu0 %924 }
 0x1da   : > { %1908 = vmatprep.subr.mxu0 %v2738_v24  ;;  %1782 = vmatpush1.msra.mxu1 %v1691_v6  ;;  %v1732_v24 = vld [vmem:[%s4308_s14 + $0x178] sm:$0xff] }
 0x1db   : > { %1909 = vmatpush1.msra.mxu0 %v2737_v26  ;;  %1783 = vmatprep.subr.mxu1 %v1690_v8  ;;  %v2756_v26 = vld [vmem:[%s4308_s14 + $0x308] sm:$0xff] }
 0x1dc   : > { %1910 = vmatprep.subr.mxu0 %v2736_v28  ;;  %1784 = vmatpush1.msra.mxu1 %v1689_v10  ;;  %v2755_v28 = vld [vmem:[%s4308_s14 + $0x300] sm:$0xff] }
 0x1dd   : > { %1911 = vmatpush1.msra.mxu0 %v2735_v30  ;;  %1785 = vmatprep.subr.mxu1 %v1688_v12  ;;  %v2754_v30 = vld [vmem:[%s4308_s14 + $0x2f8] sm:$0xff] }
 0x1de   : > { %1912 = vmatprep.subr.mxu0 %v2734_v32  ;;  %1786 = vmatpush1.msra.mxu1 %v1687_v14  ;;  %v2753_v32 = vld [vmem:[%s4308_s14 + $0x2f0] sm:$0xff] }
 0x1df   : > { %1913 = vmatpush1.msra.mxu0 %v2733_v34  ;;  %1787 = vmatprep.subr.mxu1 %v1686_v16  ;;  %v2752_v34 = vld [vmem:[%s4308_s14 + $0x2e8] sm:$0xff] }
 0x1e0   : > { %1914 = vmatprep.subr.mxu0 %v2732_v36  ;;  %1788 = vmatpush1.msra.mxu1 %v1685_v18  ;;  %v2751_v36 = vld [vmem:[%s4308_s14 + $0x2e0] sm:$0xff] }
 0x1e1   : > { %1915 = vmatpush1.msra.mxu0 %v2731_v38  ;;  %2706 = vmatprep.subr.msk.mxu1 %vm1423_vm13, %v1734_v20  ;;  %v2750_v38 = vld [vmem:[%s4308_s14 + $0x2d8] sm:$0xff] }
 0x1e2   : > { %1916 = vmatprep.subr.mxu0 %v2730_v40  ;;  %2707 = vmatpush2.msk.msra.mxu1 %vm1423_vm13, %v1733_v22  ;;  %v2749_v40 = vld [vmem:[%s4308_s14 + $0x2d0] sm:$0xff] }
 0x1e3   : > { %1917 = vmatpush1.msra.mxu0 %v2729_v42  ;;  %1805 = vmatprep.subr.mxu1 %v1732_v24  ;;  %v2748_v42 = vld [vmem:[%s4308_s14 + $0x2c8] sm:$0xff] }
 0x1e4   : > { %1918 = vmatprep.subr.mxu0 %v2728_v44  ;;  %1806 = vmatpush2.msra.mxu1 %v1731_v27  ;;  %v2747_v44 = vld [vmem:[%s4308_s14 + $0x2c0] sm:$0xff] }
 0x1e5   : > { %1919 = vmatpush1.msra.mxu0 %v2727_v46  ;;  %1807 = vmatprep.subr.mxu1 %v1730_v29  ;;  %v2746_v46 = vld [vmem:[%s4308_s14 + $0x2b8] sm:$0xff] }
 0x1e6   : > { %1920 = vmatprep.subr.mxu0 %v2726_v48  ;;  %1808 = vmatpush2.msra.mxu1 %v1729_v31  ;;  %v2745_v48 = vld [vmem:[%s4308_s14 + $0x2b0] sm:$0xff] }
 0x1e7   : > { %1921 = vmatpush1.msra.mxu0 %v2725_v50  ;;  %1809 = vmatprep.subr.mxu1 %v1728_v33  ;;  %v2744_v50 = vld [vmem:[%s4308_s14 + $0x2a8] sm:$0xff] }
 0x1e8   : > { %1922 = vmatprep.subr.mxu0 %v2724_v52  ;;  %1810 = vmatpush2.msra.mxu1 %v1727_v35  ;;  %v2743_v52 = vld [vmem:[%s4308_s14 + $0x2a0] sm:$0xff] }
 0x1e9   : > { %1923 = vmatpush1.msra.mxu0 %v2723_v54  ;;  %1811 = vmatprep.subr.mxu1 %v1726_v37  ;;  %v2742_v54 = vld [vmem:[%s4308_s14 + $0x298] sm:$0xff] }
 0x1ea   : > { %1924 = vmatprep.subr.mxu0 %v2722_v56  ;;  %1812 = vmatpush2.msra.mxu1 %v1725_v39  ;;  %v2741_v56 = vld [vmem:[%s4308_s14 + $0x290] sm:$0xff] }
 0x1eb   : > { %1925 = vmatpush1.msra.mxu0 %v2721_v58  ;;  %1813 = vmatprep.subr.mxu1 %v1724_v41 }
 0x1ec   : > { %1926 = vmatprep.subr.mxu0 %v2720_v60  ;;  %1814 = vmatpush2.msra.mxu1 %v1723_v43 }
 0x1ed   : > { %1927 = vmatpush1.msra.mxu0 %v2719_v62  ;;  %1815 = vmatprep.subr.mxu1 %v1722_v45 }
 0x1ee   : > { %1928 = vmatprep.subr.mxu0 %v2718_v0  ;;  %1816 = vmatpush2.msra.mxu1 %v1721_v47 }
 0x1ef   : > { %1929 = vmatpush1.msra.mxu0 %v2717_v3  ;;  %1817 = vmatprep.subr.mxu1 %v1720_v49 }
 0x1f0   : > { %1930 = vmatprep.subr.mxu0 %v2716_v5  ;;  %1818 = vmatpush2.msra.mxu1 %v1719_v51 }
 0x1f1   : > { %1931 = vmatpush1.msra.mxu0 %v2715_v7  ;;  %1819 = vmatprep.subr.mxu1 %v1718_v53 }
 0x1f2   : > { %1932 = vmatprep.subr.mxu0 %v2714_v9  ;;  %1820 = vmatpush2.msra.mxu1 %v1717_v55  ;;  %v1993_v55 = vld [vmem:[%s4311_s17] sm:$0xf] }
 0x1f3   : > { %1933 = vmatpush1.msra.mxu0 %v2713_v11 }
 0x1f4   : > { %1934 = vmatprep.subr.mxu0 %v2712_v13 }
 0x1f5   : > { %1935 = vmatpush1.msra.mxu0 %v2711_v15 }
 0x1f6   : > { %1936 = vmatprep.subr.mxu0 %v2710_v17 }
 0x1f7   : > { %1937 = vmatpush1.msra.mxu0 %v2709_v19 }
 0x1f8   : > { %2760 = vmatprep.subr.msk.mxu0 %vm1423_vm13, %v2758_v21 }
 0x1f9   : > { %2761 = vmatpush2.msk.msra.mxu0 %vm1423_vm13, %v2757_v23 }
 0x1fa   : > { %1954 = vmatprep.subr.mxu0 %v2756_v26 }
 0x1fb   : > { %1955 = vmatpush2.msra.mxu0 %v2755_v28 }
 0x1fc   : > { %1956 = vmatprep.subr.mxu0 %v2754_v30 }
 0x1fd   : > { %1957 = vmatpush2.msra.mxu0 %v2753_v32 }
 0x1fe   : > { %1958 = vmatprep.subr.mxu0 %v2752_v34 }
 0x1ff   : > { %1959 = vmatpush2.msra.mxu0 %v2751_v36 }
 0x200   : > { %1960 = vmatprep.subr.mxu0 %v2750_v38 }
 0x201   : > { %1961 = vmatpush2.msra.mxu0 %v2749_v40 }
 0x202   : > { %1962 = vmatprep.subr.mxu0 %v2748_v42 }
 0x203   : > { %1963 = vmatpush2.msra.mxu0 %v2747_v44  ;;  %v1679_v44 = vld [vmem:[%s4355_s5] sm:$0xff]  ;;  %s2941_s5 = smov 124  }
 0x204   : > { %1964 = vmatprep.subr.mxu0 %v2746_v46  ;;  %v1681_v49 = vcombine.high %v1679_v44, %v1679_v44 }
 0x205   : > { %1965 = vmatpush2.msra.mxu0 %v2745_v48 }
 0x206   : > { %1966 = vmatprep.subr.mxu0 %v2744_v50 }
 0x207   : > { %1967 = vmatpush2.msra.mxu0 %v2743_v52 }
 0x208   : > { %1968 = vmatprep.subr.mxu0 %v2742_v54 }
 0x209   : > { %1969 = vmatpush2.msra.mxu0 %v2741_v56 }
 0x23b   : > { %v3548_v56 = vpop.permute.xlu1 %1831 }
 0x298   : > { %v997_v58 = vpop.f32.mrf.mxu0 }
 0x299   : > { %v998_v59 = vadd.f32 %v997_v58, %v925_v57 }
 0x29a   : > { %v999_v60 = vpop.f32.mrf.mxu0 }
 0x29b   : > { %v1004_v61 = vmul.f32 0.70710677, %v998_v59  ;;  %v1000_v62 = vadd.f32 %v999_v60, %v925_v57  ;;  %v1002_v41 = vmul.f32 0.5, %v998_v59  ;;  %v3550_v57 = vpop.permute.xlu0 %1981 }
 0x29d   : > { %v1006_v63 = vand.u32 2147483647, %v1004_v61  ;;  %v1005_v0 = vmul.f32 0.70710677, %v1000_v62  ;;  %vm1044_vm14 = vcmp.ge.f32.partialorder %v1004_v61, 0.0  ;;  %v1003_v47 = vmul.f32 0.5, %v1000_v62 }
 0x29f   : > { %v1008_v1 = vmul.f32 0.3275911, %v1006_v63  ;;  %v1007_v3 = vand.u32 2147483647, %v1005_v0  ;;  %v1032_v7 = vsub.f32 0.0, %v1006_v63  ;;  %vm1045_vm15 = vcmp.ge.f32.partialorder %v1005_v0, 0.0 }
 0x2a1   : > { %v1010_v4 = vadd.f32 1.0, %v1008_v1  ;;  %v1009_v5 = vmul.f32 0.3275911, %v1007_v3  ;;  %v1033_v8 = vsub.f32 0.0, %v1007_v3  ;;  %v1034_v9 = vmul.f32 %v1032_v7, %v1006_v63 }
 0x2a2   : > { %v1516_v7 = vlaneseq }
 0x2a3   : > { %2887 = vrcp.f32 %v1010_v4  ;;  %v1011_v6 = vadd.f32 1.0, %v1009_v5  ;;  %v1035_v11 = vmul.f32 %v1033_v8, %v1007_v3  ;;  %v1036_v13 = vmul.f32 1.442695, %v1034_v9 }
 0x2a4   : > { %v3609_v8 = vshrl.u32 %v1516_v7, 7 }
 0x2a5   : > { %2889 = vrcp.f32 %v1011_v6  ;;  %v1038_v17 = vmul.f32 1.442695, %v1035_v11  ;;  %v2759_v11 = vld [vmem:[%s4309_s15 + $0x2] sm:$0x3] }
 0x2a6   : > { %2891 = vpow2.f32 %v1036_v13  ;;  %v3616_v9 = vsub.s32 0, %v3609_v8 }
 0x2a7   : > { %2893 = vpow2.f32 %v1038_v17 }
 0x2b0   : > { %v2888_v10 = vpop.eup %2887 }
 0x2b1   : > { %v1014_v12 = vmul.f32 1.0614054, %v2888_v10 }
 0x2b2   : > { %v2890_v14 = vpop.eup %2889 }
 0x2b3   : > { %v1016_v15 = vadd.f32 -1.4531521, %v1014_v12  ;;  %v1015_v16 = vmul.f32 1.0614054, %v2890_v14  ;;  %v2892_v31 = vpop.eup %2891  ;;  %v3628_v12 = vsub.s32 1, %v3609_v8 }
 0x2b4   : > { %v2894_v35 = vpop.eup %2893 }
 0x2b5   : > { %v1018_v18 = vmul.f32 %v2888_v10, %v1016_v15  ;;  %v1017_v19 = vadd.f32 -1.4531521, %v1015_v16  ;;  %v1897_v17 = vrot.slane %v2759_v11, %v3628_v12 }
 0x2b7   : > { %v1020_v20 = vadd.f32 1.4214138, %v1018_v18  ;;  %v1019_v21 = vmul.f32 %v2890_v14, %v1017_v19 }
 0x2b9   : > { %v1022_v22 = vmul.f32 %v2888_v10, %v1020_v20  ;;  %v1021_v23 = vadd.f32 1.4214138, %v1019_v21 }
 0x2bb   : > { %v1024_v24 = vadd.f32 -0.28449672, %v1022_v22  ;;  %v1023_v25 = vmul.f32 %v2890_v14, %v1021_v23 }
 0x2bd   : > { %v1026_v26 = vmul.f32 %v2888_v10, %v1024_v24  ;;  %v1025_v27 = vadd.f32 -0.28449672, %v1023_v25 }
 0x2bf   : > { %v1028_v28 = vadd.f32 0.2548296, %v1026_v26  ;;  %v1027_v29 = vmul.f32 %v2890_v14, %v1025_v27 }
 0x2c1   : > { %v1030_v30 = vmul.f32 %v2888_v10, %v1028_v28  ;;  %v1029_v32 = vadd.f32 0.2548296, %v1027_v29  ;;  %v1735_v10 = vld [vmem:[%s4309_s15] sm:$0x3] }
 0x2c2   : > { %v1740_v13 = vrot.slane %v1735_v10, %v3616_v9  ;;  %v1744_v15 = vrot.slane %v1735_v10, %v3628_v12 }
 0x2c3   : > { %v1040_v33 = vmul.f32 %v2892_v31, %v1030_v30  ;;  %v1031_v34 = vmul.f32 %v2890_v14, %v1029_v32  ;;  %v1893_v14 = vrot.slane %v2759_v11, %v3616_v9  ;;  %v1988_v32 = vld [vmem:[%s4310_s16] sm:$0xf] }
 0x2c5   : > { %v1042_v36 = vsub.f32 1.0, %v1040_v33  ;;  %v1041_v37 = vmul.f32 %v2894_v35, %v1031_v34 }
 0x2c7   : > { %v1046_v38 = vsub.f32 0.0, %v1042_v36  ;;  %v1043_v39 = vsub.f32 1.0, %v1041_v37 }
 0x2c9   : > { %v1048_v40 = vsel %vm1044_vm14, %v1042_v36, %v1046_v38  ;;  %v1047_v43 = vsub.f32 0.0, %v1043_v39  ;;  %vm1165_vm14 = vcmask 908288  }
 0x2ca   : > { %v1050_v42 = vadd.f32 1.0, %v1048_v40 }
 0x2cb   : > { %v1049_v46 = vsel %vm1045_vm15, %v1043_v39, %v1047_v43  ;;  %vm1098_vm15 = vcmask 1022976  }
 0x2cc   : > { %v3514_v45 = vmul.f32 %v1050_v42, %v1002_v41  ;;  %v1051_v48 = vadd.f32 1.0, %v1049_v46 }
 0x2ce   : > { %v3517_v50 = vrot.slane %v3514_v45, 4  ;;  %v3519_v51 = vmul.f32 %v1051_v48, %v1003_v47  ;;  %v1683_v54 = vadd.f32 %v1679_v44, %v3514_v45 }
 0x2d0   : > { %1058 = vrot.lane.b32.xlu1 %v3517_v50, %s2934_s29  ;;  %v1684_v52 = vadd.f32 %v1681_v49, %v3519_v51  ;;  %v3524_v53 = vrot.slane %v3519_v51, 4 }
 0x2d2   : > { %2708 = vmatprep.mubr.msk.f32.mxu1 %vm1747_vm0, %v1684_v52  ;;  %2762 = vmatprep.mubr.msk.f32.mxu0 %vm1747_vm0, %v1684_v52 }
 0x2d3   : > { %1060 = vrot.lane.b32.xlu0 %v3524_v53, %s2934_s29  ;;  %1822 = vmatmul.mubr.f32.vlgmr.msra.gmra.mxu1 %v1683_v54  ;;  %s4356_s29 = smov 114  }
 0x2d4   : > { %1971 = vmatmul.mubr.f32.vlgmr.msra.gmra.mxu0 %v1683_v54  ;;  %1267 = vrot.lane.b32.xlu1 %v3517_v50, %s4335_s6 }
 0x2d5   : > { %2066 = vmatprep.mubr.f32.mxu1 %v2932_v2 }
 0x2d7   : > { %1269 = vrot.lane.b32.xlu0 %v3524_v53, %s4335_s6 }
 0x2d8   : > { %1434 = vrot.lane.b32.xlu1 %v2932_v2, %s4340_s3  ;;  %s2951_s3 = smov 72  }
 0x2db   : > { %1419 = vrot.lane.b32.xlu0 %v2932_v2, %s2937_s27 }
 0x2dc   : > { %1996 = vperm.xlu1 %2876, %v1993_v55  }
 0x2df   : > { %1448 = vrot.lane.b32.xlu0 %v2932_v2, %s4339_s26  ;;  %s2949_s26 = smov 84  }
 0x2e0   : > { %1476 = vrot.lane.b32.xlu1 %v2932_v2, %s4335_s6  ;;  %s4358_s6 = smov 112  }
 0x2e3   : > { %1462 = vrot.lane.b32.xlu0 %v2932_v2, %s4338_s2  ;;  %s2947_s2 = smov 85  }
 0x342   : > { %v1059_v58 = vpop.permute.xlu1 %1058 }
 0x343   : > { %v1066_v61 = vsel %vm1062_vm1, 0.0, %v1059_v58 }
 0x345   : > { %v1061_v59 = vpop.permute.xlu0 %1060 }
 0x346   : > { %v1063_v60 = vsel %vm1062_vm1, %v1059_v58, %v1061_v59  ;;  %v1268_v0 = vpop.permute.xlu1 %1267  ;;  %vm1360_vm1 = vcmask 703488  }
 0x347   : > { %v1068_v62 = vsel %vm1067_vm2, %v1063_v60, 0.0  ;;  %v1275_v4 = vsel %vm1271_vm3, 0.0, %v1268_v0 }
 0x348   : > { %v3553_v63 = vcombine.low %v1066_v61, %v1068_v62  ;;  %v2686_v62 = vld [vmem:[%s4302_s8 + $0x8] sm:$0xff] }
 0x349   : > { %v1270_v1 = vpop.permute.xlu0 %1269 }
 0x34a   : > { %v1272_v3 = vsel %vm1271_vm3, %v1268_v0, %v1270_v1  ;;  %1077 = vrot.lane.b32.xlu1 %v3553_v63, %s4333_s0  ;;  %v3653_v34 = vpop.permute.xlu1 %1434 }
 0x34b   : > { %v1276_v5 = vsel %vm1165_vm14, %v1272_v3, 0.0  ;;  %v1277_v3 = vld [vmem:[%s4302_s8] sm:$0xff] }
 0x34c   : > { %v3560_v6 = vcombine.low %v1275_v4, %v1276_v5  ;;  %v2687_v4 = vld [vmem:[%s4302_s8 + $0x10] sm:$0xff] }
 0x34d   : > { %v3655_v35 = vpop.permute.xlu0 %1419 }
 0x34e   : > { %1086 = vrot.lane.b32.xlu1 %v3553_v63, %s4337_s24  ;;  %1285 = vrot.lane.b32.xlu0 %v3560_v6, %s4333_s0  ;;  %s2943_s0 = smov 122  }
 0x351   : > { %v3659_v37 = vpop.permute.xlu0 %1448 }
 0x352   : > { %1095 = vrot.lane.b32.xlu1 %v3553_v63, %s4336_s28  ;;  %1294 = vrot.lane.b32.xlu0 %v3560_v6, %s4337_s24  ;;  %s4359_s28 = smov 100   ;;  %s2945_s24 = smov 86  }
 0x355   : > { %v3663_v39 = vpop.permute.xlu0 %1462 }
 0x356   : > { %1105 = vrot.lane.b32.xlu1 %v3553_v63, %s2941_s5  ;;  %1303 = vrot.lane.b32.xlu0 %v3560_v6, %s4356_s29  ;;  %s4360_s5 = smov 99  }
 0x357   : > { %v3657_v36 = vpop.permute.xlu1 %1996 }
 0x35a   : > { %1115 = vrot.lane.b32.xlu1 %v3553_v63, %s2942_s25  ;;  %1312 = vrot.lane.b32.xlu0 %v3560_v6, %s4357_s1  ;;  %s4361_s25 = smov 98  }
 0x35b   : > { %v3661_v38 = vpop.permute.xlu1 %1476 }
 0x35e   : > { %1125 = vrot.lane.b32.xlu1 %v3553_v63, %s2943_s0  ;;  %1321 = vrot.lane.b32.xlu0 %v3560_v6, %s4358_s6  ;;  %s2944_s0 = smov 111  }
 0x362   : > { %1135 = vrot.lane.b32.xlu1 %v3553_v63, %s4356_s29  ;;  %1330 = vrot.lane.b32.xlu0 %v3560_v6, %s4359_s28  ;;  %s2946_s29 = smov 110  }
 0x366   : > { %1144 = vrot.lane.b32.xlu1 %v3553_v63, %s4357_s1  ;;  %1339 = vrot.lane.b32.xlu0 %v3560_v6, %s4360_s5  ;;  %s2948_s1 = smov 109  }
 0x36a   : > { %1153 = vrot.lane.b32.xlu1 %v3553_v63, %s4358_s6  ;;  %1348 = vrot.lane.b32.xlu0 %v3560_v6, %s4361_s25  ;;  %s2950_s6 = smov 108  }
 0x36e   : > { %1162 = vrot.lane.b32.xlu1 %v3553_v63, %s2944_s0  ;;  %1357 = vrot.lane.b32.xlu0 %v3560_v6, %s2945_s24  ;;  %s2952_s24 = smov 71   ;;  %s4364_s0 = smov 44  }
 0x372   : > { %1172 = vrot.lane.b32.xlu1 %v3553_v63, %s2946_s29  ;;  %1367 = vrot.lane.b32.xlu0 %v3560_v6, %s2947_s2  ;;  %s2953_s2 = smov 70   ;;  %s4368_s29 = smov 126  }
 0x376   : > { %1182 = vrot.lane.b32.xlu1 %v3553_v63, %s2948_s1  ;;  %1376 = vrot.lane.b32.xlu0 %v3560_v6, %s2949_s26  ;;  %s4362_s26 = smov 57   ;;  %s4369_s1 = smov 125  }
 0x37a   : > { %1192 = vrot.lane.b32.xlu1 %v3553_v63, %s2950_s6  ;;  %1386 = vrot.lane.b32.xlu0 %v3560_v6, %s2951_s3  ;;  %s4363_s3 = smov 56   ;;  %s4365_s6 = smov 43  }
 0x37e   : > { %1202 = vrot.lane.b32.xlu1 %v3553_v63, %s4359_s28  ;;  %1396 = vrot.lane.b32.xlu0 %v3560_v6, %s2952_s24  ;;  %s2956_s24 = smov 42   ;;  %s2959_s28 = smov 1  }
 0x382   : > { %1417 = vrot.lane.b32.xlu1 %v3560_v6, %s2937_s27  ;;  %1406 = vrot.lane.b32.xlu0 %v3560_v6, %s2953_s2  ;;  %s2957_s2 = smov 95  }
 0x386   : > { %1211 = vrot.lane.b32.xlu1 %v3553_v63, %s4360_s5  ;;  %1432 = vrot.lane.b32.xlu0 %v3560_v6, %s4362_s26  ;;  %s2954_s5 = smov 97   ;;  %s2958_s26 = smov 94  }
 0x38a   : > { %1446 = vrot.lane.b32.xlu1 %v3560_v6, %s4363_s3  ;;  %1220 = vrot.lane.b32.xlu0 %v3553_v63, %s4361_s25  ;;  %s2955_s25 = smov 96  }
 0x38e   : > { %1460 = vrot.lane.b32.xlu1 %v3560_v6, %s4364_s0  ;;  %1229 = vrot.lane.b32.xlu0 %v3553_v63, %s2954_s5  ;;  %s4367_s5 = smov 127  }
 0x392   : > { %1239 = vrot.lane.b32.xlu1 %v3553_v63, %s2955_s25  ;;  %1474 = vrot.lane.b32.xlu0 %v3560_v6, %s4365_s6 }
 0x393   : > { %v1823_v16 = vpop.f32.mrf.mxu1 }
 0x394   : > { %v1824_v18 = vadd.f32 %v1823_v16, %v1740_v13  ;;  %v1972_v19 = vpop.f32.mrf.mxu0 }
 0x395   : > { %v1973_v20 = vadd.f32 %v1972_v19, %v1893_v14  ;;  %v1825_v21 = vpop.f32.mrf.mxu1 }
 0x396   : > { %v1834_v22 = vmul.f32 %v3548_v56, %v1824_v18  ;;  %v1826_v23 = vadd.f32 %v1825_v21, %v1744_v15  ;;  %v1974_v24 = vpop.f32.mrf.mxu0  ;;  %1487 = vrot.lane.b32.xlu1 %v3560_v6, %s2956_s24  ;;  %1249 = vrot.lane.b32.xlu0 %v3553_v63, %s2957_s2  ;;  %s4366_s2 = sld [smem:[#allocation9_spill]]  ;;  %v1282_v21 = vmul.f32 %v3560_v6, %v1277_v3 }
 0x397   : > { %v1984_v25 = vmul.f32 %v3550_v57, %v1973_v20  ;;  %v1975_v26 = vadd.f32 %v1974_v24, %v1897_v17  ;;  %v2688_v17 = vld [vmem:[%s4302_s8 + $0x18] sm:$0xff]  ;;  %v2689_v24 = vld [vmem:[%s4302_s8 + $0x20] sm:$0xff] }
 0x398   : > { %v1835_v27 = vmul.f32 %v3548_v56, %v1826_v23 }
 0x399   : > { %v1985_v28 = vmul.f32 %v3550_v57, %v1975_v26  ;;  %v1986_v29 = vadd.f32 %v1984_v25, %v1834_v22 }
 0x39a   : > { %1259 = vrot.lane.b32.xlu1 %v3553_v63, %s2958_s26  ;;  %1489 = vrot.lane.b32.xlu0 %v2932_v2, %s2956_s24 }
 0x39b   : > { %v1987_v30 = vadd.f32 %v1985_v28, %v1835_v27  ;;  %v1991_v33 = vsel %vm1423_vm13, %v1986_v29, %v3517_v50 }
 0x39c   : > { %v2666_v15 = vld [vmem:[%s4366_s2 + $0x8] sm:$0xff]  ;;  %v1069_v20 = vld [vmem:[%s4366_s2] sm:$0xff]  ;;  %v2667_v29 = vld [vmem:[%s4366_s2 + $0x10] sm:$0xff] }
 0x39d   : > { %v1992_v31 = vsel %vm1423_vm13, %v1987_v30, %v3524_v53 }
 0x39e   : > { %2032 = vmatprep.subr.mxu1 %v1992_v31 }
 0x39f   : > { %2033 = vmatpush1.msra.mxu1 %v1991_v33  ;;  %v1074_v33 = vmul.f32 %v3553_v63, %v1069_v20  ;;  %v2691_v63 = vld [vmem:[%s4302_s8 + $0x30] sm:$0xff] }
 0x3a0   : > { %2764 = vmatmul.mubr.msk.f32.vlgmr.msra.gmra.mxu1 %vm927_vm12, %v1988_v32 }
 0x3bc   : > { %v1078_v40 = vpop.permute.xlu1 %1077 }
 0x3bd   : > { %v1079_v61 = vrot.slane %v1078_v40, 4 }
 0x3bf   : > { %v1080_v16 = vsel %vm807_vm4, %v1078_v40, %v1079_v61 }
 0x3c0   : > { %v1286_v41 = vpop.permute.xlu0 %1285  ;;  %v1087_v42 = vpop.permute.xlu1 %1086  ;;  %v1082_v27 = vmul.f32 %v2666_v15, %v1080_v16 }
 0x3c1   : > { %v1287_v55 = vrot.slane %v1286_v41, 4  ;;  %v1088_v11 = vrot.slane %v1087_v42, 4 }
 0x3c3   : > { %v1288_v0 = vsel %vm807_vm4, %v1286_v41, %v1287_v55  ;;  %v1089_v30 = vsel %vm822_vm5, %v1087_v42, %v1088_v11  ;;  %v2690_v41 = vld [vmem:[%s4302_s8 + $0x28] sm:$0xff]  ;;  %v2668_v42 = vld [vmem:[%s4366_s2 + $0x18] sm:$0xff]  ;;  %vm1108_vm4 = vcmask 1014784  }
 0x3c4   : > { %v1295_v43 = vpop.permute.xlu0 %1294  ;;  %v1096_v44 = vpop.permute.xlu1 %1095  ;;  %v1290_v10 = vmul.f32 %v2686_v62, %v1288_v0  ;;  %v1091_v61 = vmul.f32 %v2667_v29, %v1089_v30 }
 0x3c5   : > { %v1296_v58 = vrot.slane %v1295_v43, 4  ;;  %v1097_v23 = vrot.slane %v1096_v44, 4 }
 0x3c6   : > { %v1291_v28 = vadd.f32 %v1290_v10, %v1282_v21  ;;  %v2669_v10 = vld [vmem:[%s4366_s2 + $0x20] sm:$0xff] }
 0x3c7   : > { %v1297_v5 = vsel %vm822_vm5, %v1295_v43, %v1296_v58  ;;  %v1099_v55 = vsel %vm1098_vm15, %v1096_v44, %v1097_v23  ;;  %vm1118_vm5 = vcmask 1006592   ;;  %vm1128_vm15 = vcmask 998400   ;;  %v2693_v21 = vld [vmem:[%s4302_s8 + $0x40] sm:$0xff] }
 0x3c8   : > { %v1304_v46 = vpop.permute.xlu0 %1303  ;;  %v3665_v47 = vpop.permute.xlu1 %1105  ;;  %v1299_v22 = vmul.f32 %v2687_v4, %v1297_v5  ;;  %v1101_v44 = vmul.f32 %v2668_v42, %v1099_v55  ;;  %v2798_v42 = vld [vmem:[%s4313_s19 + $0x280] sm:$0xff] }
 0x3c9   : > { %v1305_v1 = vrot.slane %v1304_v46, 4  ;;  %v1107_v40 = vrot.slane %v3665_v47, 4 }
 0x3cb   : > { %v1306_v18 = vsel %vm837_vm6, %v1304_v46, %v1305_v1  ;;  %v1109_v11 = vsel %vm1108_vm4, %v3665_v47, %v1107_v40  ;;  %v2162_v40 = vld [vmem:[%s4313_s19 + $0xf8] sm:$0xff]  ;;  %vm1379_vm4 = vcmask 687104  }
 0x3cc   : > { %v1313_v48 = vpop.permute.xlu0 %1312  ;;  %v3667_v49 = vpop.permute.xlu1 %1115  ;;  %v1308_v31 = vmul.f32 %v2688_v17, %v1306_v18  ;;  %v1111_v23 = vmul.f32 %v2669_v10, %v1109_v11  ;;  %2202 = vmatprep.subr.mxu0 %v2162_v40  ;;  %v2796_v10 = vld [vmem:[%s4313_s19 + $0x270] sm:$0xff]  ;;  %v2155_v40 = vld [vmem:[%s4313_s19 + $0xc0] sm:$0xff] }
 0x3cd   : > { %v1314_v7 = vrot.slane %v1313_v48, 4  ;;  %v1117_v3 = vrot.slane %v3667_v49, 4 }
 0x3cf   : > { %v1315_v25 = vsel %vm852_vm7, %v1313_v48, %v1314_v7  ;;  %v1300_v48 = vadd.f32 %v1299_v22, %v1291_v28 }
 0x3d0   : > { %v1322_v50 = vpop.permute.xlu0 %1321  ;;  %v3669_v52 = vpop.permute.xlu1 %1125  ;;  %v1317_v58 = vmul.f32 %v2689_v24, %v1315_v25  ;;  %v1119_v24 = vsel %vm1118_vm5, %v3667_v49, %v1117_v3  ;;  %v2799_v49 = vld [vmem:[%s4313_s19 + $0x288] sm:$0xff]  ;;  %vm1389_vm5 = vcmask 588800  }
 0x3d1   : > { %v1323_v19 = vrot.slane %v1322_v50, 4  ;;  %v1309_v1 = vadd.f32 %v1308_v31, %v1300_v48  ;;  %v1127_v18 = vrot.slane %v3669_v52, 4  ;;  %2345 = vmatprep.subr.mxu1 %v2799_v49  ;;  %v2792_v49 = vld [vmem:[%s4313_s19 + $0x250] sm:$0xff] }
 0x3d2   : > { %2346 = vmatpush1.msra.mxu1 %v2798_v42  ;;  %v2791_v42 = vld [vmem:[%s4313_s19 + $0x248] sm:$0xff] }
 0x3d3   : > { %v1324_v43 = vsel %vm867_vm8, %v1322_v50, %v1323_v19  ;;  %v1083_v50 = vadd.f32 %v1082_v27, %v1074_v33  ;;  %v1318_v17 = vadd.f32 %v1317_v58, %v1309_v1 }
 0x3d4   : > { %v1331_v53 = vpop.permute.xlu0 %1330  ;;  %v3671_v54 = vpop.permute.xlu1 %1135  ;;  %v1326_v4 = vmul.f32 %v2690_v41, %v1324_v43  ;;  %v2671_v41 = vld [vmem:[%s4366_s2 + $0x30] sm:$0xff]  ;;  %v1129_v43 = vsel %vm1128_vm15, %v3669_v52, %v1127_v18  ;;  %v2158_v18 = vld [vmem:[%s4313_s19 + $0xd8] sm:$0xff]  ;;  %vm1195_vm15 = vcmask 883712  }
 0x3d5   : > { %v1332_v26 = vrot.slane %v1331_v53, 4  ;;  %v1092_v20 = vadd.f32 %v1091_v61, %v1083_v50  ;;  %v1137_v30 = vrot.slane %v3671_v54, 4  ;;  %v2695_v52 = vld [vmem:[%s4302_s8 + $0x50] sm:$0xff]  ;;  %v2672_v50 = vld [vmem:[%s4366_s2 + $0x38] sm:$0xff]  ;;  %v1131_v11 = vmul.f32 %v2671_v41, %v1129_v43 }
 0x3d6   : > { %v1327_v25 = vadd.f32 %v1326_v4, %v1318_v17  ;;  %v1437_v41 = vrot.slane %v3653_v34, 4  ;;  %v2143_v34 = vld [vmem:[%s4313_s19 + $0x60] sm:$0xff] }
 0x3d7   : > { %v1333_v62 = vsel %vm882_vm9, %v1331_v53, %v1332_v26  ;;  %v2692_v53 = vld [vmem:[%s4302_s8 + $0x38] sm:$0xff]  ;;  %v1102_v29 = vadd.f32 %v1101_v44, %v1092_v20  ;;  %v2159_v44 = vld [vmem:[%s4313_s19 + $0xe0] sm:$0xff] }
 0x3d8   : > { %v1340_v59 = vpop.permute.xlu0 %1339  ;;  %v3673_v60 = vpop.permute.xlu1 %1144  ;;  %v1335_v19 = vmul.f32 %v2691_v63, %v1333_v62  ;;  %v2160_v63 = vld [vmem:[%s4313_s19 + $0xe8] sm:$0xff]  ;;  %v2797_v62 = vld [vmem:[%s4313_s19 + $0x278] sm:$0xff] }
 0x3d9   : > { %v1341_v46 = vrot.slane %v1340_v59, 4  ;;  %v1146_v58 = vrot.slane %v3673_v60, 4  ;;  %2347 = vmatprep.subr.mxu1 %v2797_v62  ;;  %v2790_v62 = vld [vmem:[%s4313_s19 + $0x240] sm:$0xff] }
 0x3da   : > { %2348 = vmatpush1.msra.mxu1 %v2796_v10 }
 0x3db   : > { %v1342_v15 = vsel %vm897_vm10, %v1340_v59, %v1341_v46  ;;  %v2670_v59 = vld [vmem:[%s4366_s2 + $0x28] sm:$0xff]  ;;  %v1336_v46 = vadd.f32 %v1335_v19, %v1327_v25  ;;  %v2697_v25 = vld [vmem:[%s4302_s8 + $0x60] sm:$0xff] }
 0x3dc   : > { %v1349_v13 = vpop.permute.xlu0 %1348  ;;  %v3686_v14 = vpop.permute.xlu1 %1153  ;;  %v1344_v26 = vmul.f32 %v2692_v53, %v1342_v15  ;;  %v1121_v55 = vmul.f32 %v2670_v59, %v1119_v24  ;;  %v1138_v53 = vsel %vm837_vm6, %v3671_v54, %v1137_v30  ;;  %v2696_v15 = vld [vmem:[%s4302_s8 + $0x58] sm:$0xff]  ;;  %v2795_v19 = vld [vmem:[%s4313_s19 + $0x268] sm:$0xff]  ;;  %v2673_v54 = vld [vmem:[%s4366_s2 + $0x40] sm:$0xff]  ;;  %v1147_v59 = vsel %vm852_vm7, %v3673_v60, %v1146_v58 }
 0x3dd   : > { %v1350_v0 = vrot.slane %v1349_v13, 4  ;;  %2349 = vmatprep.subr.mxu1 %v2795_v19  ;;  %v1155_v24 = vrot.slane %v3686_v14, 4  ;;  %v1140_v30 = vmul.f32 %v2672_v50, %v1138_v53  ;;  %vm1399_vm6 = vcmask 580608  }
 0x3de   : > { %v1345_v1 = vadd.f32 %v1344_v26, %v1336_v46  ;;  %v2698_v46 = vld [vmem:[%s4302_s8 + $0x68] sm:$0xff]  ;;  %v1149_v58 = vmul.f32 %v2673_v54, %v1147_v59  ;;  %vm1175_vm7 = vcmask 900096   ;;  %v2700_v59 = vld [vmem:[%s4302_s8 + $0x78] sm:$0xff] }
 0x3df   : > { %v1351_v47 = vsel %vm912_vm11, %v1349_v13, %v1350_v0  ;;  %v2694_v13 = vld [vmem:[%s4302_s8 + $0x48] sm:$0xff]  ;;  %v1112_v0 = vadd.f32 %v1111_v23, %v1102_v29  ;;  %v2793_v29 = vld [vmem:[%s4313_s19 + $0x258] sm:$0xff] }
 0x3e0   : > { %v1358_v6 = vpop.permute.xlu0 %1357  ;;  %v3708_v32 = vpop.permute.xlu1 %1162  ;;  %v1353_v48 = vmul.f32 %v2693_v21, %v1351_v47  ;;  %v2157_v47 = vld [vmem:[%s4313_s19 + $0xd0] sm:$0xff] }
 0x3e1   : > { %v1359_v16 = vrot.slane %v1358_v6, 4  ;;  %v1122_v23 = vadd.f32 %v1121_v55, %v1112_v0  ;;  %v1422_v55 = vrot.slane %v3655_v35, 4  ;;  %v2674_v0 = vld [vmem:[%s4366_s2 + $0x48] sm:$0xff]  ;;  %v1156_v35 = vsel %vm867_vm8, %v3686_v14, %v1155_v24  ;;  %v2699_v14 = vld [vmem:[%s4302_s8 + $0x70] sm:$0xff] }
 0x3e2   : > { %v1354_v20 = vadd.f32 %v1353_v48, %v1345_v1  ;;  %v1164_v50 = vrot.slane %v3708_v32, 4  ;;  %vm1409_vm8 = vcmask 572416   ;;  %v2149_v24 = vld [vmem:[%s4313_s19 + $0x90] sm:$0xff] }
 0x3e3   : > { %v1361_v31 = vsel %vm1360_vm1, %v1358_v6, %v1359_v16  ;;  %v2161_v6 = vld [vmem:[%s4313_s19 + $0xf0] sm:$0xff]  ;;  %v1132_v43 = vadd.f32 %v1131_v11, %v1122_v23  ;;  %vm1185_vm1 = vcmask 891904  }
 0x3e4   : > { %v1368_v5 = vpop.permute.xlu0 %1367  ;;  %v3725_v7 = vpop.permute.xlu1 %1172  ;;  %2203 = vmatpush1.msra.mxu0 %v2161_v6  ;;  %v1363_v3 = vmul.f32 %v2694_v13, %v1361_v31  ;;  %v2154_v6 = vld [vmem:[%s4313_s19 + $0xb8] sm:$0xff] }
 0x3e5   : > { %v1369_v22 = vrot.slane %v1368_v5, 4  ;;  %2204 = vmatprep.subr.mxu0 %v2160_v63  ;;  %v2153_v63 = vld [vmem:[%s4313_s19 + $0xb0] sm:$0xff] }
 0x3e6   : > { %2205 = vmatpush1.msra.mxu0 %v2159_v44  ;;  %v1364_v60 = vadd.f32 %v1363_v3, %v1354_v20  ;;  %v2152_v3 = vld [vmem:[%s4313_s19 + $0xa8] sm:$0xff]  ;;  %v1141_v44 = vadd.f32 %v1140_v30, %v1132_v43  ;;  %v2150_v20 = vld [vmem:[%s4313_s19 + $0x98] sm:$0xff] }
 0x3e7   : > { %v1370_v61 = vsel %vm1067_vm2, %v1368_v5, %v1369_v22  ;;  %2206 = vmatprep.subr.mxu0 %v2158_v18  ;;  %v2794_v22 = vld [vmem:[%s4313_s19 + $0x260] sm:$0xff]  ;;  %v1174_v18 = vrot.slane %v3725_v7, 4  ;;  %vm1425_vm2 = vcmask 474112  }
 0x3e8   : > { %v1377_v27 = vpop.permute.xlu0 %1376  ;;  %v3745_v28 = vpop.permute.xlu1 %1182  ;;  %v1372_v21 = vmul.f32 %v2695_v52, %v1370_v61  ;;  %2207 = vmatpush1.msra.mxu0 %v2157_v47  ;;  %2350 = vmatpush1.msra.mxu1 %v2794_v22  ;;  %v1150_v47 = vadd.f32 %v1149_v58, %v1141_v44  ;;  %v1158_v22 = vmul.f32 %v2674_v0, %v1156_v35  ;;  %v1451_v0 = vrot.slane %v3659_v37, 4  ;;  %v2677_v37 = vld [vmem:[%s4366_s2 + $0x60] sm:$0xff] }
 0x3e9   : > { %v1378_v33 = vrot.slane %v1377_v27, 4  ;;  %2351 = vmatprep.subr.mxu1 %v2793_v29  ;;  %v1184_v29 = vrot.slane %v3745_v28, 4 }
 0x3ea   : > { %2352 = vmatpush1.msra.mxu1 %v2792_v49  ;;  %v1373_v52 = vadd.f32 %v1372_v21, %v1364_v60  ;;  %v2787_v21 = vld [vmem:[%s4313_s19 + $0x228] sm:$0xff] }
 0x3eb   : > { %v1380_v16 = vsel %vm1379_vm4, %v1377_v27, %v1378_v33  ;;  %v2156_v27 = vld [vmem:[%s4313_s19 + $0xc8] sm:$0xff]  ;;  %2353 = vmatprep.subr.mxu1 %v2791_v42  ;;  %v2676_v42 = vld [vmem:[%s4366_s2 + $0x58] sm:$0xff]  ;;  %v1186_v44 = vsel %vm1185_vm1, %v3745_v28, %v1184_v29  ;;  %vm1453_vm4 = vcmask 457728  }
 0x3ec   : > { %v1387_v4 = vpop.permute.xlu0 %1386  ;;  %v3783_v5 = vpop.permute.xlu1 %1192  ;;  %v1382_v13 = vmul.f32 %v2696_v15, %v1380_v16  ;;  %2208 = vmatprep.subr.mxu0 %v2156_v27  ;;  %2354 = vmatpush1.msra.mxu1 %v2790_v62  ;;  %v2151_v16 = vld [vmem:[%s4313_s19 + $0xa0] sm:$0xff]  ;;  %v1166_v27 = vsel %vm1165_vm14, %v3708_v32, %v1164_v50  ;;  %vm1439_vm14 = vcmask 465920   ;;  %v2783_v62 = vld [vmem:[%s4313_s19 + $0x208] sm:$0xff] }
 0x3ed   : > { %v1388_v17 = vrot.slane %v1387_v4, 4  ;;  %2209 = vmatpush1.msra.mxu0 %v2155_v40  ;;  %v1194_v58 = vrot.slane %v3783_v5, 4 }
 0x3ee   : > { %2210 = vmatprep.subr.mxu0 %v2154_v6  ;;  %v1383_v10 = vadd.f32 %v1382_v13, %v1373_v52  ;;  %v2148_v13 = vld [vmem:[%s4313_s19 + $0x88] sm:$0xff]  ;;  %v2784_v6 = vld [vmem:[%s4313_s19 + $0x210] sm:$0xff] }
 0x3ef   : > { %v1390_v26 = vsel %vm1389_vm5, %v1387_v4, %v1388_v17  ;;  %2211 = vmatpush1.msra.mxu0 %v2153_v63  ;;  %v2789_v4 = vld [vmem:[%s4313_s19 + $0x238] sm:$0xff]  ;;  %v2788_v17 = vld [vmem:[%s4313_s19 + $0x230] sm:$0xff]  ;;  %vm1242_vm5 = vcmask 785408  }
 0x3f0   : > { %v1397_v31 = vpop.permute.xlu0 %1396  ;;  %v3825_v33 = vpop.permute.xlu1 %1202  ;;  %v1392_v61 = vmul.f32 %v2697_v25, %v1390_v26  ;;  %2212 = vmatprep.subr.mxu0 %v2152_v3  ;;  %2355 = vmatprep.subr.mxu1 %v2789_v4  ;;  %v2786_v25 = vld [vmem:[%s4313_s19 + $0x220] sm:$0xff]  ;;  %v2675_v26 = vld [vmem:[%s4366_s2 + $0x50] sm:$0xff]  ;;  %v2146_v63 = vld [vmem:[%s4313_s19 + $0x78] sm:$0xff]  ;;  %v1159_v4 = vadd.f32 %v1158_v22, %v1150_v47 }
 0x3f1   : > { %v1398_v48 = vrot.slane %v1397_v31, 4  ;;  %2213 = vmatpush1.msra.mxu0 %v2151_v16  ;;  %2356 = vmatpush1.msra.mxu1 %v2788_v17  ;;  %v1168_v35 = vmul.f32 %v2675_v26, %v1166_v27  ;;  %v2782_v3 = vld [vmem:[%s4313_s19 + $0x200] sm:$0xff]  ;;  %v2142_v22 = vld [vmem:[%s4313_s19 + $0x58] sm:$0xff]  ;;  %v2679_v27 = vld [vmem:[%s4366_s2 + $0x70] sm:$0xff] }
 0x3f2   : > { %v1393_v23 = vadd.f32 %v1392_v61, %v1383_v10  ;;  %2214 = vmatprep.subr.mxu0 %v2150_v20  ;;  %2357 = vmatprep.subr.mxu1 %v2787_v21  ;;  %v1204_v10 = vrot.slane %v3825_v33, 4  ;;  %v2778_v26 = vld [vmem:[%s4313_s19 + $0x1e0] sm:$0xff] }
 0x3f3   : > { %v1400_v1 = vsel %vm1399_vm6, %v1397_v31, %v1398_v48  ;;  %2215 = vmatpush1.msra.mxu0 %v2149_v24  ;;  %2358 = vmatpush1.msra.mxu1 %v2786_v25  ;;  %v2785_v31 = vld [vmem:[%s4313_s19 + $0x218] sm:$0xff]  ;;  %v2147_v48 = vld [vmem:[%s4313_s19 + $0x80] sm:$0xff]  ;;  %v1188_v24 = vmul.f32 %v2677_v37, %v1186_v44  ;;  %v2141_v25 = vld [vmem:[%s4313_s19 + $0x50] sm:$0xff]  ;;  %vm1262_vm6 = vcmask 769024  }
 0x3f4   : > { %v1402_v11 = vmul.f32 %v2698_v46, %v1400_v1  ;;  %v1407_v53 = vpop.permute.xlu0 %1406  ;;  %v1418_v15 = vpop.permute.xlu1 %1417  ;;  %2216 = vmatprep.subr.mxu0 %v2148_v13  ;;  %2359 = vmatprep.subr.mxu1 %v2785_v31  ;;  %v2145_v1 = vld [vmem:[%s4313_s19 + $0x70] sm:$0xff]  ;;  %v1205_v29 = vsel %vm882_vm9, %v3825_v33, %v1204_v10  ;;  %v2140_v31 = vld [vmem:[%s4313_s19 + $0x48] sm:$0xff]  ;;  %vm1232_vm9 = vcmask 793600  }
 0x3f5   : > { %v1408_v19 = vrot.slane %v1407_v53, 4  ;;  %v1421_v54 = vrot.slane %v1418_v15, 4  ;;  %2217 = vmatpush1.msra.mxu0 %v2147_v48  ;;  %2360 = vmatpush1.msra.mxu1 %v2784_v6  ;;  %v2139_v6 = vld [vmem:[%s4313_s19 + $0x40] sm:$0xff]  ;;  %v2136_v10 = vld [vmem:[%s4313_s19 + $0x28] sm:$0xff] }
 0x3f6   : > { %v1403_v40 = vadd.f32 %v1402_v11, %v1393_v23  ;;  %2218 = vmatprep.subr.mxu0 %v2146_v63  ;;  %2361 = vmatprep.subr.mxu1 %v2783_v62  ;;  %v2779_v23 = vld [vmem:[%s4313_s19 + $0x1e8] sm:$0xff]  ;;  %v2138_v62 = vld [vmem:[%s4313_s19 + $0x38] sm:$0xff] }
 0x3f7   : > { %v1410_v30 = vsel %vm1409_vm8, %v1407_v53, %v1408_v19  ;;  %v1424_v60 = vsel %vm1423_vm13, %v1421_v54, %v1422_v55  ;;  %v1176_v55 = vsel %vm1175_vm7, %v3725_v7, %v1174_v18  ;;  %v2701_v7 = vld [vmem:[%s4302_s8 + $0x80] sm:$0xff]  ;;  %2219 = vmatpush1.msra.mxu0 %v2145_v1  ;;  %2362 = vmatpush1.msra.mxu1 %v2782_v3  ;;  %v2781_v53 = vld [vmem:[%s4313_s19 + $0x1f8] sm:$0xff]  ;;  %v2678_v19 = vld [vmem:[%s4366_s2 + $0x68] sm:$0xff]  ;;  %v1479_v1 = vrot.slane %v3661_v38, 4 }
 0x3f8   : > { %v1412_v49 = vmul.f32 %v2699_v14, %v1410_v30  ;;  %v1426_v32 = vsel %vm1425_vm2, %v1418_v15, %v1424_v60  ;;  %v1433_v43 = vpop.permute.xlu0 %1432  ;;  %v3903_v46 = vpop.permute.xlu1 %1211  ;;  %v2144_v14 = vld [vmem:[%s4313_s19 + $0x68] sm:$0xff]  ;;  %v1178_v15 = vmul.f32 %v2676_v42, %v1176_v55  ;;  %2363 = vmatprep.subr.mxu1 %v2781_v53  ;;  %v1196_v54 = vsel %vm1195_vm15, %v3783_v5, %v1194_v58  ;;  %v2776_v42 = vld [vmem:[%s4313_s19 + $0x1d0] sm:$0xff]  ;;  %v2680_v55 = vld [vmem:[%s4366_s2 + $0x78] sm:$0xff] }
 0x3f9   : > { %v1428_v52 = vmul.f32 %v2700_v59, %v1426_v32  ;;  %v1436_v61 = vrot.slane %v1433_v43, 4  ;;  %2220 = vmatprep.subr.mxu0 %v2144_v14  ;;  %v1213_v21 = vrot.slane %v3903_v46, 4  ;;  %v1169_v59 = vadd.f32 %v1168_v35, %v1159_v4  ;;  %v2702_v5 = vld [vmem:[%s4302_s8 + $0x88] sm:$0xff]  ;;  %v2681_v4 = vld [vmem:[%s4366_s2 + $0x80] sm:$0xff]  ;;  %v2773_v38 = vld [vmem:[%s4313_s19 + $0x1b8] sm:$0xff] }
 0x3fa   : > { %v1413_v50 = vadd.f32 %v1412_v49, %v1403_v40  ;;  %2221 = vmatpush1.msra.mxu0 %v2143_v34  ;;  %v2777_v40 = vld [vmem:[%s4313_s19 + $0x1d8] sm:$0xff]  ;;  %v1198_v32 = vmul.f32 %v2678_v19, %v1196_v54  ;;  %v1465_v3 = vrot.slane %v3663_v39, 4  ;;  %v2771_v54 = vld [vmem:[%s4313_s19 + $0x1a8] sm:$0xff]  ;;  %vm1507_vm7 = vcmask 551936  }
 0x3fb   : > { %v1438_v11 = vsel %vm1423_vm13, %v1436_v61, %v1437_v41  ;;  %v2780_v41 = vld [vmem:[%s4313_s19 + $0x1f0] sm:$0xff]  ;;  %2222 = vmatprep.subr.mxu0 %v2142_v22  ;;  %v1179_v49 = vadd.f32 %v1178_v15, %v1169_v59  ;;  %v1214_v58 = vsel %vm897_vm10, %v3903_v46, %v1213_v21  ;;  %vm1467_vm10 = vcmask 359424   ;;  %v2135_v15 = vld [vmem:[%s4313_s19 + $0x20] sm:$0xff]  ;;  %v2134_v19 = vld [vmem:[%s4313_s19 + $0x18] sm:$0xff] }
 0x3fc   : > { %v1429_v16 = vadd.f32 %v1428_v52, %v1413_v50  ;;  %v1440_v28 = vsel %vm1439_vm14, %v1433_v43, %v1438_v11  ;;  %v1221_v17 = vpop.permute.xlu0 %1220  ;;  %v1447_v18 = vpop.permute.xlu1 %1446  ;;  %2364 = vmatpush1.msra.mxu1 %v2780_v41  ;;  %2223 = vmatpush1.msra.mxu0 %v2141_v25  ;;  %v1207_v50 = vmul.f32 %v2679_v27, %v1205_v29  ;;  %v2137_v46 = vld [vmem:[%s4313_s19 + $0x30] sm:$0xff]  ;;  %v2770_v22 = vld [vmem:[%s4313_s19 + $0x1a0] sm:$0xff]  ;;  %v2769_v25 = vld [vmem:[%s4313_s19 + $0x198] sm:$0xff] }
 0x3fd   : > { %v1442_v20 = vmul.f32 %v2701_v7, %v1440_v28  ;;  %v1450_v47 = vrot.slane %v1447_v18, 4  ;;  %2365 = vmatprep.subr.mxu1 %v2779_v23  ;;  %v1222_v60 = vrot.slane %v1221_v17, 4  ;;  %2224 = vmatprep.subr.mxu0 %v2140_v31  ;;  %v1189_v35 = vadd.f32 %v1188_v24, %v1179_v49  ;;  %v2774_v7 = vld [vmem:[%s4313_s19 + $0x1c0] sm:$0xff]  ;;  %v2682_v28 = vld [vmem:[%s4366_s2 + $0x88] sm:$0xff]  ;;  %v2683_v59 = vld [vmem:[%s4366_s2 + $0x90] sm:$0xff] }
 0x3fe   : > { %2366 = vmatpush1.msra.mxu1 %v2778_v26  ;;  %2225 = vmatpush1.msra.mxu0 %v2139_v6  ;;  %v1216_v39 = vmul.f32 %v2680_v55, %v1214_v58  ;;  %v2703_v29 = vld [vmem:[%s4302_s8 + $0x90] sm:$0xff]  ;;  %v2131_v31 = vld [vmem:[%s4313_s19] sm:$0xff]  ;;  %v2684_v49 = vld [vmem:[%s4366_s2 + $0x98] sm:$0xff] }
 0x3ff   : > { %v1443_v30 = vadd.f32 %v1442_v20, %v1429_v16  ;;  %v1452_v13 = vsel %vm1423_vm13, %v1450_v47, %v1451_v0  ;;  %2367 = vmatprep.subr.mxu1 %v2777_v40  ;;  %v2775_v0 = vld [vmem:[%s4313_s19 + $0x1c8] sm:$0xff]  ;;  %2226 = vmatprep.subr.mxu0 %v2138_v62  ;;  %v1223_v37 = vsel %vm912_vm11, %v1221_v17, %v1222_v60  ;;  %v2772_v16 = vld [vmem:[%s4313_s19 + $0x1b0] sm:$0xff]  ;;  %vm1252_vm11 = vcmask 777216   ;;  %v2704_v6 = vld [vmem:[%s4302_s8 + $0x98] sm:$0xff] }
 0x400   : > { %v1454_v43 = vsel %vm1453_vm4, %v1447_v18, %v1452_v13  ;;  %v1230_v48 = vpop.permute.xlu0 %1229  ;;  %v3989_v33 = vpop.permute.xlu1 %1460  ;;  %2368 = vmatpush1.msra.mxu1 %v2776_v42  ;;  %2227 = vmatpush1.msra.mxu0 %v2137_v46  ;;  %v1199_v11 = vadd.f32 %v1198_v32, %v1189_v35  ;;  %v1225_v21 = vmul.f32 %v2681_v4, %v1223_v37  ;;  %v2133_v47 = vld [vmem:[%s4313_s19 + $0x10] sm:$0xff]  ;;  %v2179_v58 = vld [vmem:[%s4313_s19 + $0x180] sm:$0xf]  ;;  %v2178_v62 = vld [vmem:[%s4313_s19 + $0x178] sm:$0xff] }
 0x401   : > { %v1456_v52 = vmul.f32 %v2702_v5, %v1454_v43  ;;  %v1231_v61 = vrot.slane %v1230_v48, 4  ;;  %v1464_v63 = vrot.slane %v3989_v33, 4  ;;  %2369 = vmatprep.subr.mxu1 %v2775_v0  ;;  %2228 = vmatprep.subr.mxu0 %v2136_v10  ;;  %v2132_v5 = vld [vmem:[%s4313_s19 + $0x8] sm:$0xff]  ;;  %v2768_v40 = vld [vmem:[%s4313_s19 + $0x190] sm:$0xff] }
 0x402   : > { %2370 = vmatpush1.msra.mxu1 %v2774_v7  ;;  %2229 = vmatpush1.msra.mxu0 %v2135_v15  ;;  %v1208_v20 = vadd.f32 %v1207_v50, %v1199_v11  ;;  %v2180_v43 = vld [vmem:[%s4313_s19 + $0x188] sm:$0xf]  ;;  %v2705_v15 = vld [vmem:[%s4302_s8 + $0xa0] sm:$0xff] }
 0x403   : > { %v4021_v44 = vadd.f32 %v1456_v52, %v1443_v30  ;;  %2371 = vmatprep.subr.mxu1 %v2773_v38  ;;  %v1233_v17 = vsel %vm1232_vm9, %v1230_v48, %v1231_v61  ;;  %v1466_v18 = vsel %vm1423_vm13, %v1464_v63, %v1465_v3  ;;  %2230 = vmatprep.subr.mxu0 %v2134_v19  ;;  %v2817_v48 = vld [vmem:[%s4313_s19 + $0x318] sm:$0xf]  ;;  %v2816_v52 = vld [vmem:[%s4313_s19 + $0x310] sm:$0xf]  ;;  %v2815_v0 = vld [vmem:[%s4313_s19 + $0x308] sm:$0xff] }
 0x404   : > { %v1475_v14 = vpop.permute.xlu0 %1474  ;;  %v1240_v53 = vpop.permute.xlu1 %1239  ;;  %2372 = vmatpush1.msra.mxu1 %v2772_v16  ;;  %2231 = vmatpush1.msra.mxu0 %v2133_v47  ;;  %v1217_v26 = vadd.f32 %v1216_v39, %v1208_v20  ;;  %v1235_v27 = vmul.f32 %v2682_v28, %v1233_v17  ;;  %v1468_v30 = vsel %vm1467_vm10, %v3989_v33, %v1466_v18  ;;  %v2814_v3 = vld [vmem:[%s4313_s19 + $0x300] sm:$0xff]  ;;  %v2176_v39 = vld [vmem:[%s4313_s19 + $0x168] sm:$0xff]  ;;  %v2812_v28 = vld [vmem:[%s4313_s19 + $0x2f0] sm:$0xff] }
 0x405   : > { %v1478_v34 = vrot.slane %v1475_v14, 4  ;;  %v1241_v41 = vrot.slane %v1240_v53, 4  ;;  %2373 = vmatprep.subr.mxu1 %v2771_v54  ;;  %2232 = vmatprep.subr.mxu0 %v2132_v5  ;;  %v1470_v61 = vmul.f32 %v2703_v29, %v1468_v30  ;;  %v2685_v38 = vld [vmem:[%s4366_s2 + $0xa0] sm:$0xff]  ;;  %v2811_v19 = vld [vmem:[%s4313_s19 + $0x2e8] sm:$0xff]  ;;  %v2170_v29 = vld [vmem:[%s4313_s19 + $0x138] sm:$0xff] }
 0x406   : > { %2374 = vmatpush1.msra.mxu1 %v2770_v22  ;;  %2233 = vmatpush1.msra.mxu0 %v2131_v31  ;;  %v1226_v33 = vadd.f32 %v1225_v21, %v1217_v26  ;;  %v2175_v16 = vld [vmem:[%s4313_s19 + $0x160] sm:$0xff]  ;;  %v2808_v26 = vld [vmem:[%s4313_s19 + $0x2d0] sm:$0xff]  ;;  %v2807_v30 = vld [vmem:[%s4313_s19 + $0x2c8] sm:$0xff] }
 0x407   : > { %v1480_v23 = vsel %vm1423_vm13, %v1478_v34, %v1479_v1  ;;  %v1243_v24 = vsel %vm1242_vm5, %v1240_v53, %v1241_v41  ;;  %2375 = vmatprep.subr.mxu1 %v2769_v25  ;;  %2765 = vmatprep.subr.msk.mxu0 %vm1423_vm13, %v2180_v43  ;;  %v2177_v1 = vld [vmem:[%s4313_s19 + $0x170] sm:$0xff]  ;;  %v1471_v17 = vadd.f32 %v1470_v61, %v4021_v44  ;;  %v2174_v41 = vld [vmem:[%s4313_s19 + $0x158] sm:$0xff]  ;;  %v2810_v47 = vld [vmem:[%s4313_s19 + $0x2e0] sm:$0xff] }
 0x408   : > { %v1250_v60 = vpop.permute.xlu0 %1249  ;;  %v1488_v13 = vpop.permute.xlu1 %1487  ;;  %2376 = vmatpush1.msra.mxu1 %v2768_v40  ;;  %v1481_v42 = vsel %vm1271_vm3, %v1475_v14, %v1480_v23  ;;  %v1245_v55 = vmul.f32 %v2683_v59, %v1243_v24  ;;  %2766 = vmatpush2.msk.msra.mxu0 %vm1423_vm13, %v2179_v58  ;;  %v1236_v35 = vadd.f32 %v1235_v27, %v1226_v33  ;;  %vm1494_vm3 = vcmask 343040   ;;  %v2813_v14 = vld [vmem:[%s4313_s19 + $0x2f8] sm:$0xff]  ;;  %v2173_v44 = vld [vmem:[%s4313_s19 + $0x150] sm:$0xff]  ;;  %v2172_v59 = vld [vmem:[%s4313_s19 + $0x148] sm:$0xff] }
 0x409   : > { %v1251_v32 = vrot.slane %v1250_v60, 4  ;;  %2819 = vmatprep.subr.msk.mxu1 %vm1423_vm13, %v2817_v48  ;;  %2250 = vmatprep.subr.mxu0 %v2178_v62  ;;  %v1483_v4 = vmul.f32 %v2704_v6, %v1481_v42  ;;  %v1491_v37 = vrot.slane %v1488_v13, 4  ;;  %v2809_v24 = vld [vmem:[%s4313_s19 + $0x2d8] sm:$0xff]  ;;  %v2171_v25 = vld [vmem:[%s4313_s19 + $0x140] sm:$0xff]  ;;  %v1500_v40 = vcombine.high %v3514_v45, %v3519_v51  ;;  %v2804_v48 = vld [vmem:[%s4313_s19 + $0x2b0] sm:$0xff] }
 0x40a   : > { %2820 = vmatpush2.msk.msra.mxu1 %vm1423_vm13, %v2816_v52  ;;  %2251 = vmatpush2.msra.mxu0 %v2177_v1  ;;  %v1246_v53 = vadd.f32 %v1245_v55, %v1236_v35  ;;  %v2167_v43 = vld [vmem:[%s4313_s19 + $0x120] sm:$0xff]  ;;  %v2166_v6 = vld [vmem:[%s4313_s19 + $0x118] sm:$0xff]  ;;  %v2803_v42 = vld [vmem:[%s4313_s19 + $0x2a8] sm:$0xff] }
 0x40b   : > { %v1253_v63 = vsel %vm1252_vm11, %v1250_v60, %v1251_v32  ;;  %2393 = vmatprep.subr.mxu1 %v2815_v0  ;;  %2252 = vmatprep.subr.mxu0 %v2176_v39  ;;  %v1484_v22 = vadd.f32 %v1483_v4, %v1471_v17  ;;  %v2169_v60 = vld [vmem:[%s4313_s19 + $0x130] sm:$0xff]  ;;  %v2805_v32 = vld [vmem:[%s4313_s19 + $0x2b8] sm:$0xff]  ;;  %v2802_v58 = vld [vmem:[%s4313_s19 + $0x2a0] sm:$0xff] }
 0x40c   : > { %v1255_v50 = vmul.f32 %v2684_v49, %v1253_v63  ;;  %v1490_v46 = vpop.permute.xlu0 %1489  ;;  %v1260_v7 = vpop.permute.xlu1 %1259  ;;  %2394 = vmatpush2.msra.mxu1 %v2814_v3  ;;  %2253 = vmatpush2.msra.mxu0 %v2175_v16  ;;  %v2168_v49 = vld [vmem:[%s4313_s19 + $0x128] sm:$0xff]  ;;  %v2165_v55 = vld [vmem:[%s4313_s19 + $0x110] sm:$0xff]  ;;  %v2801_v63 = vld [vmem:[%s4313_s19 + $0x298] sm:$0xff] }
 0x40d   : > { %v1492_v10 = vrot.slane %v1490_v46, 4  ;;  %v1261_v11 = vrot.slane %v1260_v7, 4  ;;  %2395 = vmatprep.subr.mxu1 %v2813_v14  ;;  %2254 = vmatprep.subr.mxu0 %v2174_v41  ;;  %v2164_v61 = vld [vmem:[%s4313_s19 + $0x108] sm:$0xff]  ;;  %v2163_v62 = vld [vmem:[%s4313_s19 + $0x100] sm:$0xff]  ;;  %v2800_v0 = vld [vmem:[%s4313_s19 + $0x290] sm:$0xff] }
 0x40e   : > { %2396 = vmatpush2.msra.mxu1 %v2812_v28  ;;  %v1256_v54 = vadd.f32 %v1255_v50, %v1246_v53  ;;  %2255 = vmatpush2.msra.mxu0 %v2173_v44 }
 0x40f   : > { %v1493_v18 = vsel %vm1423_vm13, %v1491_v37, %v1492_v10  ;;  %v1263_v34 = vsel %vm1262_vm6, %v1260_v7, %v1261_v11  ;;  %2397 = vmatprep.subr.mxu1 %v2811_v19  ;;  %2256 = vmatprep.subr.mxu0 %v2172_v59 }
 0x410   : > { %v1495_v20 = vsel %vm1494_vm3, %v1488_v13, %v1493_v18  ;;  %v1265_v21 = vmul.f32 %v2685_v38, %v1263_v34  ;;  %2398 = vmatpush2.msra.mxu1 %v2810_v47  ;;  %2257 = vmatpush2.msra.mxu0 %v2171_v25  ;;  %v2806_v13 = vld [vmem:[%s4313_s19 + $0x2c0] sm:$0xff] }
 0x411   : > { %v1497_v23 = vmul.f32 %v2705_v15, %v1495_v20  ;;  %2399 = vmatprep.subr.mxu1 %v2809_v24  ;;  %2258 = vmatprep.subr.mxu0 %v2170_v29 }
 0x412   : > { %v4150_v5 = vadd.f32 %v1265_v21, %v1256_v54  ;;  %2400 = vmatpush2.msra.mxu1 %v2808_v26  ;;  %2259 = vmatpush2.msra.mxu0 %v2169_v60 }
 0x413   : > { %v4158_v27 = vadd.f32 %v1497_v23, %v1484_v22  ;;  %2401 = vmatprep.subr.mxu1 %v2807_v30  ;;  %2260 = vmatprep.subr.mxu0 %v2168_v49 }
 0x414   : > { %2402 = vmatpush2.msra.mxu1 %v2806_v13  ;;  %2261 = vmatpush2.msra.mxu0 %v2167_v43 }
 0x415   : > { %v1499_v31 = vadd.f32 %v4158_v27, %v4150_v5  ;;  %2403 = vmatprep.subr.mxu1 %v2805_v32  ;;  %2262 = vmatprep.subr.mxu0 %v2166_v6 }
 0x416   : > { %2404 = vmatpush2.msra.mxu1 %v2804_v48  ;;  %2263 = vmatpush2.msra.mxu0 %v2165_v55 }
 0x417   : > { %v1502_v33 = vadd.f32 %v1500_v40, %v1499_v31  ;;  %2405 = vmatprep.subr.mxu1 %v2803_v42  ;;  %2264 = vmatprep.subr.mxu0 %v2164_v61  ;;  %v2125_v61 = vld [vmem:[%s4312_s18] sm:$0xff] }
 0x418   : > { %2406 = vmatpush2.msra.mxu1 %v2802_v58  ;;  %2265 = vmatpush2.msra.mxu0 %v2163_v62 }
 0x419   : > { %v1504_v52 = vcombine.high %v1502_v33, %v1502_v33  ;;  %2407 = vmatprep.subr.mxu1 %v2801_v63  ;;  %v1506_v35 = vsel %vm1423_vm13, %v1502_v33, 0.0 }
 0x41a   : > { %2408 = vmatpush2.msra.mxu1 %v2800_v0 }
 0x41b   : > { %v1508_v50 = vsel %vm1507_vm7, %v1504_v52, 0.0 }
 0x41c   : > { %v1509_v46 = vadd.f32 %v1508_v50, %v1506_v35 }
 0x41e   : > { %1510 = vadd.xlane.f32.xlu0 %v1509_v46  ;;  %v2127_v46 = vcombine.high %v2125_v61, %v2125_v61 }
 0x460   : > { %v2068_v7 = vpop.f32.mrf.mxu1 }
 0x461   : > { %v2069_v1 = vadd.f32 %v2068_v7, %v3657_v36 }
 0x462   : > { %v2070_v3 = vpop.f32.mrf.mxu1 }
 0x463   : > { %v2075_v4 = vmul.f32 0.70710677, %v2069_v1  ;;  %v2071_v37 = vadd.f32 %v2070_v3, %v3657_v36  ;;  %v2073_v62 = vmul.f32 0.5, %v2069_v1 }
 0x465   : > { %v2077_v10 = vand.u32 2147483647, %v2075_v4  ;;  %v2076_v38 = vmul.f32 0.70710677, %v2071_v37  ;;  %vm2115_vm8 = vcmp.ge.f32.partialorder %v2075_v4, 0.0  ;;  %v2074_v35 = vmul.f32 0.5, %v2071_v37 }
 0x466   : > { %v1533_v37 = vsub.s32 2, %v3609_v8 }
 0x467   : > { %v2079_v11 = vmul.f32 0.3275911, %v2077_v10  ;;  %v2078_v39 = vand.u32 2147483647, %v2076_v38  ;;  %v2103_v16 = vsub.f32 0.0, %v2077_v10  ;;  %vm2116_vm2 = vcmp.ge.f32.partialorder %v2076_v38, 0.0 }
 0x468   : > { %v1514_v38 = vld [vmem:[%s4303_s9] sm:$0x3] }
 0x469   : > { %v2081_v14 = vadd.f32 1.0, %v2079_v11  ;;  %v2080_v53 = vmul.f32 0.3275911, %v2078_v39  ;;  %v2104_v28 = vsub.f32 0.0, %v2078_v39  ;;  %v2105_v17 = vmul.f32 %v2103_v16, %v2077_v10 }
 0x46a   : > { %v1543_v16 = vsub.s32 3, %v3609_v8 }
 0x46b   : > { %2895 = vrcp.f32 %v2081_v14  ;;  %v2082_v15 = vadd.f32 1.0, %v2080_v53  ;;  %v2106_v34 = vmul.f32 %v2104_v28, %v2078_v39  ;;  %v2107_v19 = vmul.f32 1.442695, %v2105_v17 }
 0x46d   : > { %2897 = vrcp.f32 %v2082_v15  ;;  %v2109_v36 = vmul.f32 1.442695, %v2106_v34 }
 0x46e   : > { %2899 = vpow2.f32 %v2107_v19 }
 0x46f   : > { %2901 = vpow2.f32 %v2109_v36 }
 0x478   : > { %v2896_v18 = vpop.eup %2895 }
 0x479   : > { %v2085_v41 = vmul.f32 1.0614054, %v2896_v18 }
 0x47a   : > { %v2898_v54 = vpop.eup %2897 }
 0x47b   : > { %v2087_v20 = vadd.f32 -1.4531521, %v2085_v41  ;;  %v2086_v21 = vmul.f32 1.0614054, %v2898_v54  ;;  %v2900_v40 = vpop.eup %2899 }
 0x47c   : > { %v2902_v48 = vpop.eup %2901 }
 0x47d   : > { %v2089_v44 = vmul.f32 %v2896_v18, %v2087_v20  ;;  %v2088_v47 = vadd.f32 -1.4531521, %v2086_v21  ;;  %v1515_v20 = vld [vmem:[%s4304_s10] sm:$0x3] }
 0x47f   : > { %v2091_v22 = vadd.f32 1.4214138, %v2089_v44  ;;  %v2090_v23 = vmul.f32 %v2898_v54, %v2088_v47 }
 0x481   : > { %v2093_v59 = vmul.f32 %v2896_v18, %v2091_v22  ;;  %v2092_v24 = vadd.f32 1.4214138, %v2090_v23 }
 0x483   : > { %v2095_v25 = vadd.f32 -0.28449672, %v2093_v59  ;;  %v2094_v26 = vmul.f32 %v2898_v54, %v2092_v24 }
 0x485   : > { %v2097_v29 = vmul.f32 %v2896_v18, %v2095_v25  ;;  %v2096_v30 = vadd.f32 -0.28449672, %v2094_v26 }
 0x487   : > { %v2099_v60 = vadd.f32 0.2548296, %v2097_v29  ;;  %v2098_v13 = vmul.f32 %v2898_v54, %v2096_v30 }
 0x489   : > { %v2101_v31 = vmul.f32 %v2896_v18, %v2099_v60  ;;  %v2100_v49 = vadd.f32 0.2548296, %v2098_v13 }
 0x48b   : > { %v2111_v32 = vmul.f32 %v2900_v40, %v2101_v31  ;;  %v2102_v43 = vmul.f32 %v2898_v54, %v2100_v49 }
 0x48d   : > { %v2113_v33 = vsub.f32 1.0, %v2111_v32  ;;  %v2112_v6 = vmul.f32 %v2902_v48, %v2102_v43 }
 0x48f   : > { %v2117_v42 = vsub.f32 0.0, %v2113_v33  ;;  %v2114_v55 = vsub.f32 1.0, %v2112_v6 }
 0x491   : > { %v2119_v58 = vsel %vm2115_vm8, %v2113_v33, %v2117_v42  ;;  %v2118_v63 = vsub.f32 0.0, %v2114_v55  ;;  %v2181_v42 = vld [vmem:[%s4314_s20] sm:$0x3] }
 0x492   : > { %v2121_v52 = vadd.f32 1.0, %v2119_v58 }
 0x493   : > { %v2120_v0 = vsel %vm2116_vm2, %v2114_v55, %v2118_v63  ;;  %v2818_v55 = vld [vmem:[%s4314_s20 + $0x2] sm:$0x3] }
 0x494   : > { %v2122_v50 = vadd.f32 1.0, %v2120_v0  ;;  %v2123_v7 = vmul.f32 %v2121_v52, %v2073_v62  ;;  %v2186_v52 = vrot.slane %v2181_v42, %v3616_v9  ;;  %v2190_v62 = vrot.slane %v2181_v42, %v3628_v12 }
 0x495   : > { %v2336_v0 = vrot.slane %v2818_v55, %v3628_v12 }
 0x496   : > { %v2124_v3 = vmul.f32 %v2122_v50, %v2074_v35  ;;  %v2129_v11 = vadd.f32 %v2125_v61, %v2123_v7  ;;  %v2332_v61 = vrot.slane %v2818_v55, %v3616_v9 }
 0x498   : > { %v2130_v10 = vadd.f32 %v2127_v46, %v2124_v3 }
 0x49a   : > { %2767 = vmatprep.mubr.msk.f32.mxu0 %vm1747_vm0, %v2130_v10  ;;  %2821 = vmatprep.mubr.msk.f32.mxu1 %vm1747_vm0, %v2130_v10 }
 0x49b   : > { %2267 = vmatmul.mubr.f32.vlgmr.msra.gmra.mxu0 %v2129_v11  ;;  %2410 = vmatmul.mubr.f32.vlgmr.msra.gmra.mxu1 %v2129_v11 }
 0x49c   : > { %2496 = vmatprep.mubr.f32.mxu0 %v2932_v2  ;;  %2576 = vmatprep.mubr.f32.mxu1 %v2932_v2 }
 0x4a7   : > { %v1511_v4 = vpop.xlane.xlu0 %1510 }
 0x4a8   : > { %v1513_v1 = vmul.f32 0.0051020407, %v1511_v4 }
 0x4aa   : > { %v1524_v39 = vrot.slane %v1513_v1, %v3628_v12  ;;  %v1519_v14 = vrot.slane %v1513_v1, %v3616_v9  ;;  %v1534_v15 = vrot.slane %v1513_v1, %v1533_v37  ;;  %v1544_v17 = vrot.slane %v1513_v1, %v1543_v16 }
 0x4ac   : > { %v1525_v53 = vmul.f32 %v1524_v39, %v1514_v38  ;;  %v1520_v28 = vmul.f32 %v1519_v14, %v1514_v38  ;;  %v1535_v2 = vmul.f32 %v1534_v15, %v1514_v38  ;;  %v1545_v18 = vmul.f32 %v1544_v17, %v1514_v38 }
 0x4ae   : > { %1527 = vrot.lane.b32.xlu1 %v1525_v53, %s4367_s5 }
 0x4b2   : > { %1537 = vrot.lane.b32.xlu1 %v1535_v2, %s4368_s29  ;;  %s4370_s29 = sshll.u32 %s4372_s30, 4 }
 0x4b3   : > { %s710_s6 = scalar_lea.vmem %s4317_s23, %s4370_s29 }
 0x4b6   : > { %1547 = vrot.lane.b32.xlu1 %v1545_v18, %s4369_s1 }
 0x520   : > { %v1528_v34 = vpop.permute.xlu1 %1527 }
 0x521   : > { %v1530_v19 = vadd.f32 %v1528_v34, %v1520_v28 }
 0x524   : > { %v1538_v41 = vpop.permute.xlu1 %1537 }
 0x525   : > { %v1540_v54 = vadd.f32 %v1538_v41, %v1530_v19  ;;  %v2420_v19 = vld [vmem:[%s4315_s21] sm:$0xf] }
 0x528   : > { %v1548_v21 = vpop.permute.xlu1 %1547 }
 0x529   : > { %v1550_v36 = vadd.f32 %v1548_v21, %v1540_v54 }
 0x52b   : > { %v1551_v44 = vadd.f32 %v1550_v36, %v1515_v20  ;;  %v1579_v20 = vld [vmem:[%s4305_s11 + $0x8] sm:$0xf] }
 0x52d   : > { %v1553_v47 = vmul.f32 0.70710677, %v1551_v44  ;;  %v1552_v50 = vmul.f32 0.5, %v1551_v44 }
 0x52f   : > { %v1554_v22 = vand.u32 2147483647, %v1553_v47  ;;  %vm1573_vm1 = vcmp.ge.f32.partialorder %v1553_v47, 0.0  ;;  %v1580_v47 = vld [vmem:[%s4306_s12] sm:$0xff] }
 0x531   : > { %v1555_v23 = vmul.f32 0.3275911, %v1554_v22  ;;  %v1567_v24 = vsub.f32 0.0, %v1554_v22 }
 0x533   : > { %v1556_v59 = vadd.f32 1.0, %v1555_v23  ;;  %v1568_v25 = vmul.f32 %v1567_v24, %v1554_v22 }
 0x535   : > { %2903 = vrcp.f32 %v1556_v59  ;;  %v1569_v29 = vmul.f32 1.442695, %v1568_v25  ;;  %v1581_v25 = vld [vmem:[%s4306_s12 + $0x8] sm:$0xf] }
 0x537   : > { %2905 = vpow2.f32 %v1569_v29 }
 0x542   : > { %v2904_v26 = vpop.eup %2903 }
 0x543   : > { %v1558_v30 = vmul.f32 1.0614054, %v2904_v26 }
 0x544   : > { %v2906_v33 = vpop.eup %2905 }
 0x545   : > { %v1559_v60 = vadd.f32 -1.4531521, %v1558_v30 }
 0x547   : > { %v1560_v13 = vmul.f32 %v2904_v26, %v1559_v60 }
 0x549   : > { %v1561_v31 = vadd.f32 1.4214138, %v1560_v13 }
 0x54b   : > { %v1562_v40 = vmul.f32 %v2904_v26, %v1561_v31 }
 0x54d   : > { %v1563_v49 = vadd.f32 -0.28449672, %v1562_v40 }
 0x54f   : > { %v1564_v32 = vmul.f32 %v2904_v26, %v1563_v49 }
 0x551   : > { %v1565_v43 = vadd.f32 0.2548296, %v1564_v32 }
 0x553   : > { %v1566_v48 = vmul.f32 %v2904_v26, %v1565_v43 }
 0x555   : > { %v1571_v6 = vmul.f32 %v2906_v33, %v1566_v48 }
 0x557   : > { %v1572_v58 = vsub.f32 1.0, %v1571_v6 }
 0x559   : > { %v1574_v63 = vsub.f32 0.0, %v1572_v58 }
 0x55b   : > { %v1575_v35 = vsel %vm1573_vm1, %v1572_v58, %v1574_v63  ;;  %v2268_v46 = vpop.f32.mrf.mxu0  ;;  %v2411_v7 = vpop.f32.mrf.mxu1 }
 0x55c   : > { %v1576_v3 = vadd.f32 1.0, %v1575_v35  ;;  %v2269_v10 = vadd.f32 %v2268_v46, %v2186_v52  ;;  %v2412_v11 = vadd.f32 %v2411_v7, %v2332_v61  ;;  %v2960_v46 = vmov 839922192  }
 0x55d   : > { %v2270_v4 = vpop.f32.mrf.mxu0  ;;  %v2413_v1 = vpop.f32.mrf.mxu1  ;;  %v1639_v7 = vunpack.c.l.s4 %v2960_v46 }
 0x55e   : > { %v1577_v37 = vmul.f32 %v1576_v3, %v1552_v50  ;;  %v2273_v38 = vmul.f32 %v2269_v10, %v3548_v56  ;;  %v2416_v39 = vmul.f32 %v2412_v11, %v3550_v57  ;;  %v2271_v14 = vadd.f32 %v2270_v4, %v2190_v62 }
 0x55f   : > { %v2414_v53 = vadd.f32 %v2413_v1, %v2336_v0  ;;  %v2961_v3 = vmov 1985246804   ;;  %v1640_v11 = vunpack.c.0.s8 %v1639_v7 }
 0x560   : > { %v1591_v15 = vrot.slane %v1577_v37, %v3628_v12  ;;  %v2418_v16 = vadd.f32 %v2416_v39, %v2273_v38  ;;  %v2274_v28 = vmul.f32 %v2271_v14, %v3548_v56  ;;  %v1578_v56 = vld [vmem:[%s4305_s11] sm:$0xff]  ;;  %v1585_v36 = vrot.slane %v1577_v37, %v3616_v9 }
 0x561   : > { %v2417_v2 = vmul.f32 %v2414_v53, %v3550_v57  ;;  %v1656_v10 = vunpack.c.l.s4 %v2961_v3  ;;  %v1643_v1 = vsub.s32 %v1640_v11, %v3609_v8 }
 0x562   : > { %1593 = vrot.lane.b32.xlu1 %v1591_v15, %s2959_s28  ;;  %v2423_v18 = vrot.slane %v2418_v16, 4  ;;  %v1586_v44 = vmul.f32 %v1585_v36, %v1578_v56  ;;  %v1587_v24 = vmul.f32 %v1585_v36, %v1579_v20 }
 0x563   : > { %v2419_v17 = vadd.f32 %v2417_v2, %v2274_v28  ;;  %v1657_v4 = vunpack.c.0.s8 %v1656_v10 }
 0x564   : > { %v2427_v12 = vsel %vm1423_vm13, %v3514_v45, %v2423_v18 }
 0x565   : > { %v2424_v34 = vrot.slane %v2419_v17, 4  ;;  %v1660_v14 = vsub.s32 %v1657_v4, %v3609_v8 }
 0x567   : > { %v2428_v41 = vsel %vm1423_vm13, %v3519_v51, %v2424_v34 }
 0x568   : > { %2462 = vmatprep.subr.mxu0 %v2428_v41 }
 0x569   : > { %2463 = vmatpush1.msra.mxu0 %v2427_v12 }
 0x56a   : > { %2822 = vmatmul.mubr.msk.f32.vlgmr.msra.gmra.mxu0 %vm927_vm12, %v2420_v19 }
 0x5d4   : > { %v1594_v57 = vpop.permute.xlu1 %1593 }
 0x5d5   : > { %v1596_v54 = vmul.f32 %v1594_v57, %v1578_v56  ;;  %v1597_v21 = vmul.f32 %v1594_v57, %v1579_v20 }
 0x5d7   : > { %1600 = vrot.lane.b32.xlu1 %v1596_v54, %s4367_s5 }
 0x5db   : > { %1602 = vrot.lane.b32.xlu1 %v1597_v21, %s4367_s5 }
 0x62a   : > { %v2498_v17 = vpop.f32.mrf.mxu0 }
 0x62c   : > { %v2500_v12 = vpop.f32.mrf.mxu0 }
 0x649   : > { %v1601_v22 = vpop.permute.xlu1 %1600 }
 0x64a   : > { %v1606_v23 = vadd.f32 %v1601_v22, %v1586_v44 }
 0x64c   : > { %v1608_v59 = vadd.f32 %v1606_v23, %v1580_v47 }
 0x64d   : > { %v1603_v26 = vpop.permute.xlu1 %1602 }
 0x64e   : > { %v1607_v29 = vadd.f32 %v1603_v26, %v1587_v24  ;;  %v1611_v30 = vrot.slane %v1608_v59, 4 }
 0x650   : > { %v1609_v60 = vadd.f32 %v1607_v29, %v1581_v25  ;;  %v1613_v13 = vmax.f32 %v1608_v59, %v1611_v30 }
 0x652   : > { %v1614_v31 = vmax.f32 %v1613_v13, %v1609_v60 }
 0x654   : > { %v1615_v9 = vsub.f32 %v1608_v59, %v1614_v31  ;;  %v1619_v40 = vrot.slane %v1614_v31, 4  ;;  %v1624_v32 = vsub.f32 %v1609_v60, %v1614_v31 }
 0x656   : > { %v1621_v49 = vsub.f32 %v1608_v59, %v1619_v40  ;;  %v1616_v43 = vmul.f32 1.442695, %v1615_v9  ;;  %v1625_v33 = vmul.f32 1.442695, %v1624_v32 }
 0x658   : > { %v1622_v48 = vmul.f32 1.442695, %v1621_v49 }
 0x65a   : > { %2907 = vpow2.f32 %v1622_v48 }
 0x65b   : > { %2909 = vpow2.f32 %v1616_v43 }
 0x65c   : > { %2911 = vpow2.f32 %v1625_v33 }
 0x667   : > { %v2908_v6 = vpop.eup %2907 }
 0x668   : > { %v1628_v42 = vrot.slane %v2908_v6, 4  ;;  %v2910_v55 = vpop.eup %2909 }
 0x669   : > { %v2912_v52 = vpop.eup %2911 }
 0x66a   : > { %v1630_v58 = vadd.f32 %v2910_v55, %v1628_v42 }
 0x66c   : > { %v1631_v61 = vadd.f32 %v2912_v52, %v1630_v58 }
 0x66e   : > { %2913 = vrcp.f32 %v1631_v61 }
 0x67b   : > { %v2914_v63 = vpop.eup %2913 }
 0x67c   : > { %v1665_v62 = vmul.f32 %v2914_v63, %v2912_v52  ;;  %v1633_v0 = vmul.f32 %v2914_v63, %v2910_v55  ;;  %v1648_v35 = vrot.slane %v2914_v63, 4 }
 0x67e   : > { %1668 = vperm.xlu0 %2875, %v1665_v62   ;;  %1636 = vperm.xlu1 %2876, %v1633_v0   ;;  %v1650_v50 = vmul.f32 %v2908_v6, %v1648_v35 }
 0x682   : > { %1653 = vperm.xlu1 %2876, %v1650_v50  }
 0x6f9   : > { %v1669_v37 = vpop.permute.xlu0 %1668  ;;  %v1637_v38 = vpop.permute.xlu1 %1636 }
 0x6fa   : > { %v1670_v39 = vrot.slane %v1669_v37, 4  ;;  %v1644_v53 = vrot.slane %v1637_v38, %v1643_v1 }
 0x6fc   : > { %v1672_v16 = vmul.f32 %v1670_v39, %v3514_v45  ;;  %v1673_v28 = vmul.f32 %v1670_v39, %v3519_v51  ;;  %v1646_v18 = vmul.f32 %v1644_v53, %v4158_v27  ;;  %v2503_v45 = vld [vmem:[%s4316_s22] sm:$0xff] }
 0x6fd   : > { %v1654_v15 = vpop.permute.xlu1 %1653 }
 0x6fe   : > { %v1661_v2 = vrot.slane %v1654_v15, %v1660_v14  ;;  %v1676_v41 = vcombine.high %v1672_v16, %v1673_v28 }
 0x700   : > { %v1663_v34 = vmul.f32 %v1661_v2, %v4150_v5 }
 0x702   : > { %v1664_v19 = vadd.f32 %v1663_v34, %v1646_v18 }
 0x704   : > { %v1678_v56 = vadd.f32 %v1676_v41, %v1664_v19 }
 0x706   : > { %v2505_v57 = vcombine.low %v1678_v56, %v1678_v56  ;;  %v2508_v8 = vsel %vm1423_vm13, %v2500_v12, %v1678_v56 }
 0x707   : > { %2542 = vmatprep.subr.mxu1 %v2508_v8 }
 0x708   : > { %v2507_v51 = vsel %vm1423_vm13, %v2498_v17, %v2505_v57 }
 0x709   : > { %2543 = vmatpush1.msra.mxu1 %v2507_v51 }
 0x70a   : > { %2823 = vmatmul.mubr.msk.f32.vlgmr.msra.gmra.mxu1 %vm927_vm12, %v2503_v45 }
 0x7ca   : > { %v2578_v5 = vpop.f32.mrf.mxu1 }
 0x7cb   : > { %2583 = vst [vmem:[%s710_s6] sm:$0xff] %v2578_v5 }
 0x7cc   : > { %v2580_v27 = vpop.f32.mrf.mxu1 }
 0x7cd   : > { %2584 = vst.msk [vmem:[%s710_s6 + $0x8] sm:$0xff] %vm1747_vm0, %v2580_v27 }
 0x7ce PF: > { %s33_s4 = sadd.s32 1, %s2921_s4  }
 0x7cf   : > { %p30_p4 = scmp.ge.s32.totalorder %s33_s4, 4  }
 0x7d1   :  { %32 = sbr.rel (!%p30_p4) target bundleno = 9 (0x9), region = 195 }

</bundles_post_ra>
